<compile_context>
chip_gen: v7x
topology: tpu7x:2x2x1
jax: 0.10.0
libtpu: 0.0.40
codegen_flags: <defaults>
</compile_context>

<pallas_src>
import functools

import jax
import jax.numpy as jnp
from jax.experimental import pallas as pl
from jax.experimental.pallas import tpu as pltpu


HIDDEN = 768          # t5-base hidden size (fixed by the module definition)
NUM_FEAT = 8          # numerical feature dim (small, synthetic)
INTER = 128           # numerical_feature_layer intermediate width
LN_EPS = 1e-5         # nn.LayerNorm default eps

# f32 bytes of the small weights held resident in VMEM.
_WEIGHT_BYTES = 4 * (NUM_FEAT * INTER + INTER + INTER * HIDDEN + HIDDEN
                     + 2 * HIDDEN + 2 * HIDDEN * HIDDEN + HIDDEN)

# Budget under which the whole per-batch (S, H) slab (double-buffered in + out)
# plus the resident weights comfortably fits scoped VMEM on every generation
# (v7x has only 64 MiB physical).
_FUSED_VMEM_BUDGET = 44 * 1024 * 1024
_VMEM_CAP = 56 << 20

_VMEM_SPEC = pl.BlockSpec(memory_space=pltpu.MemorySpace.VMEM)


def _seq_tile(seq_len, itemsize, target=1024):
    """Largest dtype-aligned seq tile <= target that divides seq_len.

    bf16 packs 16 sublanes per vreg and int8/fp8 pack 32, so the tile must be a
    multiple of 8/16/32 depending on itemsize.  If no clean divisor exists we
    fall back to an aligned tile and a cdiv grid with a masked tail (never a
    single whole-sequence block).
    """
    mult = {4: 8, 2: 16, 1: 32}.get(itemsize, 8)
    if seq_len <= target:
        return seq_len
    for t in range(target, mult - 1, -1):
        if seq_len % t == 0 and t % mult == 0:
            return t
    return target - (target % mult) if target % mult else target


# --------------------------------------------------------------------------
# Shared tiny-MLP / LayerNorm / combined-layer math (f32, runs on a (1, H) row).
# --------------------------------------------------------------------------
def _compute_comb(mean_state, nf_row, w1_ref, b1_ref, w2_ref, b2_ref,
                  g_ref, beta_ref, wc1_ref, wc2_ref, bc_ref):
    # numerical_feature_layer: Linear -> ReLU -> (Dropout=id) -> Linear -> LayerNorm
    x = jnp.dot(nf_row, w1_ref[...], preferred_element_type=jnp.float32) + b1_ref[...]
    x = jnp.maximum(x, 0.0)
    x = jnp.dot(x, w2_ref[...], preferred_element_type=jnp.float32) + b2_ref[...]
    mu = jnp.mean(x, axis=-1, keepdims=True)
    var = jnp.mean((x - mu) * (x - mu), axis=-1, keepdims=True)
    num_out = (x - mu) * jax.lax.rsqrt(var + LN_EPS) * g_ref[...] + beta_ref[...]

    # combined_layer on concat(mean_state, num_out): the 1536-wide weight is
    # split into two 768x768 halves so no concat is materialized.
    comb = (jnp.dot(mean_state, wc1_ref[...], preferred_element_type=jnp.float32)
            + jnp.dot(num_out, wc2_ref[...], preferred_element_type=jnp.float32)
            + bc_ref[...])
    return jnp.maximum(comb, 0.0)          # ReLU; Dropout(0.1) is identity in eval


# --------------------------------------------------------------------------
# Primary path: single-pass fused kernel, one grid step per batch element.
# --------------------------------------------------------------------------
def fused_kernel(h_ref, nf_ref, w1_ref, b1_ref, w2_ref, b2_ref,
                 g_ref, beta_ref, wc1_ref, wc2_ref, bc_ref, out_ref, *, seq_len):
    h = h_ref[...].astype(jnp.float32)                     # (1, S, H)
    mean_state = jnp.sum(h, axis=1) * (1.0 / seq_len)      # (1, H) f32
    nf_row = nf_ref[0].astype(jnp.float32)                 # (1, F)
    comb = _compute_comb(mean_state, nf_row, w1_ref, b1_ref, w2_ref, b2_ref,
                         g_ref, beta_ref, wc1_ref, wc2_ref, bc_ref)   # (1, H)
    # f32 add, cast once to the activation dtype (no double rounding for bf16).
    out_ref[...] = (h + comb[:, None, :]).astype(out_ref.dtype)


# --------------------------------------------------------------------------
# Fallback pass 1: tiled seq-reduce with the tiny MLP folded into the epilogue.
# --------------------------------------------------------------------------
def reduce_comb_kernel(h_ref, nf_ref, w1_ref, b1_ref, w2_ref, b2_ref,
                       g_ref, beta_ref, wc1_ref, wc2_ref, bc_ref,
                       comb_ref, sum_ref, *, seq_len, ts):
    s = pl.program_id(1)

    @pl.when(s == 0)
    def _():
        sum_ref[...] = jnp.zeros_like(sum_ref)

    h = h_ref[...].astype(jnp.float32)                     # (1, ts, H)
    if seq_len % ts:                                       # mask garbage tail rows
        row = jax.lax.broadcasted_iota(jnp.int32, (1, ts, 1), 1)
        h = jnp.where(row < (seq_len - s * ts), h, 0.0)
    sum_ref[...] += jnp.sum(h, axis=1, keepdims=True)

    @pl.when(s == pl.num_programs(1) - 1)
    def _():
        mean_state = sum_ref[0] * (1.0 / seq_len)          # (1, H)
        nf_row = nf_ref[0].astype(jnp.float32)             # (1, F)
        comb = _compute_comb(mean_state, nf_row, w1_ref, b1_ref, w2_ref, b2_ref,
                             g_ref, beta_ref, wc1_ref, wc2_ref, bc_ref)
        comb_ref[...] = comb[:, None, :]


# --------------------------------------------------------------------------
# Fallback pass 2: streamed broadcast-add, f32 accumulate, single cast.
# --------------------------------------------------------------------------
def broadcast_add_kernel(comb_ref, h_ref, out_ref):
    out_ref[...] = (h_ref[...].astype(jnp.float32) + comb_ref[...]).astype(out_ref.dtype)


def model_setup_forward(last_hidden_state, attention_mask, numerical_features, params):
    """Returns {'final state': ..., 'attention mask': ...} (labels=None path)."""
    B, S, H = last_hidden_state.shape
    assert H == HIDDEN
    itemsize = jnp.dtype(last_hidden_state.dtype).itemsize

    nf3 = numerical_features.reshape(B, 1, NUM_FEAT)
    weights = (params["w1"], params["b1"], params["w2"], params["b2"],
               params["ln_g"], params["ln_b"],
               params["wc1"], params["wc2"], params["bc"])

    slab_bytes = S * H * itemsize
    fused_need = 4 * slab_bytes + _WEIGHT_BYTES + (2 << 20)

    if fused_need <= _FUSED_VMEM_BUDGET:
        # Single pass: read last_hidden_state once, write final_state once.
        # NOTE(v7x): with B == 1 one TensorCore idles on this path; the two-pass
        # fallback (seq axis tiled) can be forced in that case if it matters.
        final_state = pl.pallas_call(
            functools.partial(fused_kernel, seq_len=S),
            out_shape=jax.ShapeDtypeStruct((B, S, H), last_hidden_state.dtype),
            grid=(B,),
            in_specs=[pl.BlockSpec((1, S, H), lambda b: (b, 0, 0)),
                      pl.BlockSpec((1, 1, NUM_FEAT), lambda b: (b, 0, 0))]
                     + [_VMEM_SPEC] * 9,
            out_specs=pl.BlockSpec((1, S, H), lambda b: (b, 0, 0)),
            input_output_aliases={0: 0},
            compiler_params=pltpu.CompilerParams(
                dimension_semantics=("parallel",),
                vmem_limit_bytes=min(_VMEM_CAP, max(32 << 20, fused_need + (8 << 20)))),
            cost_estimate=pl.CostEstimate(
                flops=4 * B * S * H + 4 * B * HIDDEN * HIDDEN,
                transcendentals=0,
                bytes_accessed=2 * B * S * H * itemsize + _WEIGHT_BYTES),
        )(last_hidden_state, nf3, *weights)
        return {"final state": final_state, "attention mask": attention_mask}

    # ---- fallback for very long sequences: two streamed passes ---------------
    ts = _seq_tile(S, itemsize)
    n_s = pl.cdiv(S, ts)
    tile_bytes = ts * H * itemsize

    comb = pl.pallas_call(
        functools.partial(reduce_comb_kernel, seq_len=S, ts=ts),
        out_shape=jax.ShapeDtypeStruct((B, 1, H), jnp.float32),
        grid=(B, n_s),
        in_specs=[pl.BlockSpec((1, ts, H), lambda b, s: (b, s, 0)),
                  pl.BlockSpec((1, 1, NUM_FEAT), lambda b, s: (b, 0, 0))]
                 + [_VMEM_SPEC] * 9,
        out_specs=pl.BlockSpec((1, 1, H), lambda b, s: (b, 0, 0)),
        scratch_shapes=[pltpu.VMEM((1, 1, H), jnp.float32)],
        compiler_params=pltpu.CompilerParams(
            dimension_semantics=("parallel", "arbitrary"),
            vmem_limit_bytes=min(_VMEM_CAP,
                                 max(32 << 20, 2 * tile_bytes + _WEIGHT_BYTES + (8 << 20)))),
        cost_estimate=pl.CostEstimate(
            flops=B * S * H + 4 * B * HIDDEN * HIDDEN, transcendentals=0,
            bytes_accessed=B * S * H * itemsize + B * H * 4 + _WEIGHT_BYTES),
    )(last_hidden_state, nf3, *weights)

    final_state = pl.pallas_call(
        broadcast_add_kernel,
        out_shape=jax.ShapeDtypeStruct((B, S, H), last_hidden_state.dtype),
        grid=(B, n_s),
        in_specs=[pl.BlockSpec((1, 1, H), lambda b, s: (b, 0, 0)),
                  pl.BlockSpec((1, ts, H), lambda b, s: (b, s, 0))],
        out_specs=pl.BlockSpec((1, ts, H), lambda b, s: (b, s, 0)),
        input_output_aliases={1: 0},
        compiler_params=pltpu.CompilerParams(
            dimension_semantics=("parallel", "parallel"),
            vmem_limit_bytes=min(_VMEM_CAP, max(32 << 20, 4 * tile_bytes + (8 << 20)))),
        cost_estimate=pl.CostEstimate(
            flops=B * S * H, transcendentals=0,
            bytes_accessed=2 * B * S * H * itemsize + B * H * 4),
    )(comb, last_hidden_state)

    return {"final state": final_state, "attention mask": attention_mask}


def init_params(key):
    ks = jax.random.split(key, 6)
    scale1 = 1.0 / jnp.sqrt(NUM_FEAT)
    scale2 = 1.0 / jnp.sqrt(INTER)
    scalec = 1.0 / jnp.sqrt(2 * HIDDEN)
    return {
        "w1": jax.random.uniform(ks[0], (NUM_FEAT, INTER), jnp.float32, -scale1, scale1),
        "b1": jnp.zeros((1, INTER), jnp.float32),
        "w2": jax.random.uniform(ks[1], (INTER, HIDDEN), jnp.float32, -scale2, scale2),
        "b2": jnp.zeros((1, HIDDEN), jnp.float32),
        "ln_g": jnp.ones((1, HIDDEN), jnp.float32),
        "ln_b": jnp.zeros((1, HIDDEN), jnp.float32),
        # combined_layer weight is (1536 -> 768); rows split into two 768x768 halves.
        "wc1": jax.random.uniform(ks[2], (HIDDEN, HIDDEN), jnp.float32, -scalec, scalec),
        "wc2": jax.random.uniform(ks[3], (HIDDEN, HIDDEN), jnp.float32, -scalec, scalec),
        "bc": jnp.zeros((1, HIDDEN), jnp.float32),
    }


if __name__ == "__main__":
    key = jax.random.PRNGKey(0)
    k_h, k_nf, k_p = jax.random.split(key, 3)

    B, S = 2, 8
    # Synthetic stand-in for the T5 encoder last_hidden_state.
    last_hidden_state = jax.random.normal(k_h, (B, S, HIDDEN), jnp.float32)
    attention_mask = jnp.ones((B, S), jnp.int32)
    numerical_features = jax.random.normal(k_nf, (B, NUM_FEAT), jnp.float32)
    params = init_params(k_p)

    # Pure-JAX reference (computed before the kernel since the kernel may alias
    # last_hidden_state's buffer in place).
    mean_state = jnp.mean(last_hidden_state, axis=1)
    x = jnp.maximum(numerical_features @ params["w1"] + params["b1"], 0.0)
    x = x @ params["w2"] + params["b2"]
    mu = jnp.mean(x, axis=-1, keepdims=True)
    var = jnp.mean((x - mu) ** 2, axis=-1, keepdims=True)
    num_out = (x - mu) * jax.lax.rsqrt(var + LN_EPS) * params["ln_g"] + params["ln_b"]
    comb = jnp.maximum(mean_state @ params["wc1"] + num_out @ params["wc2"] + params["bc"], 0.0)
    ref = last_hidden_state + comb[:, None, :]
    ref = jax.block_until_ready(ref)

    out = model_setup_forward(last_hidden_state, attention_mask, numerical_features, params)
    jax.block_until_ready(out["final state"])

    assert out["final state"].shape == (B, S, HIDDEN)
    assert jnp.allclose(out["final state"], ref, atol=1e-4, rtol=1e-4)
    print("KERNEL_OK")
</pallas_src>

<mosaic_0001>
module attributes {stable_mosaic.version = 11 : i64} {
  func.func @fused_kernel(%arg0: i32, %arg1: memref<1x8x768xf32, #tpu.memory_space<vmem>>, %arg2: memref<1x1x8xf32, #tpu.memory_space<vmem>>, %arg3: memref<8x128xf32, #tpu.memory_space<vmem>>, %arg4: memref<1x128xf32, #tpu.memory_space<vmem>>, %arg5: memref<128x768xf32, #tpu.memory_space<vmem>>, %arg6: memref<1x768xf32, #tpu.memory_space<vmem>>, %arg7: memref<1x768xf32, #tpu.memory_space<vmem>>, %arg8: memref<1x768xf32, #tpu.memory_space<vmem>>, %arg9: memref<768x768xf32, #tpu.memory_space<vmem>>, %arg10: memref<768x768xf32, #tpu.memory_space<vmem>>, %arg11: memref<1x768xf32, #tpu.memory_space<vmem>>, %arg12: memref<1x8x768xf32, #tpu.memory_space<vmem>>) attributes {dimension_semantics = [#tpu.dimension_semantics<parallel>], iteration_bounds = array<i64: 2>, scalar_prefetch = 0 : i64, scratch_operands = 0 : i64, tpu.core_type = #tpu.core_type<tc>, window_params = [{transform_indices = @transform_0, window_bounds = array<i64: 1, 8, 768>}, {transform_indices = @transform_1, window_bounds = array<i64: 1, 1, 8>}, {pipeline_mode = #tpu.pipeline_mode<synchronous>, transform_indices = @transform_2, window_bounds = array<i64: 8, 128>}, {pipeline_mode = #tpu.pipeline_mode<synchronous>, transform_indices = @transform_3, window_bounds = array<i64: 1, 128>}, {pipeline_mode = #tpu.pipeline_mode<synchronous>, transform_indices = @transform_4, window_bounds = array<i64: 128, 768>}, {pipeline_mode = #tpu.pipeline_mode<synchronous>, transform_indices = @transform_5, window_bounds = array<i64: 1, 768>}, {pipeline_mode = #tpu.pipeline_mode<synchronous>, transform_indices = @transform_6, window_bounds = array<i64: 1, 768>}, {pipeline_mode = #tpu.pipeline_mode<synchronous>, transform_indices = @transform_7, window_bounds = array<i64: 1, 768>}, {pipeline_mode = #tpu.pipeline_mode<synchronous>, transform_indices = @transform_8, window_bounds = array<i64: 768, 768>}, {pipeline_mode = #tpu.pipeline_mode<synchronous>, transform_indices = @transform_9, window_bounds = array<i64: 768, 768>}, {pipeline_mode = #tpu.pipeline_mode<synchronous>, transform_indices = @transform_10, window_bounds = array<i64: 1, 768>}, {transform_indices = @transform_11, window_bounds = array<i64: 1, 8, 768>}]} {
    %c0 = arith.constant 0 : index
    %c0_0 = arith.constant 0 : index
    %c0_1 = arith.constant 0 : index
    %0 = vector.load %arg1[%c0, %c0_0, %c0_1] : memref<1x8x768xf32, #tpu.memory_space<vmem>>, vector<1x8x768xf32>
    %cst = arith.constant dense<0.000000e+00> : vector<1x768xf32>
    %1 = vector.multi_reduction <add>, %0, %cst [1] : vector<1x8x768xf32> to vector<1x768xf32>
    %cst_2 = arith.constant 1.250000e-01 : f32
    %2 = vector.broadcast %cst_2 : f32 to vector<1x768xf32>
    %3 = arith.mulf %1, %2 : vector<1x768xf32>
    %c0_3 = arith.constant 0 : index
    %c0_4 = arith.constant 0 : index
    %c0_5 = arith.constant 0 : index
    %4 = vector.load %arg2[%c0_3, %c0_4, %c0_5] : memref<1x1x8xf32, #tpu.memory_space<vmem>>, vector<1x1x8xf32>
    %5 = vector.shape_cast %4 : vector<1x1x8xf32> to vector<1x8xf32>
    %c0_6 = arith.constant 0 : index
    %c0_7 = arith.constant 0 : index
    %6 = vector.load %arg3[%c0_6, %c0_7] : memref<8x128xf32, #tpu.memory_space<vmem>>, vector<8x128xf32>
    %cst_8 = arith.constant dense<0.000000e+00> : vector<1x128xf32>
    %7 = tpu.matmul %5, %6, %cst_8 {dimension_numbers = #tpu.dot_dimension_numbers<[1], [0], [0], [1], [0, 0, 1, 1], [], []>} : vector<1x8xf32>, vector<8x128xf32>, vector<1x128xf32> -> vector<1x128xf32>
    %c0_9 = arith.constant 0 : index
    %c0_10 = arith.constant 0 : index
    %8 = vector.load %arg4[%c0_9, %c0_10] : memref<1x128xf32, #tpu.memory_space<vmem>>, vector<1x128xf32>
    %9 = arith.addf %7, %8 : vector<1x128xf32>
    %cst_11 = arith.constant 0.000000e+00 : f32
    %10 = vector.broadcast %cst_11 : f32 to vector<1x128xf32>
    %11 = arith.maximumf %9, %10 : vector<1x128xf32>
    %c0_12 = arith.constant 0 : index
    %c0_13 = arith.constant 0 : index
    %12 = vector.load %arg5[%c0_12, %c0_13] : memref<128x768xf32, #tpu.memory_space<vmem>>, vector<128x768xf32>
    %cst_14 = arith.constant dense<0.000000e+00> : vector<1x768xf32>
    %13 = tpu.matmul %11, %12, %cst_14 {dimension_numbers = #tpu.dot_dimension_numbers<[1], [0], [0], [1], [0, 0, 1, 1], [], []>} : vector<1x128xf32>, vector<128x768xf32>, vector<1x768xf32> -> vector<1x768xf32>
    %c0_15 = arith.constant 0 : index
    %c0_16 = arith.constant 0 : index
    %14 = vector.load %arg6[%c0_15, %c0_16] : memref<1x768xf32, #tpu.memory_space<vmem>>, vector<1x768xf32>
    %15 = arith.addf %13, %14 : vector<1x768xf32>
    %cst_17 = arith.constant dense<0.000000e+00> : vector<1xf32>
    %16 = vector.multi_reduction <add>, %15, %cst_17 [1] : vector<1x768xf32> to vector<1xf32>
    %17 = vector.shape_cast %16 : vector<1xf32> to vector<1x1xf32>
    %cst_18 = arith.constant 7.680000e+02 : f32
    %18 = vector.broadcast %cst_18 : f32 to vector<1x1xf32>
    %19 = arith.divf %17, %18 : vector<1x1xf32>
    %20 = vector.broadcast %19 : vector<1x1xf32> to vector<1x768xf32>
    %21 = arith.subf %15, %20 : vector<1x768xf32>
    %22 = vector.broadcast %19 : vector<1x1xf32> to vector<1x768xf32>
    %23 = arith.subf %15, %22 : vector<1x768xf32>
    %24 = arith.mulf %21, %23 : vector<1x768xf32>
    %cst_19 = arith.constant dense<0.000000e+00> : vector<1xf32>
    %25 = vector.multi_reduction <add>, %24, %cst_19 [1] : vector<1x768xf32> to vector<1xf32>
    %26 = vector.shape_cast %25 : vector<1xf32> to vector<1x1xf32>
    %cst_20 = arith.constant 7.680000e+02 : f32
    %27 = vector.broadcast %cst_20 : f32 to vector<1x1xf32>
    %28 = arith.divf %26, %27 : vector<1x1xf32>
    %29 = vector.broadcast %19 : vector<1x1xf32> to vector<1x768xf32>
    %30 = arith.subf %15, %29 : vector<1x768xf32>
    %cst_21 = arith.constant 9.99999974E-6 : f32
    %31 = vector.broadcast %cst_21 : f32 to vector<1x1xf32>
    %32 = arith.addf %28, %31 : vector<1x1xf32>
    %33 = math.rsqrt %32 : vector<1x1xf32>
    %34 = vector.broadcast %33 : vector<1x1xf32> to vector<1x768xf32>
    %35 = arith.mulf %30, %34 : vector<1x768xf32>
    %c0_22 = arith.constant 0 : index
    %c0_23 = arith.constant 0 : index
    %36 = vector.load %arg7[%c0_22, %c0_23] : memref<1x768xf32, #tpu.memory_space<vmem>>, vector<1x768xf32>
    %37 = arith.mulf %35, %36 : vector<1x768xf32>
    %c0_24 = arith.constant 0 : index
    %c0_25 = arith.constant 0 : index
    %38 = vector.load %arg8[%c0_24, %c0_25] : memref<1x768xf32, #tpu.memory_space<vmem>>, vector<1x768xf32>
    %39 = arith.addf %37, %38 : vector<1x768xf32>
    %c0_26 = arith.constant 0 : index
    %c0_27 = arith.constant 0 : index
    %40 = vector.load %arg9[%c0_26, %c0_27] : memref<768x768xf32, #tpu.memory_space<vmem>>, vector<768x768xf32>
    %cst_28 = arith.constant dense<0.000000e+00> : vector<1x768xf32>
    %41 = tpu.matmul %3, %40, %cst_28 {dimension_numbers = #tpu.dot_dimension_numbers<[1], [0], [0], [1], [0, 0, 1, 1], [], []>} : vector<1x768xf32>, vector<768x768xf32>, vector<1x768xf32> -> vector<1x768xf32>
    %c0_29 = arith.constant 0 : index
    %c0_30 = arith.constant 0 : index
    %42 = vector.load %arg10[%c0_29, %c0_30] : memref<768x768xf32, #tpu.memory_space<vmem>>, vector<768x768xf32>
    %cst_31 = arith.constant dense<0.000000e+00> : vector<1x768xf32>
    %43 = tpu.matmul %39, %42, %cst_31 {dimension_numbers = #tpu.dot_dimension_numbers<[1], [0], [0], [1], [0, 0, 1, 1], [], []>} : vector<1x768xf32>, vector<768x768xf32>, vector<1x768xf32> -> vector<1x768xf32>
    %44 = arith.addf %41, %43 : vector<1x768xf32>
    %c0_32 = arith.constant 0 : index
    %c0_33 = arith.constant 0 : index
    %45 = vector.load %arg11[%c0_32, %c0_33] : memref<1x768xf32, #tpu.memory_space<vmem>>, vector<1x768xf32>
    %46 = arith.addf %44, %45 : vector<1x768xf32>
    %cst_34 = arith.constant 0.000000e+00 : f32
    %47 = vector.broadcast %cst_34 : f32 to vector<1x768xf32>
    %48 = arith.maximumf %46, %47 : vector<1x768xf32>
    %49 = vector.shape_cast %48 : vector<1x768xf32> to vector<1x1x768xf32>
    %50 = vector.broadcast %49 : vector<1x1x768xf32> to vector<1x8x768xf32>
    %51 = arith.addf %0, %50 : vector<1x8x768xf32>
    %c0_35 = arith.constant 0 : index
    %c0_36 = arith.constant 0 : index
    %c0_37 = arith.constant 0 : index
    %52 = vector.load %arg12[%c0_35, %c0_36, %c0_37] : memref<1x8x768xf32, #tpu.memory_space<vmem>>, vector<1x8x768xf32>
    tpu.vector_store %arg12[%c0_35, %c0_36, %c0_37], %51 {strides = array<i32>} : memref<1x8x768xf32, #tpu.memory_space<vmem>>, vector<1x8x768xf32>,
    return
  }
  func.func @transform_0(%arg0: i32) -> (i32, i32, i32) {
    %c0_i32 = arith.constant 0 : i32
    %c0_i32_0 = arith.constant 0 : i32
    %c0_i32_1 = arith.constant 0 : i32
    return %arg0, %c0_i32, %c0_i32_0 : i32, i32, i32
  }
  func.func @transform_1(%arg0: i32) -> (i32, i32, i32) {
    %c0_i32 = arith.constant 0 : i32
    %c0_i32_0 = arith.constant 0 : i32
    %c0_i32_1 = arith.constant 0 : i32
    return %arg0, %c0_i32, %c0_i32_0 : i32, i32, i32
  }
  func.func @transform_2(%arg0: i32) -> (i32, i32) {
    %c0_i32 = arith.constant 0 : i32
    %c0_i32_0 = arith.constant 0 : i32
    %c0_i32_1 = arith.constant 0 : i32
    return %c0_i32, %c0_i32_0 : i32, i32
  }
  func.func @transform_3(%arg0: i32) -> (i32, i32) {
    %c0_i32 = arith.constant 0 : i32
    %c0_i32_0 = arith.constant 0 : i32
    %c0_i32_1 = arith.constant 0 : i32
    return %c0_i32, %c0_i32_0 : i32, i32
  }
  func.func @transform_4(%arg0: i32) -> (i32, i32) {
    %c0_i32 = arith.constant 0 : i32
    %c0_i32_0 = arith.constant 0 : i32
    %c0_i32_1 = arith.constant 0 : i32
    return %c0_i32, %c0_i32_0 : i32, i32
  }
  func.func @transform_5(%arg0: i32) -> (i32, i32) {
    %c0_i32 = arith.constant 0 : i32
    %c0_i32_0 = arith.constant 0 : i32
    %c0_i32_1 = arith.constant 0 : i32
    return %c0_i32, %c0_i32_0 : i32, i32
  }
  func.func @transform_6(%arg0: i32) -> (i32, i32) {
    %c0_i32 = arith.constant 0 : i32
    %c0_i32_0 = arith.constant 0 : i32
    %c0_i32_1 = arith.constant 0 : i32
    return %c0_i32, %c0_i32_0 : i32, i32
  }
  func.func @transform_7(%arg0: i32) -> (i32, i32) {
    %c0_i32 = arith.constant 0 : i32
    %c0_i32_0 = arith.constant 0 : i32
    %c0_i32_1 = arith.constant 0 : i32
    return %c0_i32, %c0_i32_0 : i32, i32
  }
  func.func @transform_8(%arg0: i32) -> (i32, i32) {
    %c0_i32 = arith.constant 0 : i32
    %c0_i32_0 = arith.constant 0 : i32
    %c0_i32_1 = arith.constant 0 : i32
    return %c0_i32, %c0_i32_0 : i32, i32
  }
  func.func @transform_9(%arg0: i32) -> (i32, i32) {
    %c0_i32 = arith.constant 0 : i32
    %c0_i32_0 = arith.constant 0 : i32
    %c0_i32_1 = arith.constant 0 : i32
    return %c0_i32, %c0_i32_0 : i32, i32
  }
  func.func @transform_10(%arg0: i32) -> (i32, i32) {
    %c0_i32 = arith.constant 0 : i32
    %c0_i32_0 = arith.constant 0 : i32
    %c0_i32_1 = arith.constant 0 : i32
    return %c0_i32, %c0_i32_0 : i32, i32
  }
  func.func @transform_11(%arg0: i32) -> (i32, i32, i32) {
    %c0_i32 = arith.constant 0 : i32
    %c0_i32_0 = arith.constant 0 : i32
    %c0_i32_1 = arith.constant 0 : i32
    return %arg0, %c0_i32, %c0_i32_0 : i32, i32, i32
  }
}

</mosaic_0001>

<bundles_post_ra>
// kernel: tpu_custom_call.1
= control target key start
LH: loop header
LB: loop body
LE: loop exit
PB: predicated region body
PF: predicated region fallthrough
CT: control target
= control target key end

     0   :  { %s6447_s0 = inlined_call_operand.hbm [shape: f32[2,8,768], index: 0, kind: input, shape index: {}, may-alias: {0,11}]   ;;  %s6448_s1 = inlined_call_operand.hbm [shape: f32[2,1,8], index: 1, kind: input, shape index: {}]   ;;  %s6449_s2 = inlined_call_operand.hbm [shape: f32[8,128], index: 2, kind: input, shape index: {}]   ;;  %s6450_s3 = inlined_call_operand.hbm [shape: f32[1,128], index: 3, kind: input, shape index: {}]   ;;  %s6451_s4 = inlined_call_operand.hbm [shape: f32[128,768], index: 4, kind: input, shape index: {}]   ;;  %s6452_s5 = inlined_call_operand.hbm [shape: f32[1,768], index: 5, kind: input, shape index: {}]   ;;  %s6453_s6 = inlined_call_operand.hbm [shape: f32[1,768], index: 6, kind: input, shape index: {}]   ;;  %s6454_s7 = inlined_call_operand.hbm [shape: f32[1,768], index: 7, kind: input, shape index: {}]   ;;  %s6455_s8 = inlined_call_operand.hbm [shape: f32[768,768], index: 8, kind: input, shape index: {}]   ;;  %s6456_s9 = inlined_call_operand.hbm [shape: f32[768,768], index: 9, kind: input, shape index: {}]   ;;  %s6457_s10 = inlined_call_operand.hbm [shape: f32[1,768], index: 10, kind: input, shape index: {}]   ;;  %s6458_s11 = inlined_call_operand.hbm [shape: f32[2,8,768], index: 11, kind: output, shape index: {}, may-alias: {0,11}]  }
   0x1   :  { %6465 = sst [smem:[#allocation30_spill]] %s6447_s0 }
   0x2   :  { %6466 = sst [smem:[#allocation31_spill]] %s6449_s2 }
   0x3   :  { %6467 = sst [smem:[#allocation32_spill]] %s6450_s3 }
   0x4   :  { %6468 = sst [smem:[#allocation33_spill]] %s6451_s4 }
   0x5   :  { %6469 = sst [smem:[#allocation34_spill]] %s6458_s11 }
   0x6   :  { %16 = vsyncpa [#allocation3], 0 }
   0x7   :  { %18 = vsyncpa [#allocation3 + $0x1], 0 }
   0x8   :  { %19 = vsyncpa [#allocation6], 0 }
   0x9   :  { %21 = vsyncpa [#allocation6 + $0x1], 0 }
   0xa   :  { %22 = vsyncpa [#allocation9], 0 }
   0xb   :  { %23 = vsyncpa [#allocation12], 0 }
   0xc   :  { %24 = vsyncpa [#allocation15], 0 }
   0xd   :  { %25 = vsyncpa [#allocation18], 0 }
   0xe   :  { %26 = vsyncpa [#allocation4], 0 }
   0xf   :  { %28 = vsyncpa [#allocation4 + $0x1], 0  ;;  %s5799_s17 = smov 0   ;;  %s5801_s18 = smov 0  }
  0x10   :  { %s5803_s19 = smov 0   ;;  %s5805_s20 = smov 0  }
  0x11 LB: > { %s5723_s21 = smov [#allocation7]   ;;  %s5820_s23 = sadd.s32 4294967295, %s5721_s20   ;;  %s5721_s20 = sphi %s5805_s20, %s6504_s20   ;;  %s5717_s19 = sphi %s5803_s19, %s6503_s19   ;;  %s5713_s18 = sphi %s5801_s18, %s6502_s18   ;;  %s5709_s17 = sphi %s5799_s17, %s6501_s17  }
  0x12   : > { %s319_s22 = sshll.u32 %s5723_s21, 4  ;;  %p3849_p0 = scmp.ge.s32.totalorder %s5721_s20, 1  ;;  %s5825_s22 = int_to_ptr.vmem [resolvable:$true] %s319_s22 }
  0x13   : > { %p6461_p1 = scmp.eq.s32.totalorder %s5820_s23, 0  ;;  %p306_p2 = scmp.lt.s32.totalorder %s5721_s20, 3 }
  0x14   : > { %s5724_s25 = smov [#allocation8]   ;;  %s5725_s27 = smov [#allocation11]  }
  0x15   : > { %p5827_p3 = pnand %p3849_p0, %p306_p2  ;;  %s330_s26 = sshll.u32 %s5724_s25, 4  ;;  %s5834_s26 = int_to_ptr.vmem [resolvable:$true] %s330_s26 }
  0x16   : > { %s354_s28 = sshll.u32 %s5725_s27, 4  ;;  %s5726_s30 = smov [#allocation14]   ;;  %s5842_s28 = int_to_ptr.vmem [resolvable:$true] %s354_s28 }
  0x17   : > { %s6470_s24 = scalar_select %p5827_p3, 1, 0 }
  0x18   : > { %p5207_p5 = pneg %p5827_p3  ;;  %s5844_s12 = sshll.u32 %s5726_s30, 4  ;;  %s377_s12 = int_to_ptr.vmem [resolvable:$true] %s5844_s12 }
  0x19   : > { %6471 = sst [smem:[#allocation29_spill]] %s6470_s24  ;;  %s6473_s2 = sld [smem:[#allocation31_spill]] }
  0x1a   : > { %p5838_p6 = pnand %p5207_p5, %p6461_p1 }
  0x1c   : > { %p5854_p8 = pneg %p5838_p6 }
  0x1f   : > { %s5319_s15 = scalar_lea.hbm %s6473_s2, 128 }
  0x20   : > { %p5320_p7 = scmp.ne.s32.totalorder %s6473_s2, %s5319_s15  ;;  %p5326_p11 = scmp.lt.u32.totalorder %s5319_s15, %s6473_s2 }
  0x22   : > { %p5322_p9 = pnand %p5854_p8, %p5320_p7 }
  0x24   : > { %p5323_p10 = pneg %p5322_p9 }
  0x26   : > { %p5328_p12 = pnand %p5326_p11, %p5323_p10 }
  0x28   : > { %5331 = shalt.err (!%p5328_p12)
}
  0x29   : > { %s5332_s13 = scalar_lea.vmem %s5825_s22, 128  ;;  %p5340_p5 = scmp.lt.s32.totalorder %s5825_s22, %s5825_s22 }
  0x2a   : > { %p5333_p13 = scmp.ne.s32.totalorder %s5825_s22, %s5332_s13  ;;  %p5341_p4 = scmp.lt.s32.totalorder %s5332_s13, %s5332_s13 }
  0x2c   : > { %p5335_p0 = pnand %p5333_p13, %p5854_p8  ;;  %p5342_p7 = por %p5341_p4, %p5340_p5 }
  0x2e   : > { %p5336_p2 = pneg %p5335_p0 }
  0x30   : > { %p5343_p9 = pnand %p5342_p7, %p5336_p2 }
  0x32   : > { %5346 = shalt.err (!%p5343_p9)
}
  0x33   : > { %5210 = dma.hbm_to_vmem [thread:$0]  (!%p5838_p6), %s6473_s2, 128, %s5825_s22, [#allocation6]  }
  0x34   : > { %s6475_s3 = sld [smem:[#allocation32_spill]] }
  0x3a   : > { %s5347_s27 = scalar_lea.hbm %s6475_s3, 16 }
  0x3b   : > { %p5348_p10 = scmp.ne.s32.totalorder %s6475_s3, %s5347_s27  ;;  %p5354_p12 = scmp.lt.u32.totalorder %s5347_s27, %s6475_s3 }
  0x3d   : > { %p5350_p4 = pnand %p5348_p10, %p5854_p8 }
  0x3f   : > { %p5351_p11 = pneg %p5350_p4 }
  0x41   : > { %p5356_p13 = pnand %p5354_p12, %p5351_p11 }
  0x43   : > { %5359 = shalt.err (!%p5356_p13)
}
  0x44   : > { %s5360_s22 = scalar_lea.vmem %s5834_s26, 16  ;;  %s5367_s11 = scalar_lea.vmem %s5834_s26, 32 }
  0x45   : > { %p5361_p0 = scmp.ne.s32.totalorder %s5834_s26, %s5360_s22  ;;  %p5368_p7 = scmp.lt.s32.totalorder %s5834_s26, %s5834_s26 }
  0x46   : > { %p5369_p9 = scmp.lt.s32.totalorder %s5367_s11, %s5360_s22 }
  0x47   : > { %p5363_p2 = pnand %p5361_p0, %p5854_p8 }
  0x48   : > { %p5370_p10 = por %p5369_p9, %p5368_p7 }
  0x49   : > { %p5364_p5 = pneg %p5363_p2 }
  0x4b   : > { %p5371_p4 = pnand %p5370_p10, %p5364_p5 }
  0x4d   : > { %5374 = shalt.err (!%p5371_p4)
}
  0x4e   : > { %5213 = dma.hbm_to_vmem [thread:$0]  (!%p5838_p6), %s6475_s3, 16, %s5834_s26, [#allocation9]  }
  0x4f   : > { %s5375_s21 = scalar_lea.hbm %s6452_s5, 96 }
  0x50   : > { %p5376_p11 = scmp.ne.s32.totalorder %s6452_s5, %s5375_s21  ;;  %p5382_p0 = scmp.lt.u32.totalorder %s5375_s21, %s6452_s5 }
  0x52   : > { %p5378_p12 = pnand %p5376_p11, %p5854_p8 }
  0x54   : > { %p5379_p13 = pneg %p5378_p12 }
  0x56   : > { %p5384_p2 = pnand %p5382_p0, %p5379_p13 }
  0x58   : > { %5387 = shalt.err (!%p5384_p2)
}
  0x59   : > { %s5388_s26 = scalar_lea.vmem %s5842_s28, 96  ;;  %p5396_p10 = scmp.lt.s32.totalorder %s5842_s28, %s5842_s28 }
  0x5a   : > { %p5389_p5 = scmp.ne.s32.totalorder %s5842_s28, %s5388_s26  ;;  %p5397_p4 = scmp.lt.s32.totalorder %s5388_s26, %s5388_s26 }
  0x5c   : > { %p5391_p7 = pnand %p5389_p5, %p5854_p8  ;;  %p5398_p11 = por %p5397_p4, %p5396_p10 }
  0x5e   : > { %p5392_p9 = pneg %p5391_p7 }
  0x60   : > { %p5399_p12 = pnand %p5398_p11, %p5392_p9 }
  0x62   : > { %5402 = shalt.err (!%p5399_p12)
}
  0x63   : > { %5219 = dma.hbm_to_vmem [thread:$0]  (!%p5838_p6), %s6452_s5, 96, %s5842_s28, [#allocation12]  }
  0x64   : > { %s5403_s16 = scalar_lea.hbm %s6454_s7, 96 }
  0x65   : > { %p5404_p13 = scmp.ne.s32.totalorder %s6454_s7, %s5403_s16  ;;  %p5410_p5 = scmp.lt.u32.totalorder %s5403_s16, %s6454_s7 }
  0x67   : > { %p5406_p0 = pnand %p5404_p13, %p5854_p8 }
  0x69   : > { %p5407_p2 = pneg %p5406_p0 }
  0x6b   : > { %p5412_p7 = pnand %p5410_p5, %p5407_p2 }
  0x6d   : > { %5415 = shalt.err (!%p5412_p7)
}
  0x6e   : > { %s5416_s22 = scalar_lea.vmem %s377_s12, 96  ;;  %p5424_p11 = scmp.lt.s32.totalorder %s377_s12, %s377_s12 }
  0x6f   : > { %p5417_p9 = scmp.ne.s32.totalorder %s377_s12, %s5416_s22  ;;  %p5425_p12 = scmp.lt.s32.totalorder %s5416_s22, %s5416_s22 }
  0x71   : > { %p5419_p10 = pnand %p5417_p9, %p5854_p8  ;;  %p5426_p1 = por %p5425_p12, %p5424_p11 }
  0x73   : > { %p5420_p4 = pneg %p5419_p10 }
  0x75   : > { %p5427_p3 = pnand %p5426_p1, %p5420_p4 }
  0x77   : > { %5430 = shalt.err (!%p5427_p3)
}
  0x78   : > { %5225 = dma.hbm_to_vmem [thread:$0]  (!%p5838_p6), %s6454_s7, 96, %s377_s12, [#allocation15]  }
  0x79   : > { %s5727_s11 = smov [#allocation17]   ;;  %s5728_s14 = smov [#allocation10]  }
  0x7a   : > { %s399_s24 = sshll.u32 %s5727_s11, 4  ;;  %s340_s15 = sshll.u32 %s5728_s14, 4  ;;  %s400_s24 = int_to_ptr.vmem [resolvable:$true] %s399_s24  ;;  %s5941_s15 = int_to_ptr.vmem [resolvable:$true] %s340_s15 }
  0x7b   : > { %s5431_s27 = scalar_lea.hbm %s6456_s9, 73728 }
  0x7c   : > { %p5432_p1 = scmp.ne.s32.totalorder %s6456_s9, %s5431_s27  ;;  %p5438_p0 = scmp.lt.u32.totalorder %s5431_s27, %s6456_s9 }
  0x7e   : > { %p5434_p3 = pnand %p5432_p1, %p5854_p8 }
  0x80   : > { %p5435_p13 = pneg %p5434_p3 }
  0x82   : > { %p5440_p2 = pnand %p5438_p0, %p5435_p13 }
  0x84   : > { %5443 = shalt.err (!%p5440_p2)
}
  0x85   : > { %s5444_s28 = scalar_lea.vmem %s400_s24, 73728  ;;  %p5452_p10 = scmp.lt.s32.totalorder %s400_s24, %s400_s24 }
  0x86   : > { %p5445_p5 = scmp.ne.s32.totalorder %s400_s24, %s5444_s28  ;;  %p5453_p4 = scmp.lt.s32.totalorder %s5444_s28, %s5444_s28 }
  0x88   : > { %p5447_p7 = pnand %p5445_p5, %p5854_p8  ;;  %p5454_p11 = por %p5453_p4, %p5452_p10 }
  0x8a   : > { %p5448_p9 = pneg %p5447_p7 }
  0x8c   : > { %p5455_p12 = pnand %p5454_p11, %p5448_p9 }
  0x8e   : > { %5458 = shalt.err (!%p5455_p12)
}
  0x8f   : > { %s5729_s26 = smov 768   ;;  %s5730_s11 = smov 48  }
  0x90   : > { %5231 = dma.hbm_to_vmem [thread:$0]  (!%p5838_p6), %s6456_s9, 73728, %s400_s24, [#allocation18], %s5729_s26, %s5729_s26, %s5730_s11  }
  0x91   : > { %s6476_s4 = sld [smem:[#allocation33_spill]] }
  0x97   : > { %s5459_s30 = scalar_lea.hbm %s6476_s4, 12288 }
  0x98   : > { %p5460_p1 = scmp.ne.s32.totalorder %s6476_s4, %s5459_s30  ;;  %p5466_p0 = scmp.lt.u32.totalorder %s5459_s30, %s6476_s4 }
  0x9a   : > { %p5462_p3 = pnand %p5460_p1, %p5854_p8 }
  0x9c   : > { %p5463_p13 = pneg %p5462_p3 }
  0x9e   : > { %p5468_p2 = pnand %p5466_p0, %p5463_p13 }
  0xa0   : > { %5471 = shalt.err (!%p5468_p2)
}
  0xa1   : > { %s5472_s24 = scalar_lea.vmem %s5941_s15, 12288  ;;  %p5480_p10 = scmp.lt.s32.totalorder %s5941_s15, %s5941_s15 }
  0xa2   : > { %p5473_p5 = scmp.ne.s32.totalorder %s5941_s15, %s5472_s24  ;;  %p5481_p4 = scmp.lt.s32.totalorder %s5472_s24, %s5472_s24 }
  0xa4   : > { %p5475_p7 = pnand %p5473_p5, %p5854_p8  ;;  %p5482_p11 = por %p5481_p4, %p5480_p10 }
  0xa6   : > { %p5476_p9 = pneg %p5475_p7 }
  0xa8   : > { %p5483_p12 = pnand %p5482_p11, %p5476_p9 }
  0xaa   : > { %5486 = shalt.err (!%p5483_p12)
}
  0xab   : > { %5216 = dma.hbm_to_vmem [thread:$0]  (!%p5838_p6), %s6476_s4, 12288, %s5941_s15, [#allocation9], %s5729_s26, %s5729_s26, %s5730_s11  }
  0xac   : > { %s5731_s21 = smov [#allocation13]   ;;  %s5732_s30 = smov [#allocation16]  }
  0xad   : > { %s365_s27 = sshll.u32 %s5731_s21, 4  ;;  %s386_s13 = sshll.u32 %s5732_s30, 4  ;;  %s366_s27 = int_to_ptr.vmem [resolvable:$true] %s365_s27  ;;  %s5990_s13 = int_to_ptr.vmem [resolvable:$true] %s386_s13 }
  0xae   : > { %s5487_s28 = scalar_lea.hbm %s6453_s6, 96 }
  0xaf   : > { %p5488_p1 = scmp.ne.s32.totalorder %s6453_s6, %s5487_s28  ;;  %p5494_p0 = scmp.lt.u32.totalorder %s5487_s28, %s6453_s6 }
  0xb1   : > { %p5490_p3 = pnand %p5488_p1, %p5854_p8 }
  0xb3   : > { %p5491_p13 = pneg %p5490_p3 }
  0xb5   : > { %p5496_p2 = pnand %p5494_p0, %p5491_p13 }
  0xb7   : > { %5499 = shalt.err (!%p5496_p2)
}
  0xb8   : > { %s5500_s16 = scalar_lea.vmem %s366_s27, 96  ;;  %p5508_p10 = scmp.lt.s32.totalorder %s366_s27, %s366_s27 }
  0xb9   : > { %p5501_p5 = scmp.ne.s32.totalorder %s366_s27, %s5500_s16  ;;  %p5509_p4 = scmp.lt.s32.totalorder %s5500_s16, %s5500_s16 }
  0xbb   : > { %p5503_p7 = pnand %p5501_p5, %p5854_p8  ;;  %p5510_p11 = por %p5509_p4, %p5508_p10 }
  0xbd   : > { %p5504_p9 = pneg %p5503_p7 }
  0xbf   : > { %p5511_p12 = pnand %p5510_p11, %p5504_p9 }
  0xc1   : > { %5514 = shalt.err (!%p5511_p12)
}
  0xc2   : > { %5222 = dma.hbm_to_vmem [thread:$0]  (!%p5838_p6), %s6453_s6, 96, %s366_s27, [#allocation12]  }
  0xc3   : > { %s5515_s12 = scalar_lea.hbm %s6455_s8, 73728 }
  0xc4   : > { %p5516_p1 = scmp.ne.s32.totalorder %s6455_s8, %s5515_s12  ;;  %p5522_p0 = scmp.lt.u32.totalorder %s5515_s12, %s6455_s8 }
  0xc6   : > { %p5518_p3 = pnand %p5516_p1, %p5854_p8 }
  0xc8   : > { %p5519_p13 = pneg %p5518_p3 }
  0xca   : > { %p5524_p2 = pnand %p5522_p0, %p5519_p13 }
  0xcc   : > { %5527 = shalt.err (!%p5524_p2)
}
  0xcd   : > { %s5528_s27 = scalar_lea.vmem %s5990_s13, 73728  ;;  %p5536_p10 = scmp.lt.s32.totalorder %s5990_s13, %s5990_s13 }
  0xce   : > { %p5529_p5 = scmp.ne.s32.totalorder %s5990_s13, %s5528_s27  ;;  %p5537_p4 = scmp.lt.s32.totalorder %s5528_s27, %s5528_s27 }
  0xd0   : > { %p5531_p7 = pnand %p5529_p5, %p5854_p8  ;;  %p5538_p11 = por %p5537_p4, %p5536_p10 }
  0xd2   : > { %p5532_p9 = pneg %p5531_p7 }
  0xd4   : > { %p5539_p12 = pnand %p5538_p11, %p5532_p9 }
  0xd6   : > { %5542 = shalt.err (!%p5539_p12)
}
  0xd7   : > { %5228 = dma.hbm_to_vmem [thread:$0]  (!%p5838_p6), %s6455_s8, 73728, %s5990_s13, [#allocation15], %s5729_s26, %s5729_s26, %s5730_s11  }
  0xd8   : > { %s5733_s21 = smov [#allocation19]   ;;  %s5543_s28 = scalar_lea.hbm %s6457_s10, 96 }
  0xd9   : > { %s413_s30 = sshll.u32 %s5733_s21, 4  ;;  %p5544_p1 = scmp.ne.s32.totalorder %s6457_s10, %s5543_s28  ;;  %s414_s30 = int_to_ptr.vmem [resolvable:$true] %s413_s30 }
  0xda   : > { %p5550_p0 = scmp.lt.u32.totalorder %s5543_s28, %s6457_s10 }
  0xdb   : > { %p5546_p3 = pnand %p5544_p1, %p5854_p8 }
  0xdd   : > { %p5547_p13 = pneg %p5546_p3 }
  0xdf   : > { %p5552_p2 = pnand %p5550_p0, %p5547_p13 }
  0xe1   : > { %5555 = shalt.err (!%p5552_p2)
}
  0xe2   : > { %s5556_s26 = scalar_lea.vmem %s414_s30, 96  ;;  %p5564_p10 = scmp.lt.s32.totalorder %s414_s30, %s414_s30 }
  0xe3   : > { %p5557_p5 = scmp.ne.s32.totalorder %s414_s30, %s5556_s26  ;;  %p5565_p4 = scmp.lt.s32.totalorder %s5556_s26, %s5556_s26 }
  0xe5   : > { %p5559_p7 = pnand %p5557_p5, %p5854_p8  ;;  %p5566_p11 = por %p5565_p4, %p5564_p10 }
  0xe7   : > { %p5560_p9 = pneg %p5559_p7 }
  0xe9   : > { %p5567_p12 = pnand %p5566_p11, %p5560_p9 }
  0xeb   : > { %5570 = shalt.err (!%p5567_p12)
}
  0xec   : > { %5234 = dma.hbm_to_vmem [thread:$0]  (!%p5838_p6), %s6457_s10, 96, %s414_s30, [#allocation18]  }
  0xed   : > { %s3848_s25 = sadd.s32 4294967294, %s5721_s20   ;;  %s6056_s29 = sadd.s32 1, %s5721_s20  }
  0xee   : > { %s41_s16 = sadd.s32 1, %s5717_s19  ;;  %s38_s2 = ssub.s32 %s5721_s20, %s6056_s29 }
  0xef   : > { %p48_p8 = scmp.ne.s32.totalorder %s5717_s19, %s5713_s18  ;;  %p39_p1 = scmp.eq.s32.totalorder %s38_s2, 0 }
  0xf0   : > { %p49_p3 = scmp.eq.s32.totalorder %s5721_s20, 0  ;;  %p54_p13 = scmp.ne.s32.totalorder %s5713_s18, %s5709_s17 }
  0xf1   : > { %p293_p0 = scmp.eq.s32.totalorder %s5820_s23, 1  ;;  %p6477_p5 = scmp.eq.s32.totalorder %s5820_s23, 0 }
  0xf2   : > { %s6068_s21 = scalar_select %p39_p1, %s5717_s19, %s41_s16  }
  0xf3   : > { %p50_p2 = por %p49_p3, %p48_p8  ;;  %p6072_p7 = por %p6477_p5, %p54_p13 }
  0xf4   : > { %p6076_p6 = por %p293_p0, %p48_p8  ;;  %p299_p9 = scmp.eq.s32.totalorder %s3848_s25, 1 }
  0xf5   : > { %s6478_s30 = scalar_select %p6072_p7, 1, 0 }
  0xf6   : > { %s6479_s22 = scalar_select %p6076_p6, 1, 0 }
  0xf7   : > { %p5255_p10 = scmp.lt.s32.totalorder %s5721_s20, 2  ;;  %s6082_s12 = sand.u32 1, %s5717_s19  }
  0xf8   : > { %p6084_p4 = por %p299_p9, %p54_p13  ;;  %s5161_s24 = smul.u32 48, %s6082_s12 }
  0xf9   : > { %p6089_p11 = pnand %p5255_p10, %p50_p2  ;;  %s5162_s15 = smul.u32 768, %s5721_s20 }
  0xfa   : > { %s6480_s28 = scalar_select %p6084_p4, 1, 0 }
  0xfb   : > { %s6482_s0 = sld [smem:[#allocation30_spill]]  ;;  %s428_s25 = scalar_lea.vmem [#allocation2], %s5161_s24 }
  0xfc   : > { %s436_s16 = sshll.u32 %s428_s25, 4  ;;  %s425_s2 = scalar_lea.sflag [#allocation3], %s6082_s12  ;;  %s6100_s16 = int_to_ptr.vmem [resolvable:$true] %s436_s16 }
  0xfd   : > { %p5573_p8 = pneg %p6089_p11 }
 0x101   : > { %s6098_s13 = scalar_lea.hbm %s6482_s0, %s5162_s15  ;;  %s5576_s11 = scalar_lea.hbm %s6482_s0, 1536 }
 0x102   : > { %s5571_s3 = scalar_lea.hbm %s6098_s13, 768  ;;  %p5577_p13 = scmp.lt.u32.totalorder %s6098_s13, %s6482_s0 }
 0x103   : > { %p5572_p12 = scmp.ne.s32.totalorder %s6098_s13, %s5571_s3  ;;  %p5578_p0 = scmp.lt.u32.totalorder %s5576_s11, %s5571_s3 }
 0x104   : > { %p5580_p5 = scmp.lt.u32.totalorder %s5571_s3, %s6098_s13 }
 0x105   : > { %p5574_p1 = pnand %p5573_p8, %p5572_p12  ;;  %p5579_p2 = por %p5578_p0, %p5577_p13 }
 0x107   : > { %p5575_p3 = pneg %p5574_p1  ;;  %p5581_p9 = por %p5580_p5, %p5579_p2 }
 0x109   : > { %p5582_p10 = pnand %p5581_p9, %p5575_p3 }
 0x10b   : > { %5585 = shalt.err (!%p5582_p10)
}
 0x10c   : > { %s5586_s24 = scalar_lea.vmem %s6100_s16, 768  ;;  %s5734_s25 = smov [#allocation2]  }
 0x10d   : > { %p5587_p12 = scmp.ne.s32.totalorder %s6100_s16, %s5586_s24  ;;  %s5591_s26 = sshll.u32 %s5734_s25, 4  ;;  %s5592_s26 = int_to_ptr.vmem [resolvable:$false] %s5591_s26 }
 0x10e   : > { %s5593_s4 = scalar_lea.vmem %s5592_s26, 1536  ;;  %p5594_p6 = scmp.lt.s32.totalorder %s6100_s16, %s5592_s26 }
 0x10f   : > { %p5589_p1 = pnand %p5587_p12, %p5573_p8  ;;  %p5595_p13 = scmp.lt.s32.totalorder %s5593_s4, %s5586_s24 }
 0x111   : > { %p5590_p4 = pneg %p5589_p1  ;;  %p5596_p0 = por %p5595_p13, %p5594_p6 }
 0x113   : > { %p5597_p2 = pnand %p5596_p0, %p5590_p4 }
 0x115   : > { %5600 = shalt.err (!%p5597_p2)
}
 0x116   : > { %5238 = dma.hbm_to_vmem [thread:$0]  (!%p6089_p11), %s6098_s13, 768, %s6100_s16, %s425_s2  }
 0x117   : > { %s3861_s3 = sshll.u32 %s5721_s20, 4  ;;  %s446_s24 = scalar_lea.vmem [#allocation5], %s6082_s12 }
 0x118   : > { %s6132_s11 = scalar_lea.hbm %s6448_s1, %s3861_s3  ;;  %s453_s25 = sshll.u32 %s446_s24, 4  ;;  %s454_s25 = int_to_ptr.vmem [resolvable:$true] %s453_s25 }
 0x119   : > { %s6483_s26 = sand.u32 1, %s5721_s20   ;;  %s5601_s0 = scalar_lea.hbm %s6132_s11, 16 }
 0x11a   : > { %s444_s4 = scalar_lea.sflag [#allocation6], %s6483_s26  ;;  %p5602_p6 = scmp.ne.s32.totalorder %s6132_s11, %s5601_s0 }
 0x11b   : > { %s5606_s2 = scalar_lea.hbm %s6448_s1, 32  ;;  %p5607_p5 = scmp.lt.u32.totalorder %s6132_s11, %s6448_s1 }
 0x11c   : > { %p5604_p4 = pnand %p5602_p6, %p5573_p8  ;;  %p5608_p9 = scmp.lt.u32.totalorder %s5606_s2, %s5601_s0 }
 0x11d   : > { %p5610_p12 = scmp.lt.u32.totalorder %s5601_s0, %s6132_s11 }
 0x11e   : > { %p5605_p3 = pneg %p5604_p4  ;;  %p5609_p10 = por %p5608_p9, %p5607_p5 }
 0x120   : > { %p5611_p1 = por %p5610_p12, %p5609_p10 }
 0x122   : > { %p5612_p13 = pnand %p5611_p1, %p5605_p3 }
 0x124   : > { %5615 = shalt.err (!%p5612_p13)
}
 0x125   : > { %s5616_s12 = scalar_lea.vmem %s454_s25, 16  ;;  %s5735_s15 = smov [#allocation5]  }
 0x126   : > { %p5617_p0 = scmp.ne.s32.totalorder %s454_s25, %s5616_s12  ;;  %s5621_s24 = sshll.u32 %s5735_s15, 4  ;;  %s5622_s24 = int_to_ptr.vmem [resolvable:$false] %s5621_s24 }
 0x127   : > { %s5623_s26 = scalar_lea.vmem %s5622_s24, 32  ;;  %p5624_p4 = scmp.lt.s32.totalorder %s454_s25, %s5622_s24 }
 0x128   : > { %p5619_p2 = pnand %p5617_p0, %p5573_p8  ;;  %p5625_p7 = scmp.lt.s32.totalorder %s5623_s26, %s5616_s12 }
 0x12a   : > { %p5620_p6 = pneg %p5619_p2  ;;  %p5626_p5 = por %p5625_p7, %p5624_p4 }
 0x12c   : > { %p5627_p9 = pnand %p5626_p5, %p5620_p6 }
 0x12e   : > { %5630 = shalt.err (!%p5627_p9)
}
 0x12f   : > { %5241 = dma.hbm_to_vmem [thread:$0]  (!%p6089_p11), %s6132_s11, 16, %s454_s25, %s444_s4  }
 0x130   : > { %s6484_s0 = sld [smem:[#allocation29_spill]] }
 0x136   : > { %p6485_p3 = scmp.ne.s32.totalorder %s6484_s0, 0 }
 0x137   : > { %s6159_s13 = sand.u32 (!%p6485_p3), 1, %s5713_s18   ;;  %p6486_p7 = scmp.ne.s32.totalorder (!%p6485_p3), %s6478_s30, 0 }
 0x138   : > { %462 = sbr.rel (%p6485_p3) target bundleno = 1881 (0x759), region = 64  ;;  %s465_s2 = scalar_lea.sflag (!%p6485_p3), [#allocation3], %s6159_s13 }
 0x139   : > { %s5163_s16 = smul.u32 (!%p6485_p3), 48, %s6159_s13 }
 0x13b   : > { %s6165_s3 = scalar_lea.vmem (!%p6485_p3), [#allocation2], %s5163_s16 }
 0x13f   : > { %5676 = dma.done.wait (%p6486_p7), %s465_s2, 768  }
 0x140   : > { %5678 = vsyncadd (%p6486_p7), %s465_s2, 4294966528  ;;  %s473_s14 = sand.u32 1, %s5820_s23   ;;  %s476_s25 = scalar_lea.vmem [#allocation5], %s6159_s13 }
 0x141   : > { %s474_s11 = scalar_lea.sflag [#allocation6], %s473_s14 }
 0x142   : > { %5680 = dma.done.wait (%p6486_p7), %s474_s11, 16  }
 0x143   : > { %5682 = vsyncadd (%p6486_p7), %s474_s11, 4294967280  ;;  %p6487_p11 = scmp.eq.s32.totalorder %s5820_s23, 0 }
 0x145   : > { %5684 = dma.done.wait (%p6487_p11), [#allocation6], 128   ;;  %p6488_p8 = pmov %p6487_p11 }
 0x147   : > { %5686 = vsyncadd (%p6488_p8), [#allocation6], 4294967168  ;;  %p6489_p10 = pmov %p6488_p8 }
 0x148   : > { %p6490_p12 = pmov %p6488_p8 }
 0x149   : > { %5688 = dma.done.wait (%p6489_p10), [#allocation9], 12304  }
 0x14a   : > { %5690 = vsyncadd (%p6490_p12), [#allocation9], 4294954992  ;;  %p6491_p1 = pmov %p6488_p8 }
 0x14c   : > { %5692 = dma.done.wait (%p6491_p1), [#allocation12], 192   ;;  %p6492_p13 = pmov %p6491_p1 }
 0x14d   : > { %p6493_p0 = pmov %p6491_p1 }
 0x14e   : > { %5694 = vsyncadd (%p6492_p13), [#allocation12], 4294967104 }
 0x14f   : > { %5696 = dma.done.wait (%p6493_p0), [#allocation15], 73824   ;;  %p6494_p2 = pmov %p6493_p0 }
 0x150   : > { %p6495_p6 = pmov %p6493_p0 }
 0x151   : > { %5698 = vsyncadd (%p6494_p2), [#allocation15], 4294893472 }
 0x152   : > { %5700 = dma.done.wait (%p6495_p6), [#allocation18], 73824   ;;  %p6496_p4 = pmov %p6493_p0 }
 0x153   : > { %v5736_v0 = vmov 0.0   ;;  %vm5737_vm0 = vmmov 0   ;;  %vm606_vm1 = vcmask 64512   ;;  %v604_v1 = vld [vmem:[#allocation7] sm:$0xff]  ;;  %v603_v2 = vld [vmem:[%s476_s25] sm:$0x1] }
 0x154   : > { %5702 = vsyncadd (%p6496_p4), [#allocation18], 4294893472  ;;  %3878 = vmatprep.subr.mxu0 %v5736_v0  ;;  %3880 = vmatprep.mubr.msk.f32.mxu0 %vm5737_vm0, %v5736_v0  ;;  %v682_v3 = vld [vmem:[#allocation10 + $0x8] sm:$0xff]  ;;  %v688_v4 = vld [vmem:[#allocation10 + $0x38] sm:$0xff]  ;;  %vm1022_vm2 = vcmask 1040384   ;;  %s6378_s30 = scalar_lea.vmem [#allocation20], %s5163_s16 }
 0x155   : > { %873 = vmatprep.mubr.f32.mxu1 %v5736_v0  ;;  %3879 = vmatpush3.msra.mxu0 %v604_v1  ;;  %v681_v5 = vld [vmem:[#allocation10] sm:$0xff]  ;;  %v687_v6 = vld [vmem:[#allocation10 + $0x30] sm:$0xff]  ;;  %v3883_v7 = vpack.c.bf16 %v688_v4, %v682_v3  ;;  %v684_v9 = vld [vmem:[#allocation10 + $0x18] sm:$0xff]  ;;  %s5164_s4 = smul.u32 768, %s5820_s23  ;;  %s3673_s27 = sshll.u32 %s6378_s30, 4  ;;  %s6403_s27 = int_to_ptr.vmem [resolvable:$true] %s3673_s27 }
 0x156   : > { %3881 = vmatmul.mubr.msk.f32.vlgmr.msra.gmra.mrb[0].mxu0 %vm606_vm1, %v603_v2  ;;  %v3885_v8 = vpack.c.bf16 %v687_v6, %v681_v5  ;;  %v690_v10 = vld [vmem:[#allocation10 + $0x48] sm:$0xff]  ;;  %v683_v11 = vld [vmem:[#allocation10 + $0x10] sm:$0xff]  ;;  %v689_v13 = vld [vmem:[#allocation10 + $0x40] sm:$0xff]  ;;  %s6497_s15 = sld [smem:[#allocation34_spill]]  ;;  %s3659_s26 = scalar_lea.sflag [#allocation4], %s6159_s13 }
 0x157   : > { %v3915_v12 = vpack.c.bf16 %v690_v10, %v684_v9  ;;  %v694_v14 = vld [vmem:[#allocation10 + $0x68] sm:$0xff]  ;;  %v700_v15 = vld [vmem:[#allocation10 + $0x98] sm:$0xff]  ;;  %944 = vmatprep.mubr.f32.mxu0 %v5736_v0  ;;  %3884 = vmatprep.subr.bf16.mxu1 %v3883_v7  ;;  %v3917_v16 = vpack.c.bf16 %v689_v13, %v683_v11  ;;  %v693_v18 = vld [vmem:[#allocation10 + $0x60] sm:$0xff]  ;;  %s5631_s0 = scalar_lea.vmem %s6403_s27, 768  ;;  %p6498_p9 = scmp.ne.s32.totalorder %s6479_s22, 0 }
 0x158   : > { %v3887_v17 = vpack.c.bf16 %v700_v15, %v694_v14  ;;  %v699_v19 = vld [vmem:[#allocation10 + $0x90] sm:$0xff]  ;;  %v696_v20 = vld [vmem:[#allocation10 + $0x78] sm:$0xff]  ;;  %3886 = vmatpush1.bf16.msra.mxu1 %v3885_v8  ;;  %v702_v22 = vld [vmem:[#allocation10 + $0xa8] sm:$0xff]  ;;  %p5632_p5 = scmp.ne.s32.totalorder %s6403_s27, %s5631_s0  ;;  %s5738_s16 = smov [#allocation20]  }
 0x159   : > { %3916 = vmatprep.subr.bf16.mxu0 %v3915_v12  ;;  %v3889_v21 = vpack.c.bf16 %v699_v19, %v693_v18  ;;  %v695_v23 = vld [vmem:[#allocation10 + $0x70] sm:$0xff]  ;;  %v701_v24 = vld [vmem:[#allocation10 + $0xa0] sm:$0xff]  ;;  %v3919_v25 = vpack.c.bf16 %v702_v22, %v696_v20  ;;  %v706_v27 = vld [vmem:[#allocation10 + $0xc8] sm:$0xff]  ;;  %s5635_s2 = sshll.u32 %s5738_s16, 4  ;;  %s5636_s2 = int_to_ptr.vmem [resolvable:$false] %s5635_s2 }
 0x15a   : > { %3918 = vmatpush1.bf16.msra.mxu0 %v3917_v16  ;;  %3888 = vmatprep.subr.bf16.mxu1 %v3887_v17  ;;  %v3921_v26 = vpack.c.bf16 %v701_v24, %v695_v23  ;;  %v712_v28 = vld [vmem:[#allocation10 + $0xf8] sm:$0xff]  ;;  %v705_v29 = vld [vmem:[#allocation10 + $0xc0] sm:$0xff]  ;;  %v711_v31 = vld [vmem:[#allocation10 + $0xf0] sm:$0xff]  ;;  %p5633_p3 = pnand %p5632_p5, %p6498_p9  ;;  %p5638_p11 = scmp.lt.s32.totalorder %s6403_s27, %s5636_s2 }
 0x15b   : > { %v3891_v30 = vpack.c.bf16 %v712_v28, %v706_v27  ;;  %v708_v32 = vld [vmem:[#allocation10 + $0xd8] sm:$0xff]  ;;  %v714_v33 = vld [vmem:[#allocation10 + $0x108] sm:$0xff]  ;;  %3920 = vmatprep.subr.bf16.mxu0 %v3919_v25  ;;  %v707_v35 = vld [vmem:[#allocation10 + $0xd0] sm:$0xff]  ;;  %v3893_v38 = vpack.c.bf16 %v711_v31, %v705_v29 }
 0x15c   : > { %v3923_v34 = vpack.c.bf16 %v714_v33, %v708_v32  ;;  %v713_v36 = vld [vmem:[#allocation10 + $0x100] sm:$0xff]  ;;  %v718_v37 = vld [vmem:[#allocation10 + $0x128] sm:$0xff]  ;;  %3890 = vmatpush1.bf16.msra.mxu1 %v3889_v21  ;;  %v724_v39 = vld [vmem:[#allocation10 + $0x158] sm:$0xff]  ;;  %s6401_s24 = scalar_lea.hbm %s6497_s15, %s5164_s4  ;;  %p5634_p7 = pneg %p5633_p3 }
 0x15d   : > { %v717_v40 = vld [vmem:[#allocation10 + $0x120] sm:$0xff]  ;;  %v723_v41 = vld [vmem:[#allocation10 + $0x150] sm:$0xff]  ;;  %3892 = vmatprep.subr.bf16.mxu1 %v3891_v30  ;;  %v3925_v42 = vpack.c.bf16 %v713_v36, %v707_v35  ;;  %v3895_v43 = vpack.c.bf16 %v724_v39, %v718_v37  ;;  %v720_v44 = vld [vmem:[#allocation10 + $0x138] sm:$0xff] }
 0x15e   : > { %3922 = vmatpush1.bf16.msra.mxu0 %v3921_v26  ;;  %v726_v45 = vld [vmem:[#allocation10 + $0x168] sm:$0xff]  ;;  %v719_v46 = vld [vmem:[#allocation10 + $0x130] sm:$0xff]  ;;  %v725_v48 = vld [vmem:[#allocation10 + $0x160] sm:$0xff]  ;;  %v3897_v52 = vpack.c.bf16 %v723_v41, %v717_v40 }
 0x15f   : > { %3924 = vmatprep.subr.bf16.mxu0 %v3923_v34  ;;  %v3927_v47 = vpack.c.bf16 %v726_v45, %v720_v44  ;;  %v730_v49 = vld [vmem:[#allocation10 + $0x188] sm:$0xff]  ;;  %v736_v50 = vld [vmem:[#allocation10 + $0x1b8] sm:$0xff]  ;;  %v3929_v54 = vpack.c.bf16 %v725_v48, %v719_v46  ;;  %v729_v56 = vld [vmem:[#allocation10 + $0x180] sm:$0xff] }
 0x160   : > { %v732_v51 = vld [vmem:[#allocation10 + $0x198] sm:$0xff]  ;;  %3894 = vmatpush1.bf16.msra.mxu1 %v3893_v38  ;;  %v738_v53 = vld [vmem:[#allocation10 + $0x1c8] sm:$0xff]  ;;  %v3899_v55 = vpack.c.bf16 %v736_v50, %v730_v49  ;;  %v735_v57 = vld [vmem:[#allocation10 + $0x1b0] sm:$0xff] }
 0x161   : > { %3896 = vmatprep.subr.bf16.mxu1 %v3895_v43  ;;  %v731_v58 = vld [vmem:[#allocation10 + $0x190] sm:$0xff]  ;;  %v3931_v59 = vpack.c.bf16 %v738_v53, %v732_v51  ;;  %v737_v60 = vld [vmem:[#allocation10 + $0x1c0] sm:$0xff]  ;;  %v742_v61 = vld [vmem:[#allocation10 + $0x1e8] sm:$0xff]  ;;  %v3901_v2 = vpack.c.bf16 %v735_v57, %v729_v56 }
 0x162   : > { %3926 = vmatpush1.bf16.msra.mxu0 %v3925_v42  ;;  %v748_v62 = vld [vmem:[#allocation10 + $0x218] sm:$0xff]  ;;  %v750_v1 = vld [vmem:[#allocation10 + $0x228] sm:$0xff]  ;;  %v3933_v3 = vpack.c.bf16 %v737_v60, %v731_v58  ;;  %v741_v5 = vld [vmem:[#allocation10 + $0x1e0] sm:$0xff] }
 0x163   : > { %3928 = vmatprep.subr.bf16.mxu0 %v3927_v47  ;;  %v744_v63 = vld [vmem:[#allocation10 + $0x1f8] sm:$0xff]  ;;  %v3903_v4 = vpack.c.bf16 %v748_v62, %v742_v61  ;;  %v747_v6 = vld [vmem:[#allocation10 + $0x210] sm:$0xff]  ;;  %v749_v9 = vld [vmem:[#allocation10 + $0x220] sm:$0xff] }
 0x164   : > { %3898 = vmatpush1.bf16.msra.mxu1 %v3897_v52  ;;  %v743_v7 = vld [vmem:[#allocation10 + $0x1f0] sm:$0xff]  ;;  %v3935_v8 = vpack.c.bf16 %v750_v1, %v744_v63  ;;  %v754_v10 = vld [vmem:[#allocation10 + $0x248] sm:$0xff]  ;;  %v760_v11 = vld [vmem:[#allocation10 + $0x278] sm:$0xff]  ;;  %v3905_v14 = vpack.c.bf16 %v747_v6, %v741_v5 }
 0x165   : > { %3900 = vmatprep.subr.bf16.mxu1 %v3899_v55  ;;  %v756_v12 = vld [vmem:[#allocation10 + $0x258] sm:$0xff]  ;;  %v762_v13 = vld [vmem:[#allocation10 + $0x288] sm:$0xff]  ;;  %v3937_v15 = vpack.c.bf16 %v749_v9, %v743_v7  ;;  %v3907_v16 = vpack.c.bf16 %v760_v11, %v754_v10  ;;  %v753_v17 = vld [vmem:[#allocation10 + $0x240] sm:$0xff] }
 0x166   : > { %3930 = vmatpush1.bf16.msra.mxu0 %v3929_v54  ;;  %v759_v18 = vld [vmem:[#allocation10 + $0x270] sm:$0xff]  ;;  %v3939_v19 = vpack.c.bf16 %v762_v13, %v756_v12  ;;  %v761_v21 = vld [vmem:[#allocation10 + $0x280] sm:$0xff]  ;;  %v766_v24 = vld [vmem:[#allocation10 + $0x2a8] sm:$0xff] }
 0x167   : > { %3932 = vmatprep.subr.bf16.mxu0 %v3931_v59  ;;  %v755_v20 = vld [vmem:[#allocation10 + $0x250] sm:$0xff]  ;;  %v3909_v22 = vpack.c.bf16 %v759_v18, %v753_v17  ;;  %v772_v25 = vld [vmem:[#allocation10 + $0x2d8] sm:$0xff]  ;;  %v765_v27 = vld [vmem:[#allocation10 + $0x2a0] sm:$0xff] }
 0x168   : > { %3902 = vmatpush1.bf16.msra.mxu1 %v3901_v2  ;;  %v3941_v23 = vpack.c.bf16 %v761_v21, %v755_v20  ;;  %v3911_v26 = vpack.c.bf16 %v772_v25, %v766_v24  ;;  %v771_v28 = vld [vmem:[#allocation10 + $0x2d0] sm:$0xff]  ;;  %v768_v29 = vld [vmem:[#allocation10 + $0x2b8] sm:$0xff]  ;;  %v774_v31 = vld [vmem:[#allocation10 + $0x2e8] sm:$0xff] }
 0x169   : > { %3904 = vmatprep.subr.bf16.mxu1 %v3903_v4  ;;  %v3913_v30 = vpack.c.bf16 %v771_v28, %v765_v27  ;;  %v767_v32 = vld [vmem:[#allocation10 + $0x2b0] sm:$0xff]  ;;  %v773_v33 = vld [vmem:[#allocation10 + $0x2e0] sm:$0xff]  ;;  %v3943_v34 = vpack.c.bf16 %v774_v31, %v768_v29  ;;  %v686_v36 = vld [vmem:[#allocation10 + $0x28] sm:$0xff]  ;;  %v779_v29 = vlaneseq }
 0x16a   : > { %3934 = vmatpush1.bf16.msra.mxu0 %v3933_v3  ;;  %v3945_v35 = vpack.c.bf16 %v773_v33, %v767_v32  ;;  %v692_v37 = vld [vmem:[#allocation10 + $0x58] sm:$0xff]  ;;  %v685_v40 = vld [vmem:[#allocation10 + $0x20] sm:$0xff]  ;;  %v691_v41 = vld [vmem:[#allocation10 + $0x50] sm:$0xff] }
 0x16b   : > { %3936 = vmatprep.subr.bf16.mxu0 %v3935_v8  ;;  %v3947_v38 = vpack.c.bf16 %v692_v37, %v686_v36  ;;  %v605_v39 = vld [vmem:[#allocation8] sm:$0x1]  ;;  %v698_v43 = vld [vmem:[#allocation10 + $0x88] sm:$0xff]  ;;  %v3949_v47 = vpack.c.bf16 %v691_v41, %v685_v40  ;;  %v697_v50 = vld [vmem:[#allocation10 + $0x80] sm:$0xff] }
 0x16c   : > { %3906 = vmatpush1.bf16.msra.mxu1 %v3905_v14  ;;  %v704_v44 = vld [vmem:[#allocation10 + $0xb8] sm:$0xff]  ;;  %v703_v51 = vld [vmem:[#allocation10 + $0xb0] sm:$0xff]  ;;  %v710_v52 = vld [vmem:[#allocation10 + $0xe8] sm:$0xff] }
 0x16d   : > { %3908 = vmatprep.subr.bf16.mxu1 %v3907_v16  ;;  %v3951_v49 = vpack.c.bf16 %v704_v44, %v698_v43  ;;  %v716_v53 = vld [vmem:[#allocation10 + $0x118] sm:$0xff]  ;;  %v3953_v54 = vpack.c.bf16 %v703_v51, %v697_v50  ;;  %v709_v56 = vld [vmem:[#allocation10 + $0xe0] sm:$0xff]  ;;  %v715_v57 = vld [vmem:[#allocation10 + $0x110] sm:$0xff] }
 0x16e   : > { %3938 = vmatpush1.bf16.msra.mxu0 %v3937_v15  ;;  %v3955_v55 = vpack.c.bf16 %v716_v53, %v710_v52  ;;  %v722_v58 = vld [vmem:[#allocation10 + $0x148] sm:$0xff]  ;;  %v728_v59 = vld [vmem:[#allocation10 + $0x178] sm:$0xff]  ;;  %v3957_v60 = vpack.c.bf16 %v715_v57, %v709_v56  ;;  %v721_v62 = vld [vmem:[#allocation10 + $0x140] sm:$0xff] }
 0x16f   : > { %3940 = vmatprep.subr.bf16.mxu0 %v3939_v19  ;;  %v3959_v61 = vpack.c.bf16 %v728_v59, %v722_v58  ;;  %v727_v63 = vld [vmem:[#allocation10 + $0x170] sm:$0xff]  ;;  %v734_v1 = vld [vmem:[#allocation10 + $0x1a8] sm:$0xff]  ;;  %v740_v2 = vld [vmem:[#allocation10 + $0x1d8] sm:$0xff] }
 0x170   : > { %3910 = vmatpush1.bf16.msra.mxu1 %v3909_v22  ;;  %v3961_v3 = vpack.c.bf16 %v727_v63, %v721_v62  ;;  %v3963_v4 = vpack.c.bf16 %v740_v2, %v734_v1  ;;  %v733_v5 = vld [vmem:[#allocation10 + $0x1a0] sm:$0xff]  ;;  %v746_v6 = vld [vmem:[#allocation10 + $0x208] sm:$0xff]  ;;  %v752_v7 = vld [vmem:[#allocation10 + $0x238] sm:$0xff] }
 0x171   : > { %3912 = vmatprep.subr.bf16.mxu1 %v3911_v26  ;;  %v3967_v9 = vpack.c.bf16 %v752_v7, %v746_v6  ;;  %v745_v10 = vld [vmem:[#allocation10 + $0x200] sm:$0xff]  ;;  %v751_v11 = vld [vmem:[#allocation10 + $0x230] sm:$0xff]  ;;  %v758_v12 = vld [vmem:[#allocation10 + $0x268] sm:$0xff] }
 0x172   : > { %3942 = vmatpush1.bf16.msra.mxu0 %v3941_v23  ;;  %v764_v13 = vld [vmem:[#allocation10 + $0x298] sm:$0xff]  ;;  %v3969_v14 = vpack.c.bf16 %v751_v11, %v745_v10  ;;  %v757_v16 = vld [vmem:[#allocation10 + $0x260] sm:$0xff]  ;;  %v763_v17 = vld [vmem:[#allocation10 + $0x290] sm:$0xff] }
 0x173   : > { %3944 = vmatprep.subr.bf16.mxu0 %v3943_v34  ;;  %v3971_v15 = vpack.c.bf16 %v764_v13, %v758_v12  ;;  %v770_v18 = vld [vmem:[#allocation10 + $0x2c8] sm:$0xff]  ;;  %v776_v19 = vld [vmem:[#allocation10 + $0x2f8] sm:$0xff]  ;;  %v3973_v20 = vpack.c.bf16 %v763_v17, %v757_v16  ;;  %v769_v22 = vld [vmem:[#allocation10 + $0x2c0] sm:$0xff] }
 0x174   : > { %3914 = vmatpush1.bf16.msra.mxu1 %v3913_v30  ;;  %v3975_v21 = vpack.c.bf16 %v776_v19, %v770_v18  ;;  %v775_v23 = vld [vmem:[#allocation10 + $0x2f0] sm:$0xff]  ;;  %v780_v30 = vshrl.u32 %v779_v29, 7  ;;  %v777_v33 = vld [vmem:[#allocation11] sm:$0x3f] }
 0x175   : > { %3948 = vmatprep.subr.bf16.mxu1 %v3947_v38  ;;  %v3977_v24 = vpack.c.bf16 %v775_v23, %v769_v22  ;;  %v1725_v63 = vld [vmem:[#allocation17 + $0x8] sm:$0xff]  ;;  %v1731_v1 = vld [vmem:[#allocation17 + $0x38] sm:$0xff]  ;;  %v1736_v17 = vld [vmem:[#allocation17 + $0x60] sm:$0xff] }
 0x176   : > { %3946 = vmatpush1.bf16.msra.mxu0 %v3945_v35  ;;  %v6202_v31 = vsub.s32 0, %v780_v30  ;;  %v6204_v32 = vsub.s32 1, %v780_v30  ;;  %v6208_v36 = vsub.s32 2, %v780_v30  ;;  %v6215_v40 = vsub.s32 3, %v780_v30  ;;  %v1729_v2 = vld [vmem:[#allocation17 + $0x28] sm:$0xff]  ;;  %v1743_v12 = vld [vmem:[#allocation17 + $0x98] sm:$0xff] }
 0x177   : > { %v1737_v10 = vld [vmem:[#allocation17 + $0x68] sm:$0xff]  ;;  %v1742_v18 = vld [vmem:[#allocation17 + $0x90] sm:$0xff]  ;;  %v1740_v19 = vld [vmem:[#allocation17 + $0x80] sm:$0xff] }
 0x178   : > { %v782_v34 = vrot.slane %v777_v33, %v6202_v31  ;;  %v786_v35 = vrot.slane %v777_v33, %v6204_v32  ;;  %v794_v44 = vrot.slane %v777_v33, %v6215_v40  ;;  %v1741_v13 = vld [vmem:[#allocation17 + $0x88] sm:$0xff]  ;;  %v1755_v23 = vld [vmem:[#allocation17 + $0xf8] sm:$0xff] }
 0x179   : > { %v1749_v22 = vld [vmem:[#allocation17 + $0xc8] sm:$0xff] }
 0x229   : > { %v676_v42 = vpop.f32.mrb[0].mxu0 }
 0x22a   : > { %v677_v45 = vadd.f32 %v676_v42, %v605_v39  ;;  %v3882_v46 = vpop.f32.mrb[1].mxu0  ;;  %v790_v39 = vrot.slane %v777_v33, %v6208_v36 }
 0x22c   : > { %v680_v48 = vmax.f32 %v677_v45, 0.0  ;;  %v6224_v45 = vsub.s32 4, %v780_v30 }
 0x22e   : > { %874 = vmatmul.mubr.f32.vlgmr.msra.gmra.mrb[0].mxu1 %v680_v48  ;;  %945 = vmatmul.mubr.f32.vlgmr.msra.gmra.mrb[2].mxu0 %v680_v48  ;;  %v798_v50 = vrot.slane %v777_v33, %v6224_v45 }
 0x22f   : > { %3950 = vmatpush1.bf16.msra.mxu1 %v3949_v47  ;;  %1015 = vmatprep.mubr.f32.mxu1 %v5736_v0  ;;  %v739_v0 = vld [vmem:[#allocation10 + $0x1d0] sm:$0xff]  ;;  %v6226_v47 = vsub.s32 5, %v780_v30  ;;  %v1754_v30 = vld [vmem:[#allocation17 + $0xf0] sm:$0xff] }
 0x230   : > { %3952 = vmatprep.subr.bf16.mxu1 %v3951_v49  ;;  %v3965_v8 = vpack.c.bf16 %v739_v0, %v733_v5  ;;  %v1724_v5 = vld [vmem:[#allocation17] sm:$0xff]  ;;  %v1730_v0 = vld [vmem:[#allocation17 + $0x30] sm:$0xff] }
 0x231   : > { %v802_v52 = vrot.slane %v777_v33, %v6226_v47  ;;  %v3981_v7 = vpack.c.bf16 %v1730_v0, %v1724_v5  ;;  %v1752_v33 = vld [vmem:[#allocation17 + $0xe0] sm:$0xff]  ;;  %v1782_v5 = vld [vmem:[#allocation17 + $0x1d0] sm:$0xff]  ;;  %v1785_v0 = vld [vmem:[#allocation17 + $0x1e8] sm:$0xff] }
 0x233   : > { %3954 = vmatpush1.bf16.msra.mxu1 %v3953_v54 }
 0x234   : > { %3956 = vmatprep.subr.bf16.mxu1 %v3955_v55 }
 0x237   : > { %3958 = vmatpush1.bf16.msra.mxu1 %v3957_v60 }
 0x238   : > { %3960 = vmatprep.subr.bf16.mxu1 %v3959_v61 }
 0x23b   : > { %3962 = vmatpush1.bf16.msra.mxu1 %v3961_v3  ;;  %v3979_v3 = vpack.c.bf16 %v1731_v1, %v1725_v63  ;;  %v1772_v1 = vld [vmem:[#allocation17 + $0x180] sm:$0xff] }
 0x23c   : > { %3964 = vmatprep.subr.bf16.mxu1 %v3963_v4  ;;  %v1735_v4 = vld [vmem:[#allocation17 + $0x58] sm:$0xff] }
 0x23d   : > { %v4363_v6 = vpack.c.bf16 %v1735_v4, %v1729_v2  ;;  %v1778_v2 = vld [vmem:[#allocation17 + $0x1b0] sm:$0xff] }
 0x23f   : > { %3966 = vmatpush1.bf16.msra.mxu1 %v3965_v8  ;;  %v1728_v8 = vld [vmem:[#allocation17 + $0x20] sm:$0xff]  ;;  %4364 = vmatprep.subr.bf16.mxu0 %v4363_v6  ;;  %v1791_v6 = vld [vmem:[#allocation17 + $0x218] sm:$0xff] }
 0x240   : > { %3968 = vmatprep.subr.bf16.mxu1 %v3967_v9  ;;  %v1734_v9 = vld [vmem:[#allocation17 + $0x50] sm:$0xff] }
 0x241   : > { %v4365_v11 = vpack.c.bf16 %v1734_v9, %v1728_v8  ;;  %v1795_v8 = vld [vmem:[#allocation17 + $0x238] sm:$0xff]  ;;  %v3997_v9 = vpack.c.bf16 %v1778_v2, %v1772_v1  ;;  %v1830_v1 = vld [vmem:[#allocation17 + $0x350] sm:$0xff]  ;;  %v1833_v2 = vld [vmem:[#allocation17 + $0x368] sm:$0xff] }
 0x243   : > { %3970 = vmatpush1.bf16.msra.mxu1 %v3969_v14  ;;  %v1747_v14 = vld [vmem:[#allocation17 + $0xb8] sm:$0xff]  ;;  %4366 = vmatpush1.bf16.msra.mxu0 %v4365_v11  ;;  %v3999_v11 = vpack.c.bf16 %v1791_v6, %v1785_v0 }
 0x244   : > { %3972 = vmatprep.subr.bf16.mxu1 %v3971_v15  ;;  %v3983_v15 = vpack.c.bf16 %v1743_v12, %v1737_v10  ;;  %v4367_v16 = vpack.c.bf16 %v1747_v14, %v1741_v13  ;;  %v1784_v12 = vld [vmem:[#allocation17 + $0x1e0] sm:$0xff]  ;;  %v1790_v13 = vld [vmem:[#allocation17 + $0x210] sm:$0xff] }
 0x245   : > { %v1788_v14 = vld [vmem:[#allocation17 + $0x200] sm:$0xff] }
 0x246   : > { %4368 = vmatprep.subr.bf16.mxu0 %v4367_v16  ;;  %v1794_v16 = vld [vmem:[#allocation17 + $0x230] sm:$0xff] }
 0x247   : > { %3974 = vmatpush1.bf16.msra.mxu1 %v3973_v20  ;;  %v3985_v20 = vpack.c.bf16 %v1742_v18, %v1736_v17  ;;  %v1797_v17 = vld [vmem:[#allocation17 + $0x248] sm:$0xff]  ;;  %v1803_v18 = vld [vmem:[#allocation17 + $0x278] sm:$0xff] }
 0x248   : > { %3976 = vmatprep.subr.bf16.mxu1 %v3975_v21  ;;  %v1746_v21 = vld [vmem:[#allocation17 + $0xb0] sm:$0xff] }
 0x24b   : > { %3978 = vmatpush1.bf16.msra.mxu1 %v3977_v24  ;;  %v4369_v24 = vpack.c.bf16 %v1746_v21, %v1740_v19  ;;  %v1801_v19 = vld [vmem:[#allocation17 + $0x268] sm:$0xff]  ;;  %v4001_v21 = vpack.c.bf16 %v1790_v13, %v1784_v12  ;;  %v1842_v12 = vld [vmem:[#allocation17 + $0x3b0] sm:$0xff] }
 0x24c   : > { %3980 = vmatprep.subr.bf16.mxu1 %v3979_v3  ;;  %v1776_v3 = vld [vmem:[#allocation17 + $0x1a0] sm:$0xff]  ;;  %v1845_v13 = vld [vmem:[#allocation17 + $0x3c8] sm:$0xff] }
 0x24d   : > { %4370 = vmatpush1.bf16.msra.mxu0 %v4369_v24  ;;  %v4381_v10 = vpack.c.bf16 %v1782_v5, %v1776_v3  ;;  %v1796_v24 = vld [vmem:[#allocation17 + $0x240] sm:$0xff]  ;;  %v1839_v3 = vld [vmem:[#allocation17 + $0x398] sm:$0xff] }
 0x24e   : > { %1016 = vmatmul.mubr.f32.vlgmr.msra.gmra.mrb[2].mxu1 %v680_v48  ;;  %v1843_v5 = vld [vmem:[#allocation17 + $0x3b8] sm:$0xff] }
 0x24f   : > { %3982 = vmatpush1.bf16.msra.mxu1 %v3981_v7  ;;  %v1789_v7 = vld [vmem:[#allocation17 + $0x208] sm:$0xff] }
 0x250   : > { %3984 = vmatprep.subr.bf16.mxu1 %v3983_v15  ;;  %v4383_v15 = vpack.c.bf16 %v1795_v8, %v1789_v7  ;;  %v4015_v7 = vpack.c.bf16 %v1839_v3, %v1833_v2  ;;  %v1832_v8 = vld [vmem:[#allocation17 + $0x360] sm:$0xff] }
 0x253   : > { %3986 = vmatpush1.bf16.msra.mxu1 %v3985_v20  ;;  %v1807_v20 = vld [vmem:[#allocation17 + $0x298] sm:$0xff] }
 0x301   : > { %v875_v25 = vpop.f32.mrb[0].mxu1  ;;  %v946_v26 = vpop.f32.mrb[2].mxu0 }
 0x302   : > { %v877_v27 = vpop.f32.mrb[1].mxu1  ;;  %v948_v28 = vpop.f32.mrb[3].mxu0  ;;  %v6210_v37 = vadd.f32 %v875_v25, %v782_v34  ;;  %v6221_v43 = vadd.f32 %v946_v26, %v790_v39  ;;  %v3987_v25 = vpack.c.bf16 %v1755_v23, %v1749_v22  ;;  %v1753_v26 = vld [vmem:[#allocation17 + $0xe8] sm:$0xff]  ;;  %v1758_v34 = vld [vmem:[#allocation17 + $0x110] sm:$0xff]  ;;  %v4385_v22 = vpack.c.bf16 %v1794_v16, %v1788_v14  ;;  %v1851_v14 = vld [vmem:[#allocation17 + $0x3f8] sm:$0xff] }
 0x303   : > { %v6212_v38 = vadd.f32 %v877_v27, %v786_v35  ;;  %v6230_v49 = vadd.f32 %v948_v28, %v794_v44  ;;  %v1759_v27 = vld [vmem:[#allocation17 + $0x118] sm:$0xff]  ;;  %v1748_v28 = vld [vmem:[#allocation17 + $0xc0] sm:$0xff]  ;;  %v1761_v39 = vld [vmem:[#allocation17 + $0x128] sm:$0xff]  ;;  %v4373_v44 = vpack.c.bf16 %v1758_v34, %v1752_v33  ;;  %v4003_v23 = vpack.c.bf16 %v1803_v18, %v1797_v17 }
 0x304   : > { %v1023_v41 = vsel %vm1022_vm2, %v6210_v37, 0.0  ;;  %v1026_v48 = vsel %vm1022_vm2, %v6221_v43, 0.0  ;;  %v4371_v29 = vpack.c.bf16 %v1759_v27, %v1753_v26  ;;  %v3989_v35 = vpack.c.bf16 %v1754_v30, %v1748_v28  ;;  %3988 = vmatprep.subr.bf16.mxu1 %v3987_v25  ;;  %v1802_v25 = vld [vmem:[#allocation17 + $0x270] sm:$0xff]  ;;  %v1800_v26 = vld [vmem:[#allocation17 + $0x260] sm:$0xff]  ;;  %v1815_v30 = vld [vmem:[#allocation17 + $0x2d8] sm:$0xff] }
 0x305   : > { %v1024_v42 = vsel %vm1022_vm2, %v6212_v38, 0.0  ;;  %v1028_v54 = vsel %vm1022_vm2, %v6230_v49, 0.0  ;;  %v4387_v27 = vpack.c.bf16 %v1807_v20, %v1801_v19  ;;  %v1806_v28 = vld [vmem:[#allocation17 + $0x290] sm:$0xff]  ;;  %v1813_v33 = vld [vmem:[#allocation17 + $0x2c8] sm:$0xff]  ;;  %v1819_v34 = vld [vmem:[#allocation17 + $0x2f8] sm:$0xff]  ;;  %v4019_v19 = vpack.c.bf16 %v1851_v14, %v1845_v13 }
 0x306   : > { %v1025_v46 = vadd.f32 %v1024_v42, %v1023_v41  ;;  %v1767_v41 = vld [vmem:[#allocation17 + $0x158] sm:$0xff]  ;;  %v1765_v42 = vld [vmem:[#allocation17 + $0x148] sm:$0xff]  ;;  %4372 = vmatprep.subr.bf16.mxu0 %v4371_v29  ;;  %3990 = vmatpush1.bf16.msra.mxu1 %v3989_v35  ;;  %v4005_v35 = vpack.c.bf16 %v1802_v25, %v1796_v24  ;;  %v1844_v20 = vld [vmem:[#allocation17 + $0x3c0] sm:$0xff] }
 0x307   : > { %4374 = vmatpush1.bf16.msra.mxu0 %v4373_v44  ;;  %v1809_v29 = vld [vmem:[#allocation17 + $0x2a8] sm:$0xff]  ;;  %v1814_v44 = vld [vmem:[#allocation17 + $0x2d0] sm:$0xff]  ;;  %v1855_v16 = vld [vmem:[#allocation17 + $0x418] sm:$0xff] }
 0x308   : > { %v1027_v51 = vadd.f32 %v1026_v48, %v1025_v46  ;;  %v3991_v46 = vpack.c.bf16 %v1767_v41, %v1761_v39  ;;  %v1771_v48 = vld [vmem:[#allocation17 + $0x178] sm:$0xff]  ;;  %v4389_v39 = vpack.c.bf16 %v1806_v28, %v1800_v26  ;;  %v4007_v41 = vpack.c.bf16 %v1815_v30, %v1809_v29  ;;  %v1854_v24 = vld [vmem:[#allocation17 + $0x410] sm:$0xff] }
 0x30a   : > { %v1029_v57 = vadd.f32 %v1028_v54, %v1027_v51  ;;  %v1766_v51 = vld [vmem:[#allocation17 + $0x150] sm:$0xff]  ;;  %3992 = vmatprep.subr.bf16.mxu1 %v3991_v46  ;;  %v1812_v46 = vld [vmem:[#allocation17 + $0x2c0] sm:$0xff] }
 0x30b   : > { %v1770_v54 = vld [vmem:[#allocation17 + $0x170] sm:$0xff] }
 0x321   : > { %v1017_v53 = vpop.f32.mrb[2].mxu1 }
 0x322   : > { %v6236_v55 = vadd.f32 %v1017_v53, %v798_v50  ;;  %v1019_v56 = vpop.f32.mrb[3].mxu1  ;;  %v1760_v50 = vld [vmem:[#allocation17 + $0x120] sm:$0xff] }
 0x323   : > { %v6238_v58 = vadd.f32 %v1019_v56, %v802_v52  ;;  %v4375_v52 = vpack.c.bf16 %v1771_v48, %v1765_v42  ;;  %v1764_v53 = vld [vmem:[#allocation17 + $0x140] sm:$0xff]  ;;  %v1773_v56 = vld [vmem:[#allocation17 + $0x188] sm:$0xff]  ;;  %v4391_v48 = vpack.c.bf16 %v1819_v34, %v1813_v33 }
 0x324   : > { %v1030_v59 = vsel %vm1022_vm2, %v6236_v55, 0.0  ;;  %v1808_v42 = vld [vmem:[#allocation17 + $0x2a0] sm:$0xff] }
 0x325   : > { %v1031_v60 = vadd.f32 %v1030_v59, %v1029_v57  ;;  %v1032_v61 = vsel %vm1022_vm2, %v6238_v58, 0.0  ;;  %v1779_v57 = vld [vmem:[#allocation17 + $0x1b8] sm:$0xff]  ;;  %v1777_v59 = vld [vmem:[#allocation17 + $0x1a8] sm:$0xff]  ;;  %4376 = vmatprep.subr.bf16.mxu0 %v4375_v52 }
 0x326   : > { %v3995_v63 = vpack.c.bf16 %v1779_v57, %v1773_v56  ;;  %v1827_v52 = vld [vmem:[#allocation17 + $0x338] sm:$0xff]  ;;  %v4009_v56 = vpack.c.bf16 %v1814_v44, %v1808_v42 }
 0x327   : > { %v1033_v62 = vadd.f32 %v1032_v61, %v1031_v60  ;;  %v1783_v60 = vld [vmem:[#allocation17 + $0x1d8] sm:$0xff]  ;;  %v3993_v61 = vpack.c.bf16 %v1766_v51, %v1760_v50  ;;  %v1818_v50 = vld [vmem:[#allocation17 + $0x2f0] sm:$0xff]  ;;  %v1821_v51 = vld [vmem:[#allocation17 + $0x308] sm:$0xff] }
 0x328   : > { %v4379_v4 = vpack.c.bf16 %v1783_v60, %v1777_v59  ;;  %v4393_v57 = vpack.c.bf16 %v1818_v50, %v1812_v46  ;;  %v4011_v59 = vpack.c.bf16 %v1827_v52, %v1821_v51  ;;  %v1820_v60 = vld [vmem:[#allocation17 + $0x300] sm:$0xff] }
 0x329   : > { %1034 = vadd.xlane.f32.xlu0 %v1033_v62  ;;  %v4377_v62 = vpack.c.bf16 %v1770_v54, %v1764_v53  ;;  %3994 = vmatpush1.bf16.msra.mxu1 %v3993_v61  ;;  %v1825_v53 = vld [vmem:[#allocation17 + $0x328] sm:$0xff]  ;;  %v1831_v54 = vld [vmem:[#allocation17 + $0x358] sm:$0xff]  ;;  %v1826_v61 = vld [vmem:[#allocation17 + $0x330] sm:$0xff] }
 0x32a   : > { %3996 = vmatprep.subr.bf16.mxu1 %v3995_v63  ;;  %v4395_v63 = vpack.c.bf16 %v1831_v54, %v1825_v53  ;;  %v4013_v0 = vpack.c.bf16 %v1826_v61, %v1820_v60  ;;  %v1861_v60 = vld [vmem:[#allocation17 + $0x448] sm:$0xff] }
 0x32b   : > { %4378 = vmatpush1.bf16.msra.mxu0 %v4377_v62  ;;  %v1824_v62 = vld [vmem:[#allocation17 + $0x320] sm:$0xff] }
 0x32c   : > { %4380 = vmatprep.subr.bf16.mxu0 %v4379_v4  ;;  %v1837_v4 = vld [vmem:[#allocation17 + $0x388] sm:$0xff]  ;;  %v4397_v6 = vpack.c.bf16 %v1830_v1, %v1824_v62  ;;  %v1867_v62 = vld [vmem:[#allocation17 + $0x478] sm:$0xff]  ;;  %v1862_v1 = vld [vmem:[#allocation17 + $0x450] sm:$0xff] }
 0x32d   : > { %3998 = vmatpush1.bf16.msra.mxu1 %v3997_v9  ;;  %v1838_v9 = vld [vmem:[#allocation17 + $0x390] sm:$0xff]  ;;  %v4407_v2 = vpack.c.bf16 %v1867_v62, %v1861_v60  ;;  %v1908_v62 = vld [vmem:[#allocation17 + $0x5c0] sm:$0xff] }
 0x32e   : > { %4000 = vmatprep.subr.bf16.mxu1 %v3999_v11  ;;  %v4399_v11 = vpack.c.bf16 %v1843_v5, %v1837_v4  ;;  %v4017_v17 = vpack.c.bf16 %v1838_v9, %v1832_v8  ;;  %v1860_v4 = vld [vmem:[#allocation17 + $0x440] sm:$0xff]  ;;  %v1866_v5 = vld [vmem:[#allocation17 + $0x470] sm:$0xff]  ;;  %v1873_v8 = vld [vmem:[#allocation17 + $0x4a8] sm:$0xff] }
 0x32f   : > { %4382 = vmatpush1.bf16.msra.mxu0 %v4381_v10  ;;  %v1836_v10 = vld [vmem:[#allocation17 + $0x380] sm:$0xff]  ;;  %v1910_v60 = vld [vmem:[#allocation17 + $0x5d0] sm:$0xff] }
 0x330   : > { %4384 = vmatprep.subr.bf16.mxu0 %v4383_v15  ;;  %v1849_v15 = vld [vmem:[#allocation17 + $0x3e8] sm:$0xff]  ;;  %v4401_v18 = vpack.c.bf16 %v1842_v12, %v1836_v10  ;;  %v1879_v10 = vld [vmem:[#allocation17 + $0x4d8] sm:$0xff]  ;;  %v1874_v12 = vld [vmem:[#allocation17 + $0x4b0] sm:$0xff] }
 0x331   : > { %4002 = vmatpush1.bf16.msra.mxu1 %v4001_v21  ;;  %v1850_v21 = vld [vmem:[#allocation17 + $0x3f0] sm:$0xff]  ;;  %v4411_v13 = vpack.c.bf16 %v1879_v10, %v1873_v8 }
 0x332   : > { %4004 = vmatprep.subr.bf16.mxu1 %v4003_v23  ;;  %v1848_v23 = vld [vmem:[#allocation17 + $0x3e0] sm:$0xff]  ;;  %v4021_v25 = vpack.c.bf16 %v1850_v21, %v1844_v20  ;;  %v1885_v20 = vld [vmem:[#allocation17 + $0x508] sm:$0xff]  ;;  %v1891_v21 = vld [vmem:[#allocation17 + $0x538] sm:$0xff] }
 0x333   : > { %4386 = vmatpush1.bf16.msra.mxu0 %v4385_v22  ;;  %v4403_v22 = vpack.c.bf16 %v1855_v16, %v1849_v15  ;;  %v4405_v26 = vpack.c.bf16 %v1854_v24, %v1848_v23  ;;  %v1872_v15 = vld [vmem:[#allocation17 + $0x4a0] sm:$0xff]  ;;  %v1878_v16 = vld [vmem:[#allocation17 + $0x4d0] sm:$0xff]  ;;  %v4415_v23 = vpack.c.bf16 %v1891_v21, %v1885_v20 }
 0x334   : > { %4388 = vmatprep.subr.bf16.mxu0 %v4387_v27  ;;  %v1880_v24 = vld [vmem:[#allocation17 + $0x4e0] sm:$0xff] }
 0x335   : > { %4006 = vmatpush1.bf16.msra.mxu1 %v4005_v35 }
 0x336   : > { %4008 = vmatprep.subr.bf16.mxu1 %v4007_v41 }
 0x337   : > { %4390 = vmatpush1.bf16.msra.mxu0 %v4389_v39 }
 0x338   : > { %4392 = vmatprep.subr.bf16.mxu0 %v4391_v48 }
 0x339   : > { %4010 = vmatpush1.bf16.msra.mxu1 %v4009_v56 }
 0x33a   : > { %4012 = vmatprep.subr.bf16.mxu1 %v4011_v59  ;;  %v1863_v59 = vld [vmem:[#allocation17 + $0x458] sm:$0xff] }
 0x33b   : > { %4394 = vmatpush1.bf16.msra.mxu0 %v4393_v57  ;;  %v1857_v57 = vld [vmem:[#allocation17 + $0x428] sm:$0xff] }
 0x33c   : > { %4396 = vmatprep.subr.bf16.mxu0 %v4395_v63  ;;  %v4023_v61 = vpack.c.bf16 %v1863_v59, %v1857_v57  ;;  %v1856_v63 = vld [vmem:[#allocation17 + $0x420] sm:$0xff]  ;;  %v1915_v57 = vld [vmem:[#allocation17 + $0x5f8] sm:$0xff] }
 0x33d   : > { %4014 = vmatpush1.bf16.msra.mxu1 %v4013_v0  ;;  %v4025_v3 = vpack.c.bf16 %v1862_v1, %v1856_v63  ;;  %v4409_v0 = vpack.c.bf16 %v1866_v5, %v1860_v4  ;;  %v1904_v59 = vld [vmem:[#allocation17 + $0x5a0] sm:$0xff]  ;;  %v1914_v63 = vld [vmem:[#allocation17 + $0x5f0] sm:$0xff]  ;;  %v1923_v4 = vld [vmem:[#allocation17 + $0x638] sm:$0xff] }
 0x33e   : > { %4016 = vmatprep.subr.bf16.mxu1 %v4015_v7  ;;  %v1875_v7 = vld [vmem:[#allocation17 + $0x4b8] sm:$0xff]  ;;  %v4041_v1 = vpack.c.bf16 %v1910_v60, %v1904_v59  ;;  %v1921_v5 = vld [vmem:[#allocation17 + $0x628] sm:$0xff]  ;;  %v1938_v59 = vld [vmem:[#allocation17 + $0x6b0] sm:$0xff] }
 0x33f   : > { %4398 = vmatpush1.bf16.msra.mxu0 %v4397_v6  ;;  %v1869_v6 = vld [vmem:[#allocation17 + $0x488] sm:$0xff] }
 0x340   : > { %4400 = vmatprep.subr.bf16.mxu0 %v4399_v11  ;;  %v4027_v9 = vpack.c.bf16 %v1875_v7, %v1869_v6  ;;  %v1868_v11 = vld [vmem:[#allocation17 + $0x480] sm:$0xff]  ;;  %v1927_v6 = vld [vmem:[#allocation17 + $0x658] sm:$0xff]  ;;  %v1941_v60 = vld [vmem:[#allocation17 + $0x6c8] sm:$0xff] }
 0x341   : > { %4018 = vmatpush1.bf16.msra.mxu1 %v4017_v17  ;;  %v4029_v14 = vpack.c.bf16 %v1874_v12, %v1868_v11  ;;  %v1881_v17 = vld [vmem:[#allocation17 + $0x4e8] sm:$0xff]  ;;  %v4427_v7 = vpack.c.bf16 %v1927_v6, %v1921_v5  ;;  %v1072_v11 = vld [vmem:[#allocation13] sm:$0x3f]  ;;  %v1110_v12 = vld [vmem:[#allocation14] sm:$0x3f] }
 0x342   : > { %4020 = vmatprep.subr.bf16.mxu1 %v4019_v19  ;;  %v1887_v19 = vld [vmem:[#allocation17 + $0x518] sm:$0xff]  ;;  %v1123_v20 = vrot.slane %v1110_v12, %v6208_v36  ;;  %v1097_v21 = vrot.slane %v1072_v11, %v6226_v47 }
 0x343   : > { %4402 = vmatpush1.bf16.msra.mxu0 %v4401_v18  ;;  %v4413_v18 = vpack.c.bf16 %v1878_v16, %v1872_v15  ;;  %v1089_v15 = vrot.slane %v1072_v11, %v6215_v40  ;;  %v1085_v16 = vrot.slane %v1072_v11, %v6208_v36 }
 0x344   : > { %4404 = vmatprep.subr.bf16.mxu0 %v4403_v22  ;;  %v4031_v22 = vpack.c.bf16 %v1887_v19, %v1881_v17  ;;  %v1115_v19 = vrot.slane %v1110_v12, %v6202_v31 }
 0x345   : > { %4022 = vmatpush1.bf16.msra.mxu1 %v4021_v25  ;;  %v1886_v25 = vld [vmem:[#allocation17 + $0x510] sm:$0xff] }
 0x346   : > { %4024 = vmatprep.subr.bf16.mxu1 %v4023_v61 }
 0x347   : > { %4406 = vmatpush1.bf16.msra.mxu0 %v4405_v26  ;;  %v1884_v26 = vld [vmem:[#allocation17 + $0x500] sm:$0xff] }
 0x348   : > { %4408 = vmatprep.subr.bf16.mxu0 %v4407_v2  ;;  %v4425_v2 = vpack.c.bf16 %v1914_v63, %v1908_v62 }
 0x349   : > { %4026 = vmatpush1.bf16.msra.mxu1 %v4025_v3  ;;  %v1917_v3 = vld [vmem:[#allocation17 + $0x608] sm:$0xff] }
 0x34a   : > { %4028 = vmatprep.subr.bf16.mxu1 %v4027_v9 }
 0x34b   : > { %4410 = vmatpush1.bf16.msra.mxu0 %v4409_v0  ;;  %v4043_v0 = vpack.c.bf16 %v1923_v4, %v1917_v3  ;;  %v1945_v3 = vld [vmem:[#allocation17 + $0x6e8] sm:$0xff]  ;;  %v1951_v4 = vld [vmem:[#allocation17 + $0x718] sm:$0xff] }
 0x34c   : > { %4412 = vmatprep.subr.bf16.mxu0 %v4411_v13  ;;  %v1081_v13 = vrot.slane %v1072_v11, %v6204_v32 }
 0x34d   : > { %4030 = vmatpush1.bf16.msra.mxu1 %v4029_v14  ;;  %v1077_v14 = vrot.slane %v1072_v11, %v6202_v31 }
 0x34e   : > { %4032 = vmatprep.subr.bf16.mxu1 %v4031_v22 }
 0x34f   : > { %4414 = vmatpush1.bf16.msra.mxu0 %v4413_v18  ;;  %v1119_v18 = vrot.slane %v1110_v12, %v6204_v32 }
 0x350   : > { %4416 = vmatprep.subr.bf16.mxu0 %v4415_v23 }
 0x3b6   : > { %v1035_v27 = vpop.xlane.xlu0 %1034 }
 0x3b7   : > { %v1037_v28 = vmul.f32 0.0013020834, %v1035_v27  ;;  %v4033_v27 = vpack.c.bf16 %v1886_v25, %v1880_v24  ;;  %v1916_v24 = vld [vmem:[#allocation17 + $0x600] sm:$0xff]  ;;  %v1922_v25 = vld [vmem:[#allocation17 + $0x630] sm:$0xff] }
 0x3b9   : > { %v6245_v29 = vsub.f32 %v6210_v37, %v1037_v28  ;;  %v6248_v30 = vsub.f32 %v6212_v38, %v1037_v28  ;;  %v6251_v33 = vsub.f32 %v6221_v43, %v1037_v28  ;;  %v6254_v34 = vsub.f32 %v6230_v49, %v1037_v28  ;;  %4034 = vmatpush1.bf16.msra.mxu1 %v4033_v27 }
 0x3ba   : > { %v6257_v35 = vsub.f32 %v6236_v55, %v1037_v28  ;;  %v6266_v38 = vsub.f32 %v6238_v58, %v1037_v28  ;;  %v1890_v28 = vld [vmem:[#allocation17 + $0x530] sm:$0xff] }
 0x3bb   : > { %v1044_v39 = vmul.f32 %v6245_v29, %v6245_v29  ;;  %v1045_v41 = vmul.f32 %v6248_v30, %v6248_v30  ;;  %v1046_v37 = vmul.f32 %v6251_v33, %v6251_v33  ;;  %v1047_v43 = vmul.f32 %v6254_v34, %v6254_v34 }
 0x3bc   : > { %v1048_v44 = vmul.f32 %v6257_v35, %v6257_v35  ;;  %v1049_v50 = vmul.f32 %v6266_v38, %v6266_v38 }
 0x3bd   : > { %v1050_v49 = vsel %vm1022_vm2, %v1044_v39, 0.0  ;;  %v1051_v55 = vsel %vm1022_vm2, %v1045_v41, 0.0  ;;  %v1053_v46 = vsel %vm1022_vm2, %v1046_v37, 0.0  ;;  %v1055_v58 = vsel %vm1022_vm2, %v1047_v43, 0.0  ;;  %v1893_v39 = vld [vmem:[#allocation17 + $0x548] sm:$0xff]  ;;  %v1899_v41 = vld [vmem:[#allocation17 + $0x578] sm:$0xff] }
 0x3be   : > { %v1052_v42 = vadd.f32 %v1051_v55, %v1050_v49  ;;  %v1057_v52 = vsel %vm1022_vm2, %v1048_v44, 0.0  ;;  %v1059_v54 = vsel %vm1022_vm2, %v1049_v50, 0.0  ;;  %v4417_v37 = vpack.c.bf16 %v1890_v28, %v1884_v26  ;;  %v1897_v49 = vld [vmem:[#allocation17 + $0x568] sm:$0xff]  ;;  %v1903_v55 = vld [vmem:[#allocation17 + $0x598] sm:$0xff]  ;;  %v1902_v50 = vld [vmem:[#allocation17 + $0x590] sm:$0xff] }
 0x3bf   : > { %v4035_v43 = vpack.c.bf16 %v1899_v41, %v1893_v39  ;;  %v4419_v44 = vpack.c.bf16 %v1903_v55, %v1897_v49  ;;  %v1920_v28 = vld [vmem:[#allocation17 + $0x620] sm:$0xff]  ;;  %v1926_v39 = vld [vmem:[#allocation17 + $0x650] sm:$0xff]  ;;  %v1093_v49 = vrot.slane %v1072_v11, %v6224_v45  ;;  %v4435_v11 = vpack.c.bf16 %v1951_v4, %v1945_v3 }
 0x3c0   : > { %v1054_v48 = vadd.f32 %v1053_v46, %v1052_v42  ;;  %v1892_v42 = vld [vmem:[#allocation17 + $0x540] sm:$0xff]  ;;  %v1898_v46 = vld [vmem:[#allocation17 + $0x570] sm:$0xff]  ;;  %4418 = vmatpush1.bf16.msra.mxu0 %v4417_v37  ;;  %v1135_v37 = vrot.slane %v1110_v12, %v6226_v47 }
 0x3c1   : > { %4036 = vmatprep.subr.bf16.mxu1 %v4035_v43  ;;  %4420 = vmatprep.subr.bf16.mxu0 %v4419_v44  ;;  %v1988_v3 = vld [vmem:[#allocation17 + $0x840] sm:$0xff]  ;;  %v1994_v4 = vld [vmem:[#allocation17 + $0x870] sm:$0xff] }
 0x3c2   : > { %v1056_v51 = vadd.f32 %v1055_v58, %v1054_v48  ;;  %v1896_v48 = vld [vmem:[#allocation17 + $0x560] sm:$0xff]  ;;  %v4037_v58 = vpack.c.bf16 %v1898_v46, %v1892_v42  ;;  %v1929_v42 = vld [vmem:[#allocation17 + $0x668] sm:$0xff]  ;;  %v4045_v46 = vpack.c.bf16 %v1922_v25, %v1916_v24  ;;  %v1962_v25 = vld [vmem:[#allocation17 + $0x770] sm:$0xff] }
 0x3c3   : > { %v1956_v24 = vld [vmem:[#allocation17 + $0x740] sm:$0xff] }
 0x3c4   : > { %v1058_v53 = vadd.f32 %v1057_v52, %v1056_v51  ;;  %v1905_v51 = vld [vmem:[#allocation17 + $0x5a8] sm:$0xff]  ;;  %v1911_v52 = vld [vmem:[#allocation17 + $0x5d8] sm:$0xff]  ;;  %4038 = vmatpush1.bf16.msra.mxu1 %v4037_v58 }
 0x3c6   : > { %v1060_v56 = vadd.f32 %v1059_v54, %v1058_v53  ;;  %v1909_v53 = vld [vmem:[#allocation17 + $0x5c8] sm:$0xff]  ;;  %v4421_v54 = vpack.c.bf16 %v1902_v50, %v1896_v48  ;;  %v1935_v48 = vld [vmem:[#allocation17 + $0x698] sm:$0xff] }
 0x3c7   : > { %v4423_v61 = vpack.c.bf16 %v1915_v57, %v1909_v53  ;;  %v1939_v50 = vld [vmem:[#allocation17 + $0x6b8] sm:$0xff]  ;;  %v1928_v53 = vld [vmem:[#allocation17 + $0x660] sm:$0xff]  ;;  %v4047_v63 = vpack.c.bf16 %v1935_v48, %v1929_v42  ;;  %v1974_v42 = vld [vmem:[#allocation17 + $0x7d0] sm:$0xff] }
 0x3c8   : > { %1061 = vadd.xlane.f32.xlu0 %v1060_v56  ;;  %v4039_v56 = vpack.c.bf16 %v1911_v52, %v1905_v51  ;;  %4422 = vmatpush1.bf16.msra.mxu0 %v4421_v54  ;;  %v1934_v54 = vld [vmem:[#allocation17 + $0x690] sm:$0xff]  ;;  %v1932_v57 = vld [vmem:[#allocation17 + $0x680] sm:$0xff]  ;;  %v1987_v48 = vld [vmem:[#allocation17 + $0x838] sm:$0xff] }
 0x3c9   : > { %4424 = vmatprep.subr.bf16.mxu0 %v4423_v61  ;;  %v4049_v6 = vpack.c.bf16 %v1934_v54, %v1928_v53  ;;  %v1980_v54 = vld [vmem:[#allocation17 + $0x800] sm:$0xff] }
 0x3ca   : > { %4040 = vmatprep.subr.bf16.mxu1 %v4039_v56 }
 0x3cb   : > { %4042 = vmatpush1.bf16.msra.mxu1 %v4041_v1 }
 0x3cc   : > { %4426 = vmatpush1.bf16.msra.mxu0 %v4425_v2  ;;  %4044 = vmatprep.subr.bf16.mxu1 %v4043_v0  ;;  %v1947_v2 = vld [vmem:[#allocation17 + $0x6f8] sm:$0xff] }
 0x3cd   : > { %4428 = vmatprep.subr.bf16.mxu0 %v4427_v7  ;;  %v4433_v7 = vpack.c.bf16 %v1938_v59, %v1932_v57  ;;  %v1986_v57 = vld [vmem:[#allocation17 + $0x830] sm:$0xff]  ;;  %v1989_v59 = vld [vmem:[#allocation17 + $0x848] sm:$0xff] }
 0x455   : > { %v1062_v8 = vpop.xlane.xlu0 %1061 }
 0x456   : > { %v1063_v9 = vmul.f32 0.0013020834, %v1062_v8  ;;  %v1940_v8 = vld [vmem:[#allocation17 + $0x6c0] sm:$0xff] }
 0x458   : > { %v1064_v10 = vadd.f32 1e-05, %v1063_v9  ;;  %v1946_v9 = vld [vmem:[#allocation17 + $0x6f0] sm:$0xff] }
 0x45a   : > { %5311 = vrsqrt.f32 %v1064_v10  ;;  %v4051_v10 = vpack.c.bf16 %v1947_v2, %v1941_v60  ;;  %v1995_v60 = vld [vmem:[#allocation17 + $0x878] sm:$0xff]  ;;  %v4449_v2 = vpack.c.bf16 %v1986_v57, %v1980_v54  ;;  %v2041_v54 = vld [vmem:[#allocation17 + $0x9e8] sm:$0xff] }
 0x45b   : > { %v2047_v57 = vld [vmem:[#allocation17 + $0xa18] sm:$0xff] }
 0x464   : > { %v5312_v17 = vpop.eup %5311 }
 0x465   : > { %v1067_v22 = vmul.f32 %v5312_v17, %v6248_v30  ;;  %v1066_v23 = vmul.f32 %v5312_v17, %v6245_v29  ;;  %v1069_v26 = vmul.f32 %v5312_v17, %v6254_v34  ;;  %v1068_v27 = vmul.f32 %v5312_v17, %v6251_v33  ;;  %v1933_v33 = vld [vmem:[#allocation17 + $0x688] sm:$0xff] }
 0x466   : > { %v1071_v41 = vmul.f32 %v5312_v17, %v6266_v38  ;;  %v1070_v43 = vmul.f32 %v5312_v17, %v6257_v35  ;;  %v1127_v29 = vrot.slane %v1110_v12, %v6215_v40  ;;  %v1131_v38 = vrot.slane %v1110_v12, %v6224_v45  ;;  %v1944_v12 = vld [vmem:[#allocation17 + $0x6e0] sm:$0xff]  ;;  %v1963_v17 = vld [vmem:[#allocation17 + $0x778] sm:$0xff] }
 0x467   : > { %v1105_v55 = vmul.f32 %v1081_v13, %v1067_v22  ;;  %v1104_v30 = vmul.f32 %v1077_v14, %v1066_v23  ;;  %v1106_v44 = vmul.f32 %v1085_v16, %v1068_v27  ;;  %v1107_v34 = vmul.f32 %v1089_v15, %v1069_v26  ;;  %v1950_v13 = vld [vmem:[#allocation17 + $0x710] sm:$0xff]  ;;  %v1953_v14 = vld [vmem:[#allocation17 + $0x728] sm:$0xff]  ;;  %v1959_v15 = vld [vmem:[#allocation17 + $0x758] sm:$0xff] }
 0x468   : > { %v1109_v58 = vmul.f32 %v1097_v21, %v1071_v41  ;;  %v4429_v35 = vpack.c.bf16 %v1926_v39, %v1920_v28  ;;  %v1108_v62 = vmul.f32 %v1093_v49, %v1070_v43  ;;  %v4431_v1 = vpack.c.bf16 %v1939_v50, %v1933_v33  ;;  %v1957_v16 = vld [vmem:[#allocation17 + $0x748] sm:$0xff]  ;;  %v1958_v21 = vld [vmem:[#allocation17 + $0x750] sm:$0xff]  ;;  %v1971_v27 = vld [vmem:[#allocation17 + $0x7b8] sm:$0xff] }
 0x469   : > { %v6298_v51 = vadd.f32 %v1119_v18, %v1105_v55  ;;  %v6300_v52 = vadd.f32 %v1115_v19, %v1104_v30  ;;  %v6302_v56 = vadd.f32 %v1123_v20, %v1106_v44  ;;  %v6310_v5 = vadd.f32 %v1127_v29, %v1107_v34  ;;  %v1952_v20 = vld [vmem:[#allocation17 + $0x720] sm:$0xff]  ;;  %v1965_v26 = vld [vmem:[#allocation17 + $0x788] sm:$0xff]  ;;  %v1975_v39 = vld [vmem:[#allocation17 + $0x7d8] sm:$0xff] }
 0x46a   : > { %v6304_v61 = vadd.f32 %v1135_v37, %v1109_v58  ;;  %v6312_v0 = vadd.f32 %v1131_v38, %v1108_v62  ;;  %v4053_v18 = vpack.c.bf16 %v1946_v9, %v1940_v8  ;;  %v4437_v19 = vpack.c.bf16 %v1950_v13, %v1944_v12  ;;  %v1969_v28 = vld [vmem:[#allocation17 + $0x7a8] sm:$0xff]  ;;  %v1964_v43 = vld [vmem:[#allocation17 + $0x780] sm:$0xff]  ;;  %v1970_v49 = vld [vmem:[#allocation17 + $0x7b0] sm:$0xff] }
 0x46b   : > { %2364 = vmatprep.mubr.f32.mxu1 %v6298_v51  ;;  %2790 = vmatprep.mubr.f32.mxu0 %v6298_v51  ;;  %v4055_v22 = vpack.c.bf16 %v1959_v15, %v1953_v14  ;;  %v4439_v23 = vpack.c.bf16 %v1963_v17, %v1957_v16  ;;  %v4057_v41 = vpack.c.bf16 %v1958_v21, %v1952_v20  ;;  %v1968_v29 = vld [vmem:[#allocation17 + $0x7a0] sm:$0xff]  ;;  %v1977_v44 = vld [vmem:[#allocation17 + $0x7e8] sm:$0xff]  ;;  %v1982_v38 = vld [vmem:[#allocation17 + $0x810] sm:$0xff] }
 0x46c   : > { %2365 = vmatmul.mubr.f32.vlgmr.msra.gmra.mrb[4].mxu1 %v6300_v52  ;;  %2791 = vmatmul.mubr.f32.vlgmr.msra.gmra.mrb[4].mxu0 %v6300_v52  ;;  %v4441_v37 = vpack.c.bf16 %v1962_v25, %v1956_v24  ;;  %v4059_v55 = vpack.c.bf16 %v1971_v27, %v1965_v26  ;;  %v4443_v30 = vpack.c.bf16 %v1975_v39, %v1969_v28  ;;  %v1981_v34 = vld [vmem:[#allocation17 + $0x808] sm:$0xff]  ;;  %v1976_v58 = vld [vmem:[#allocation17 + $0x7e0] sm:$0xff]  ;;  %v1998_v9 = vld [vmem:[#allocation17 + $0x890] sm:$0xff] }
 0x46d   : > { %4046 = vmatpush1.bf16.msra.mxu1 %v4045_v46  ;;  %4430 = vmatpush1.bf16.msra.mxu0 %v4429_v35  ;;  %v1983_v46 = vld [vmem:[#allocation17 + $0x818] sm:$0xff]  ;;  %v4061_v33 = vpack.c.bf16 %v1970_v49, %v1964_v43  ;;  %v4445_v50 = vpack.c.bf16 %v1974_v42, %v1968_v29  ;;  %v4447_v53 = vpack.c.bf16 %v1987_v48, %v1981_v34  ;;  %v1993_v62 = vld [vmem:[#allocation17 + $0x868] sm:$0xff]  ;;  %v1992_v8 = vld [vmem:[#allocation17 + $0x860] sm:$0xff] }
 0x46e   : > { %2435 = vmatprep.mubr.f32.mxu1 %v6310_v5  ;;  %2861 = vmatprep.mubr.f32.mxu0 %v6310_v5  ;;  %v4063_v35 = vpack.c.bf16 %v1983_v46, %v1977_v44  ;;  %v2005_v12 = vld [vmem:[#allocation17 + $0x8c8] sm:$0xff]  ;;  %v2011_v13 = vld [vmem:[#allocation17 + $0x8f8] sm:$0xff]  ;;  %v4069_v14 = vpack.c.bf16 %v1994_v4, %v1988_v3  ;;  %v4453_v15 = vpack.c.bf16 %v1998_v9, %v1992_v8  ;;  %v2000_v16 = vld [vmem:[#allocation17 + $0x8a0] sm:$0xff] }
 0x46f   : > { %4048 = vmatprep.subr.bf16.mxu1 %v4047_v63  ;;  %4432 = vmatprep.subr.bf16.mxu0 %v4431_v1  ;;  %v1999_v63 = vld [vmem:[#allocation17 + $0x898] sm:$0xff]  ;;  %v4065_v1 = vpack.c.bf16 %v1982_v38, %v1976_v58  ;;  %v2006_v17 = vld [vmem:[#allocation17 + $0x8d0] sm:$0xff]  ;;  %v2004_v20 = vld [vmem:[#allocation17 + $0x8c0] sm:$0xff] }
 0x470   : > { %v2010_v21 = vld [vmem:[#allocation17 + $0x8f0] sm:$0xff]  ;;  %v2017_v24 = vld [vmem:[#allocation17 + $0x928] sm:$0xff]  ;;  %v2023_v25 = vld [vmem:[#allocation17 + $0x958] sm:$0xff]  ;;  %v4073_v26 = vpack.c.bf16 %v2006_v17, %v2000_v16 }
 0x471   : > { %4050 = vmatpush1.bf16.msra.mxu1 %v4049_v6  ;;  %4434 = vmatpush1.bf16.msra.mxu0 %v4433_v7  ;;  %v4067_v6 = vpack.c.bf16 %v1995_v60, %v1989_v59  ;;  %v4451_v7 = vpack.c.bf16 %v1999_v63, %v1993_v62  ;;  %v4457_v27 = vpack.c.bf16 %v2010_v21, %v2004_v20  ;;  %v2012_v28 = vld [vmem:[#allocation17 + $0x900] sm:$0xff]  ;;  %v2018_v39 = vld [vmem:[#allocation17 + $0x930] sm:$0xff]  ;;  %v2029_v29 = vld [vmem:[#allocation17 + $0x988] sm:$0xff] }
 0x472   : > { %4052 = vmatprep.subr.bf16.mxu1 %v4051_v10  ;;  %4436 = vmatprep.subr.bf16.mxu0 %v4435_v11  ;;  %v2001_v10 = vld [vmem:[#allocation17 + $0x8a8] sm:$0xff]  ;;  %v2007_v11 = vld [vmem:[#allocation17 + $0x8d8] sm:$0xff]  ;;  %v2016_v43 = vld [vmem:[#allocation17 + $0x920] sm:$0xff]  ;;  %v4077_v44 = vpack.c.bf16 %v2018_v39, %v2012_v28 }
 0x473   : > { %v2022_v49 = vld [vmem:[#allocation17 + $0x950] sm:$0xff]  ;;  %v2035_v42 = vld [vmem:[#allocation17 + $0x9b8] sm:$0xff]  ;;  %v2024_v34 = vld [vmem:[#allocation17 + $0x960] sm:$0xff] }
 0x474   : > { %v4461_v46 = vpack.c.bf16 %v2022_v49, %v2016_v43  ;;  %v2030_v48 = vld [vmem:[#allocation17 + $0x990] sm:$0xff]  ;;  %v2028_v58 = vld [vmem:[#allocation17 + $0x980] sm:$0xff]  ;;  %v2053_v8 = vld [vmem:[#allocation17 + $0xa48] sm:$0xff] }
 0x475   : > { %4054 = vmatpush1.bf16.msra.mxu1 %v4053_v18  ;;  %4438 = vmatpush1.bf16.msra.mxu0 %v4437_v19  ;;  %v4071_v18 = vpack.c.bf16 %v2007_v11, %v2001_v10  ;;  %v4455_v19 = vpack.c.bf16 %v2011_v13, %v2005_v12  ;;  %v2034_v38 = vld [vmem:[#allocation17 + $0x9b0] sm:$0xff]  ;;  %v4081_v59 = vpack.c.bf16 %v2030_v48, %v2024_v34  ;;  %v2036_v62 = vld [vmem:[#allocation17 + $0x9c0] sm:$0xff]  ;;  %v2059_v9 = vld [vmem:[#allocation17 + $0xa78] sm:$0xff] }
 0x476   : > { %4056 = vmatprep.subr.bf16.mxu1 %v4055_v22  ;;  %4440 = vmatprep.subr.bf16.mxu0 %v4439_v23  ;;  %v2013_v22 = vld [vmem:[#allocation17 + $0x908] sm:$0xff]  ;;  %v2019_v23 = vld [vmem:[#allocation17 + $0x938] sm:$0xff]  ;;  %v4465_v60 = vpack.c.bf16 %v2034_v38, %v2028_v58  ;;  %v2042_v63 = vld [vmem:[#allocation17 + $0x9f0] sm:$0xff] }
 0x477   : > { %v2040_v3 = vld [vmem:[#allocation17 + $0x9e0] sm:$0xff]  ;;  %v2046_v4 = vld [vmem:[#allocation17 + $0xa10] sm:$0xff]  ;;  %v4085_v10 = vpack.c.bf16 %v2042_v63, %v2036_v62  ;;  %v2065_v20 = vld [vmem:[#allocation17 + $0xaa8] sm:$0xff] }
 0x478   : > { %v4469_v11 = vpack.c.bf16 %v2046_v4, %v2040_v3  ;;  %v2048_v12 = vld [vmem:[#allocation17 + $0xa20] sm:$0xff]  ;;  %v2054_v13 = vld [vmem:[#allocation17 + $0xa50] sm:$0xff]  ;;  %v2071_v21 = vld [vmem:[#allocation17 + $0xad8] sm:$0xff] }
 0x479   : > { %4058 = vmatpush1.bf16.msra.mxu1 %v4057_v41  ;;  %4442 = vmatpush1.bf16.msra.mxu0 %v4441_v37  ;;  %v4075_v41 = vpack.c.bf16 %v2019_v23, %v2013_v22  ;;  %v4459_v37 = vpack.c.bf16 %v2023_v25, %v2017_v24  ;;  %v2052_v16 = vld [vmem:[#allocation17 + $0xa40] sm:$0xff]  ;;  %v2058_v17 = vld [vmem:[#allocation17 + $0xa70] sm:$0xff]  ;;  %v4089_v22 = vpack.c.bf16 %v2054_v13, %v2048_v12  ;;  %v2077_v43 = vld [vmem:[#allocation17 + $0xb08] sm:$0xff] }
 0x47a   : > { %4060 = vmatprep.subr.bf16.mxu1 %v4059_v55  ;;  %4444 = vmatprep.subr.bf16.mxu0 %v4443_v30  ;;  %v2025_v55 = vld [vmem:[#allocation17 + $0x968] sm:$0xff]  ;;  %v2031_v30 = vld [vmem:[#allocation17 + $0x998] sm:$0xff]  ;;  %v4473_v23 = vpack.c.bf16 %v2058_v17, %v2052_v16  ;;  %v2060_v24 = vld [vmem:[#allocation17 + $0xa80] sm:$0xff] }
 0x47b   : > { %v2066_v25 = vld [vmem:[#allocation17 + $0xab0] sm:$0xff]  ;;  %v2064_v28 = vld [vmem:[#allocation17 + $0xaa0] sm:$0xff]  ;;  %v2083_v49 = vld [vmem:[#allocation17 + $0xb38] sm:$0xff] }
 0x47c   : > { %v2070_v39 = vld [vmem:[#allocation17 + $0xad0] sm:$0xff]  ;;  %v2076_v34 = vld [vmem:[#allocation17 + $0xb00] sm:$0xff]  ;;  %v2089_v58 = vld [vmem:[#allocation17 + $0xb68] sm:$0xff] }
 0x47d   : > { %4062 = vmatpush1.bf16.msra.mxu1 %v4061_v33  ;;  %4446 = vmatpush1.bf16.msra.mxu0 %v4445_v50  ;;  %v4079_v33 = vpack.c.bf16 %v2031_v30, %v2025_v55  ;;  %v4463_v50 = vpack.c.bf16 %v2035_v42, %v2029_v29  ;;  %v4093_v55 = vpack.c.bf16 %v2066_v25, %v2060_v24  ;;  %v2072_v29 = vld [vmem:[#allocation17 + $0xae0] sm:$0xff]  ;;  %v2078_v42 = vld [vmem:[#allocation17 + $0xb10] sm:$0xff]  ;;  %v2095_v38 = vld [vmem:[#allocation17 + $0xb98] sm:$0xff] }
 0x47e   : > { %4064 = vmatprep.subr.bf16.mxu1 %v4063_v35  ;;  %4448 = vmatprep.subr.bf16.mxu0 %v4447_v53  ;;  %v2037_v35 = vld [vmem:[#allocation17 + $0x9c8] sm:$0xff]  ;;  %v2043_v53 = vld [vmem:[#allocation17 + $0x9f8] sm:$0xff]  ;;  %v4477_v30 = vpack.c.bf16 %v2070_v39, %v2064_v28  ;;  %v2082_v48 = vld [vmem:[#allocation17 + $0xb30] sm:$0xff] }
 0x47f   : > { %v2088_v62 = vld [vmem:[#allocation17 + $0xb60] sm:$0xff]  ;;  %v2094_v63 = vld [vmem:[#allocation17 + $0xb90] sm:$0xff]  ;;  %v2101_v3 = vld [vmem:[#allocation17 + $0xbc8] sm:$0xff] }
 0x480   : > { %v2107_v4 = vld [vmem:[#allocation17 + $0xbf8] sm:$0xff]  ;;  %v2100_v12 = vld [vmem:[#allocation17 + $0xbc0] sm:$0xff]  ;;  %v2106_v13 = vld [vmem:[#allocation17 + $0xbf0] sm:$0xff] }
 0x481   : > { %4066 = vmatpush1.bf16.msra.mxu1 %v4065_v1  ;;  %4450 = vmatpush1.bf16.msra.mxu0 %v4449_v2  ;;  %v4083_v1 = vpack.c.bf16 %v2043_v53, %v2037_v35  ;;  %v4467_v2 = vpack.c.bf16 %v2047_v57, %v2041_v54  ;;  %v4097_v35 = vpack.c.bf16 %v2078_v42, %v2072_v29  ;;  %v2084_v54 = vld [vmem:[#allocation17 + $0xb40] sm:$0xff]  ;;  %v2090_v57 = vld [vmem:[#allocation17 + $0xb70] sm:$0xff]  ;;  %v2113_v16 = vld [vmem:[#allocation17 + $0xc28] sm:$0xff] }
 0x482   : > { %4068 = vmatprep.subr.bf16.mxu1 %v4067_v6  ;;  %4452 = vmatprep.subr.bf16.mxu0 %v4451_v7  ;;  %v2049_v6 = vld [vmem:[#allocation17 + $0xa28] sm:$0xff]  ;;  %v2055_v7 = vld [vmem:[#allocation17 + $0xa58] sm:$0xff]  ;;  %v4481_v53 = vpack.c.bf16 %v2082_v48, %v2076_v34  ;;  %v2112_v24 = vld [vmem:[#allocation17 + $0xc20] sm:$0xff] }
 0x483   : > { %v2119_v17 = vld [vmem:[#allocation17 + $0xc58] sm:$0xff]  ;;  %v2118_v25 = vld [vmem:[#allocation17 + $0xc50] sm:$0xff]  ;;  %v2125_v28 = vld [vmem:[#allocation17 + $0xc88] sm:$0xff] }
 0x484   : > { %v2131_v39 = vld [vmem:[#allocation17 + $0xcb8] sm:$0xff]  ;;  %v2130_v42 = vld [vmem:[#allocation17 + $0xcb0] sm:$0xff]  ;;  %v2137_v34 = vld [vmem:[#allocation17 + $0xce8] sm:$0xff] }
 0x485   : > { %4070 = vmatpush1.bf16.msra.mxu1 %v4069_v14  ;;  %4454 = vmatpush1.bf16.msra.mxu0 %v4453_v15  ;;  %v4087_v14 = vpack.c.bf16 %v2055_v7, %v2049_v6  ;;  %v4471_v15 = vpack.c.bf16 %v2059_v9, %v2053_v8  ;;  %v4101_v6 = vpack.c.bf16 %v2090_v57, %v2084_v54  ;;  %v2096_v8 = vld [vmem:[#allocation17 + $0xba0] sm:$0xff]  ;;  %v2102_v9 = vld [vmem:[#allocation17 + $0xbd0] sm:$0xff]  ;;  %v2143_v48 = vld [vmem:[#allocation17 + $0xd18] sm:$0xff] }
 0x486   : > { %4072 = vmatprep.subr.bf16.mxu1 %v4071_v18  ;;  %4456 = vmatprep.subr.bf16.mxu0 %v4455_v19  ;;  %v2061_v18 = vld [vmem:[#allocation17 + $0xa88] sm:$0xff]  ;;  %v2067_v19 = vld [vmem:[#allocation17 + $0xab8] sm:$0xff]  ;;  %v4485_v7 = vpack.c.bf16 %v2094_v63, %v2088_v62  ;;  %v4495_v29 = vpack.c.bf16 %v2131_v39, %v2125_v28  ;;  %v4499_v54 = vpack.c.bf16 %v2143_v48, %v2137_v34  ;;  %v2142_v57 = vld [vmem:[#allocation17 + $0xd10] sm:$0xff] }
 0x487   : > { %v2149_v62 = vld [vmem:[#allocation17 + $0xd48] sm:$0xff]  ;;  %v2155_v63 = vld [vmem:[#allocation17 + $0xd78] sm:$0xff]  ;;  %v2168_v39 = vld [vmem:[#allocation17 + $0xde0] sm:$0xff] }
 0x488   : > { %v2180_v48 = vld [vmem:[#allocation17 + $0xe40] sm:$0xff] }
 0x489   : > { %4074 = vmatpush1.bf16.msra.mxu1 %v4073_v26  ;;  %4458 = vmatpush1.bf16.msra.mxu0 %v4457_v27  ;;  %v4091_v26 = vpack.c.bf16 %v2067_v19, %v2061_v18  ;;  %v4475_v27 = vpack.c.bf16 %v2071_v21, %v2065_v20  ;;  %v4105_v18 = vpack.c.bf16 %v2102_v9, %v2096_v8  ;;  %v2154_v9 = vld [vmem:[#allocation17 + $0xd70] sm:$0xff] }
 0x48a   : > { %4076 = vmatprep.subr.bf16.mxu1 %v4075_v41  ;;  %4460 = vmatprep.subr.bf16.mxu0 %v4459_v37  ;;  %v2073_v41 = vld [vmem:[#allocation17 + $0xae8] sm:$0xff]  ;;  %v2079_v37 = vld [vmem:[#allocation17 + $0xb18] sm:$0xff]  ;;  %v4489_v19 = vpack.c.bf16 %v2106_v13, %v2100_v12  ;;  %v4491_v21 = vpack.c.bf16 %v2119_v17, %v2113_v16  ;;  %v4503_v8 = vpack.c.bf16 %v2155_v63, %v2149_v62  ;;  %v2156_v17 = vld [vmem:[#allocation17 + $0xd80] sm:$0xff] }
 0x48b   : > { %v2161_v12 = vld [vmem:[#allocation17 + $0xda8] sm:$0xff]  ;;  %v2167_v13 = vld [vmem:[#allocation17 + $0xdd8] sm:$0xff]  ;;  %v2192_v63 = vld [vmem:[#allocation17 + $0xea0] sm:$0xff] }
 0x48d   : > { %4078 = vmatpush1.bf16.msra.mxu1 %v4077_v44  ;;  %4462 = vmatpush1.bf16.msra.mxu0 %v4461_v46  ;;  %v4095_v44 = vpack.c.bf16 %v2079_v37, %v2073_v41  ;;  %v4479_v46 = vpack.c.bf16 %v2083_v49, %v2077_v43  ;;  %v4493_v37 = vpack.c.bf16 %v2118_v25, %v2112_v24  ;;  %v2120_v43 = vld [vmem:[#allocation17 + $0xc60] sm:$0xff]  ;;  %v2126_v49 = vld [vmem:[#allocation17 + $0xc90] sm:$0xff]  ;;  %v2173_v24 = vld [vmem:[#allocation17 + $0xe08] sm:$0xff] }
 0x48e   : > { %4080 = vmatprep.subr.bf16.mxu1 %v4079_v33  ;;  %4464 = vmatprep.subr.bf16.mxu0 %v4463_v50  ;;  %v2085_v33 = vld [vmem:[#allocation17 + $0xb48] sm:$0xff]  ;;  %v2091_v50 = vld [vmem:[#allocation17 + $0xb78] sm:$0xff] }
 0x48f   : > { %v2179_v25 = vld [vmem:[#allocation17 + $0xe38] sm:$0xff] }
 0x491   : > { %4082 = vmatpush1.bf16.msra.mxu1 %v4081_v59  ;;  %4466 = vmatpush1.bf16.msra.mxu0 %v4465_v60  ;;  %v4099_v59 = vpack.c.bf16 %v2091_v50, %v2085_v33  ;;  %v4483_v60 = vpack.c.bf16 %v2095_v38, %v2089_v58  ;;  %v4113_v33 = vpack.c.bf16 %v2126_v49, %v2120_v43  ;;  %v2132_v38 = vld [vmem:[#allocation17 + $0xcc0] sm:$0xff]  ;;  %v2178_v49 = vld [vmem:[#allocation17 + $0xe30] sm:$0xff] }
 0x492   : > { %4084 = vmatprep.subr.bf16.mxu1 %v4083_v1  ;;  %4468 = vmatprep.subr.bf16.mxu0 %v4467_v2  ;;  %v2097_v1 = vld [vmem:[#allocation17 + $0xba8] sm:$0xff]  ;;  %v2103_v2 = vld [vmem:[#allocation17 + $0xbd8] sm:$0xff]  ;;  %v4511_v43 = vpack.c.bf16 %v2179_v25, %v2173_v24  ;;  %v2216_v25 = vld [vmem:[#allocation17 + $0xf60] sm:$0xff] }
 0x495   : > { %4086 = vmatpush1.bf16.msra.mxu1 %v4085_v10  ;;  %4470 = vmatpush1.bf16.msra.mxu0 %v4469_v11  ;;  %v4103_v10 = vpack.c.bf16 %v2103_v2, %v2097_v1  ;;  %v4487_v11 = vpack.c.bf16 %v2107_v4, %v2101_v3  ;;  %v2144_v4 = vld [vmem:[#allocation17 + $0xd20] sm:$0xff] }
 0x496   : > { %4088 = vmatprep.subr.bf16.mxu1 %v4087_v14  ;;  %4472 = vmatprep.subr.bf16.mxu0 %v4471_v15  ;;  %v2109_v14 = vld [vmem:[#allocation17 + $0xc08] sm:$0xff]  ;;  %v2115_v15 = vld [vmem:[#allocation17 + $0xc38] sm:$0xff] }
 0x497   : > { %v4107_v20 = vpack.c.bf16 %v2115_v15, %v2109_v14 }
 0x499   : > { %4090 = vmatpush1.bf16.msra.mxu1 %v4089_v22  ;;  %4474 = vmatpush1.bf16.msra.mxu0 %v4473_v23  ;;  %v2108_v22 = vld [vmem:[#allocation17 + $0xc00] sm:$0xff]  ;;  %v2114_v23 = vld [vmem:[#allocation17 + $0xc30] sm:$0xff] }
 0x49a   : > { %4092 = vmatprep.subr.bf16.mxu1 %v4091_v26  ;;  %4476 = vmatprep.subr.bf16.mxu0 %v4475_v27  ;;  %v2121_v26 = vld [vmem:[#allocation17 + $0xc68] sm:$0xff]  ;;  %v2127_v27 = vld [vmem:[#allocation17 + $0xc98] sm:$0xff]  ;;  %v4109_v41 = vpack.c.bf16 %v2114_v23, %v2108_v22 }
 0x49b   : > { %v2169_v22 = vld [vmem:[#allocation17 + $0xde8] sm:$0xff]  ;;  %v2175_v23 = vld [vmem:[#allocation17 + $0xe18] sm:$0xff] }
 0x49c   : > { %v4127_v28 = vpack.c.bf16 %v2175_v23, %v2169_v22 }
 0x49d   : > { %4094 = vmatpush1.bf16.msra.mxu1 %v4093_v55  ;;  %4478 = vmatpush1.bf16.msra.mxu0 %v4477_v30  ;;  %v2124_v55 = vld [vmem:[#allocation17 + $0xc80] sm:$0xff]  ;;  %v4111_v30 = vpack.c.bf16 %v2127_v27, %v2121_v26 }
 0x49e   : > { %4096 = vmatprep.subr.bf16.mxu1 %v4095_v44  ;;  %4480 = vmatprep.subr.bf16.mxu0 %v4479_v46  ;;  %v2133_v44 = vld [vmem:[#allocation17 + $0xcc8] sm:$0xff]  ;;  %v2139_v46 = vld [vmem:[#allocation17 + $0xcf8] sm:$0xff]  ;;  %v4497_v50 = vpack.c.bf16 %v2130_v42, %v2124_v55 }
 0x49f   : > { %v4115_v58 = vpack.c.bf16 %v2139_v46, %v2133_v44  ;;  %v2181_v55 = vld [vmem:[#allocation17 + $0xe48] sm:$0xff]  ;;  %v2191_v42 = vld [vmem:[#allocation17 + $0xe98] sm:$0xff] }
 0x4a1   : > { %4098 = vmatpush1.bf16.msra.mxu1 %v4097_v35  ;;  %4482 = vmatpush1.bf16.msra.mxu0 %v4481_v53  ;;  %v2138_v35 = vld [vmem:[#allocation17 + $0xcf0] sm:$0xff]  ;;  %v2136_v53 = vld [vmem:[#allocation17 + $0xce0] sm:$0xff] }
 0x4a2   : > { %4100 = vmatprep.subr.bf16.mxu1 %v4099_v59  ;;  %4484 = vmatprep.subr.bf16.mxu0 %v4483_v60  ;;  %v2145_v59 = vld [vmem:[#allocation17 + $0xd28] sm:$0xff]  ;;  %v2151_v60 = vld [vmem:[#allocation17 + $0xd58] sm:$0xff]  ;;  %v4117_v1 = vpack.c.bf16 %v2138_v35, %v2132_v38  ;;  %v4501_v2 = vpack.c.bf16 %v2142_v57, %v2136_v53  ;;  %v2190_v38 = vld [vmem:[#allocation17 + $0xe90] sm:$0xff] }
 0x4a3   : > { %v4119_v3 = vpack.c.bf16 %v2151_v60, %v2145_v59  ;;  %v2193_v35 = vld [vmem:[#allocation17 + $0xea8] sm:$0xff]  ;;  %v2199_v53 = vld [vmem:[#allocation17 + $0xed8] sm:$0xff] }
 0x4a4   : > { %v2203_v57 = vld [vmem:[#allocation17 + $0xef8] sm:$0xff]  ;;  %v4135_v62 = vpack.c.bf16 %v2199_v53, %v2193_v35 }
 0x4a5   : > { %4102 = vmatpush1.bf16.msra.mxu1 %v4101_v6  ;;  %4486 = vmatpush1.bf16.msra.mxu0 %v4485_v7  ;;  %v2150_v6 = vld [vmem:[#allocation17 + $0xd50] sm:$0xff]  ;;  %v2148_v7 = vld [vmem:[#allocation17 + $0xd40] sm:$0xff] }
 0x4a6   : > { %4104 = vmatprep.subr.bf16.mxu1 %v4103_v10  ;;  %4488 = vmatprep.subr.bf16.mxu0 %v4487_v11  ;;  %v2157_v10 = vld [vmem:[#allocation17 + $0xd88] sm:$0xff]  ;;  %v2163_v11 = vld [vmem:[#allocation17 + $0xdb8] sm:$0xff]  ;;  %v4121_v14 = vpack.c.bf16 %v2150_v6, %v2144_v4  ;;  %v4505_v15 = vpack.c.bf16 %v2154_v9, %v2148_v7  ;;  %v2202_v4 = vld [vmem:[#allocation17 + $0xef0] sm:$0xff] }
 0x4a7   : > { %v4123_v16 = vpack.c.bf16 %v2163_v11, %v2157_v10  ;;  %v2205_v6 = vld [vmem:[#allocation17 + $0xf08] sm:$0xff]  ;;  %v2211_v7 = vld [vmem:[#allocation17 + $0xf38] sm:$0xff] }
 0x4a8   : > { %v2215_v9 = vld [vmem:[#allocation17 + $0xf58] sm:$0xff] }
 0x4a9   : > { %4106 = vmatpush1.bf16.msra.mxu1 %v4105_v18  ;;  %4490 = vmatpush1.bf16.msra.mxu0 %v4489_v19  ;;  %v2162_v18 = vld [vmem:[#allocation17 + $0xdb0] sm:$0xff]  ;;  %v2160_v19 = vld [vmem:[#allocation17 + $0xda0] sm:$0xff] }
 0x4aa   : > { %4108 = vmatprep.subr.bf16.mxu1 %v4107_v20  ;;  %4492 = vmatprep.subr.bf16.mxu0 %v4491_v21  ;;  %v4507_v20 = vpack.c.bf16 %v2167_v13, %v2161_v12  ;;  %v2166_v21 = vld [vmem:[#allocation17 + $0xdd0] sm:$0xff]  ;;  %v4125_v26 = vpack.c.bf16 %v2162_v18, %v2156_v17  ;;  %v4139_v12 = vpack.c.bf16 %v2211_v7, %v2205_v6  ;;  %v2204_v13 = vld [vmem:[#allocation17 + $0xf00] sm:$0xff]  ;;  %v2217_v18 = vld [vmem:[#allocation17 + $0xf68] sm:$0xff] }
 0x4ab   : > { %v4509_v27 = vpack.c.bf16 %v2166_v21, %v2160_v19  ;;  %v2214_v17 = vld [vmem:[#allocation17 + $0xf50] sm:$0xff]  ;;  %v2223_v19 = vld [vmem:[#allocation17 + $0xf98] sm:$0xff] }
 0x4ac   : > { %2436 = vmatmul.mubr.f32.vlgmr.msra.gmra.mrb[4].mxu1 %v6302_v56  ;;  %2862 = vmatmul.mubr.f32.vlgmr.msra.gmra.mrb[4].mxu0 %v6302_v56  ;;  %v2227_v21 = vld [vmem:[#allocation17 + $0xfb8] sm:$0xff]  ;;  %v4143_v24 = vpack.c.bf16 %v2223_v19, %v2217_v18  ;;  %v2269_v18 = vld [vmem:[#allocation17 + $0x1108] sm:$0xff] }
 0x4ad   : > { %4110 = vmatpush1.bf16.msra.mxu1 %v4109_v41  ;;  %2506 = vmatprep.mubr.f32.mxu1 %v6304_v61  ;;  %v2174_v41 = vld [vmem:[#allocation17 + $0xe10] sm:$0xff]  ;;  %v2263_v6 = vld [vmem:[#allocation17 + $0x10d8] sm:$0xff] }
 0x4ae   : > { %4494 = vmatpush1.bf16.msra.mxu0 %v4493_v37  ;;  %2932 = vmatprep.mubr.f32.mxu0 %v6304_v61  ;;  %v2172_v37 = vld [vmem:[#allocation17 + $0xe00] sm:$0xff]  ;;  %v4129_v44 = vpack.c.bf16 %v2174_v41, %v2168_v39  ;;  %v2226_v39 = vld [vmem:[#allocation17 + $0xfb0] sm:$0xff]  ;;  %v2229_v41 = vld [vmem:[#allocation17 + $0xfc8] sm:$0xff] }
 0x4af   : > { %4112 = vmatprep.subr.bf16.mxu1 %v4111_v30  ;;  %4496 = vmatprep.subr.bf16.mxu0 %v4495_v29  ;;  %v2187_v30 = vld [vmem:[#allocation17 + $0xe78] sm:$0xff]  ;;  %v2185_v29 = vld [vmem:[#allocation17 + $0xe68] sm:$0xff]  ;;  %v4513_v46 = vpack.c.bf16 %v2178_v49, %v2172_v37 }
 0x4b0   : > { %v4131_v34 = vpack.c.bf16 %v2187_v30, %v2181_v55  ;;  %v2235_v37 = vld [vmem:[#allocation17 + $0xff8] sm:$0xff] }
 0x4b1   : > { %4114 = vmatpush1.bf16.msra.mxu1 %v4113_v33  ;;  %v2186_v33 = vld [vmem:[#allocation17 + $0xe70] sm:$0xff]  ;;  %v2239_v49 = vld [vmem:[#allocation17 + $0x1018] sm:$0xff] }
 0x4b2   : > { %4498 = vmatpush1.bf16.msra.mxu0 %v4497_v50  ;;  %4116 = vmatprep.subr.bf16.mxu1 %v4115_v58  ;;  %v2184_v50 = vld [vmem:[#allocation17 + $0xe60] sm:$0xff]  ;;  %v4515_v58 = vpack.c.bf16 %v2191_v42, %v2185_v29  ;;  %v4133_v59 = vpack.c.bf16 %v2186_v33, %v2180_v48  ;;  %v4147_v29 = vpack.c.bf16 %v2235_v37, %v2229_v41  ;;  %v2238_v48 = vld [vmem:[#allocation17 + $0x1010] sm:$0xff]  ;;  %v2241_v33 = vld [vmem:[#allocation17 + $0x1028] sm:$0xff] }
 0x4b3   : > { %4500 = vmatprep.subr.bf16.mxu0 %v4499_v54  ;;  %v2197_v54 = vld [vmem:[#allocation17 + $0xec8] sm:$0xff]  ;;  %v4517_v60 = vpack.c.bf16 %v2190_v38, %v2184_v50  ;;  %v2228_v42 = vld [vmem:[#allocation17 + $0xfc0] sm:$0xff]  ;;  %v2247_v50 = vld [vmem:[#allocation17 + $0x1058] sm:$0xff] }
 0x4b4   : > { %v2251_v38 = vld [vmem:[#allocation17 + $0x1078] sm:$0xff]  ;;  %v2281_v37 = vld [vmem:[#allocation17 + $0x1168] sm:$0xff] }
 0x4b5   : > { %4118 = vmatpush1.bf16.msra.mxu1 %v4117_v1  ;;  %v2198_v1 = vld [vmem:[#allocation17 + $0xed0] sm:$0xff]  ;;  %v2275_v19 = vld [vmem:[#allocation17 + $0x1138] sm:$0xff] }
 0x4b6   : > { %4502 = vmatpush1.bf16.msra.mxu0 %v4501_v2  ;;  %4120 = vmatprep.subr.bf16.mxu1 %v4119_v3  ;;  %v2196_v2 = vld [vmem:[#allocation17 + $0xec0] sm:$0xff]  ;;  %v4519_v3 = vpack.c.bf16 %v2203_v57, %v2197_v54  ;;  %v4137_v10 = vpack.c.bf16 %v2198_v1, %v2192_v63  ;;  %v4151_v57 = vpack.c.bf16 %v2247_v50, %v2241_v33  ;;  %v2250_v1 = vld [vmem:[#allocation17 + $0x1070] sm:$0xff]  ;;  %v2283_v41 = vld [vmem:[#allocation17 + $0x1178] sm:$0xff] }
 0x4b7   : > { %4504 = vmatprep.subr.bf16.mxu0 %v4503_v8  ;;  %v2209_v8 = vld [vmem:[#allocation17 + $0xf28] sm:$0xff]  ;;  %v4521_v11 = vpack.c.bf16 %v2202_v4, %v2196_v2  ;;  %v2295_v50 = vld [vmem:[#allocation17 + $0x11d8] sm:$0xff] }
 0x4b8   : > { %v556_v53 = vld [vmem:[%s6165_s3 + $0x8] sm:$0xff] }
 0x4b9   : > { %4122 = vmatpush1.bf16.msra.mxu1 %v4121_v14  ;;  %v2210_v14 = vld [vmem:[#allocation17 + $0xf30] sm:$0xff]  ;;  %v2253_v2 = vld [vmem:[#allocation17 + $0x1088] sm:$0xff]  ;;  %v567_v7 = vrot.slane %v556_v53, 4 }
 0x4ba   : > { %4506 = vmatpush1.bf16.msra.mxu0 %v4505_v15  ;;  %4124 = vmatprep.subr.bf16.mxu1 %v4123_v16  ;;  %v2208_v15 = vld [vmem:[#allocation17 + $0xf20] sm:$0xff]  ;;  %v4523_v16 = vpack.c.bf16 %v2215_v9, %v2209_v8  ;;  %v4141_v22 = vpack.c.bf16 %v2210_v14, %v2204_v13  ;;  %v2257_v4 = vld [vmem:[#allocation17 + $0x10a8] sm:$0xff] }
 0x4bb   : > { %4508 = vmatprep.subr.bf16.mxu0 %v4507_v20  ;;  %v2221_v20 = vld [vmem:[#allocation17 + $0xf88] sm:$0xff]  ;;  %v4525_v23 = vpack.c.bf16 %v2214_v17, %v2208_v15  ;;  %v2256_v13 = vld [vmem:[#allocation17 + $0x10a0] sm:$0xff]  ;;  %v4539_v14 = vpack.c.bf16 %v2263_v6, %v2257_v4  ;;  %v2262_v15 = vld [vmem:[#allocation17 + $0x10d0] sm:$0xff] }
 0x4bc   : > { %v2271_v17 = vld [vmem:[#allocation17 + $0x1118] sm:$0xff]  ;;  %v2289_v33 = vld [vmem:[#allocation17 + $0x11a8] sm:$0xff] }
 0x4bd   : > { %4126 = vmatpush1.bf16.msra.mxu1 %v4125_v26  ;;  %v2222_v26 = vld [vmem:[#allocation17 + $0xf90] sm:$0xff]  ;;  %v1149_v4 = vld [vmem:[#allocation16 + $0x8] sm:$0xff]  ;;  %v1155_v6 = vld [vmem:[#allocation16 + $0x38] sm:$0xff] }
 0x4be   : > { %4510 = vmatpush1.bf16.msra.mxu0 %v4509_v27  ;;  %4128 = vmatprep.subr.bf16.mxu1 %v4127_v28  ;;  %v2220_v27 = vld [vmem:[#allocation17 + $0xf80] sm:$0xff]  ;;  %v4527_v28 = vpack.c.bf16 %v2227_v21, %v2221_v20  ;;  %v4145_v55 = vpack.c.bf16 %v2222_v26, %v2216_v25  ;;  %v568_v20 = vadd.f32 %v567_v7, %v556_v53  ;;  %v2270_v25 = vld [vmem:[#allocation17 + $0x1110] sm:$0xff] }
 0x4bf   : > { %4512 = vmatprep.subr.bf16.mxu0 %v4511_v43  ;;  %v2233_v43 = vld [vmem:[#allocation17 + $0xfe8] sm:$0xff]  ;;  %v4529_v30 = vpack.c.bf16 %v2226_v39, %v2220_v27  ;;  %v2268_v26 = vld [vmem:[#allocation17 + $0x1100] sm:$0xff]  ;;  %v4543_v27 = vpack.c.bf16 %v2275_v19, %v2269_v18  ;;  %v1167_v19 = vld [vmem:[#allocation16 + $0x98] sm:$0xff] }
 0x4c0   : > { %v2277_v39 = vld [vmem:[#allocation17 + $0x1148] sm:$0xff] }
 0x4c1   : > { %4130 = vmatpush1.bf16.msra.mxu1 %v4129_v44  ;;  %v2234_v44 = vld [vmem:[#allocation17 + $0xff0] sm:$0xff]  ;;  %v1161_v18 = vld [vmem:[#allocation16 + $0x68] sm:$0xff] }
 0x4c2   : > { %4514 = vmatpush1.bf16.msra.mxu0 %v4513_v46  ;;  %4132 = vmatprep.subr.bf16.mxu1 %v4131_v34  ;;  %v2232_v46 = vld [vmem:[#allocation17 + $0xfe0] sm:$0xff]  ;;  %v4531_v34 = vpack.c.bf16 %v2239_v49, %v2233_v43  ;;  %v4149_v35 = vpack.c.bf16 %v2234_v44, %v2228_v42  ;;  %v2287_v43 = vld [vmem:[#allocation17 + $0x1198] sm:$0xff]  ;;  %v569_v49 = vrot.slane %v568_v20, 2  ;;  %v2282_v44 = vld [vmem:[#allocation17 + $0x1170] sm:$0xff] }
 0x4c3   : > { %4516 = vmatprep.subr.bf16.mxu0 %v4515_v58  ;;  %v2245_v58 = vld [vmem:[#allocation17 + $0x1048] sm:$0xff]  ;;  %v4533_v54 = vpack.c.bf16 %v2238_v48, %v2232_v46  ;;  %v2276_v42 = vld [vmem:[#allocation17 + $0x1140] sm:$0xff]  ;;  %v2286_v48 = vld [vmem:[#allocation17 + $0x1190] sm:$0xff] }
 0x4c4   : > { %v4535_v63 = vpack.c.bf16 %v2251_v38, %v2245_v58  ;;  %v2280_v46 = vld [vmem:[#allocation17 + $0x1160] sm:$0xff]  ;;  %v2293_v58 = vld [vmem:[#allocation17 + $0x11c8] sm:$0xff]  ;;  %v2299_v38 = vld [vmem:[#allocation17 + $0x11f8] sm:$0xff]  ;;  %v4165_v53 = vpack.c.bf16 %v2282_v44, %v2276_v42 }
 0x4c5   : > { %4134 = vmatpush1.bf16.msra.mxu1 %v4133_v59  ;;  %v2240_v59 = vld [vmem:[#allocation17 + $0x1020] sm:$0xff]  ;;  %v1750_v42 = vld [vmem:[#allocation17 + $0xd0] sm:$0xff] }
 0x4c6   : > { %4518 = vmatpush1.bf16.msra.mxu0 %v4517_v60  ;;  %4136 = vmatprep.subr.bf16.mxu1 %v4135_v62  ;;  %v2246_v60 = vld [vmem:[#allocation17 + $0x1050] sm:$0xff]  ;;  %v2244_v62 = vld [vmem:[#allocation17 + $0x1040] sm:$0xff] }
 0x4c7   : > { %4520 = vmatprep.subr.bf16.mxu0 %v4519_v3  ;;  %v2259_v3 = vld [vmem:[#allocation17 + $0x10b8] sm:$0xff]  ;;  %v4153_v8 = vpack.c.bf16 %v2246_v60, %v2240_v59  ;;  %v4537_v9 = vpack.c.bf16 %v2250_v1, %v2244_v62  ;;  %v2288_v59 = vld [vmem:[#allocation17 + $0x11a0] sm:$0xff]  ;;  %v2294_v60 = vld [vmem:[#allocation17 + $0x11d0] sm:$0xff] }
 0x4c8   : > { %v2292_v62 = vld [vmem:[#allocation17 + $0x11c0] sm:$0xff]  ;;  %v2298_v1 = vld [vmem:[#allocation17 + $0x11f0] sm:$0xff] }
 0x4c9   : > { %4138 = vmatpush1.bf16.msra.mxu1 %v4137_v10  ;;  %v4155_v10 = vpack.c.bf16 %v2259_v3, %v2253_v2  ;;  %v1727_v2 = vld [vmem:[#allocation17 + $0x18] sm:$0xff]  ;;  %v1733_v3 = vld [vmem:[#allocation17 + $0x48] sm:$0xff]  ;;  %v1756_v44 = vld [vmem:[#allocation17 + $0x100] sm:$0xff] }
 0x4ca   : > { %4522 = vmatpush1.bf16.msra.mxu0 %v4521_v11  ;;  %4140 = vmatprep.subr.bf16.mxu1 %v4139_v12  ;;  %v2252_v11 = vld [vmem:[#allocation17 + $0x1080] sm:$0xff]  ;;  %v2258_v12 = vld [vmem:[#allocation17 + $0x10b0] sm:$0xff] }
 0x4cb   : > { %4524 = vmatprep.subr.bf16.mxu0 %v4523_v16  ;;  %v2265_v16 = vld [vmem:[#allocation17 + $0x10e8] sm:$0xff]  ;;  %v4157_v21 = vpack.c.bf16 %v2258_v12, %v2252_v11  ;;  %v1726_v11 = vld [vmem:[#allocation17 + $0x10] sm:$0xff]  ;;  %v1732_v12 = vld [vmem:[#allocation17 + $0x40] sm:$0xff] }
 0x4cd   : > { %4142 = vmatpush1.bf16.msra.mxu1 %v4141_v22  ;;  %v4541_v22 = vpack.c.bf16 %v2262_v15, %v2256_v13  ;;  %v4555_v13 = vpack.c.bf16 %v1155_v6, %v1149_v4  ;;  %v1154_v15 = vld [vmem:[#allocation16 + $0x30] sm:$0xff] }
 0x4ce   : > { %4526 = vmatpush1.bf16.msra.mxu0 %v4525_v23  ;;  %4144 = vmatprep.subr.bf16.mxu1 %v4143_v24  ;;  %v4159_v23 = vpack.c.bf16 %v2271_v17, %v2265_v16  ;;  %v2264_v24 = vld [vmem:[#allocation17 + $0x10e0] sm:$0xff]  ;;  %v1739_v16 = vld [vmem:[#allocation17 + $0x78] sm:$0xff]  ;;  %v1745_v17 = vld [vmem:[#allocation17 + $0xa8] sm:$0xff] }
 0x4cf   : > { %4528 = vmatprep.subr.bf16.mxu0 %v4527_v28  ;;  %v2274_v28 = vld [vmem:[#allocation17 + $0x1130] sm:$0xff] }
 0x4d1   : > { %4146 = vmatpush1.bf16.msra.mxu1 %v4145_v55  ;;  %v4161_v55 = vpack.c.bf16 %v2270_v25, %v2264_v24  ;;  %v1744_v24 = vld [vmem:[#allocation17 + $0xa0] sm:$0xff] }
 0x4d2   : > { %4530 = vmatpush1.bf16.msra.mxu0 %v4529_v30  ;;  %4148 = vmatprep.subr.bf16.mxu1 %v4147_v29  ;;  %v4545_v30 = vpack.c.bf16 %v2274_v28, %v2268_v26  ;;  %v4163_v29 = vpack.c.bf16 %v2283_v41, %v2277_v39  ;;  %v1160_v25 = vld [vmem:[#allocation16 + $0x60] sm:$0xff]  ;;  %v4175_v26 = vpack.c.bf16 %v1745_v17, %v1739_v16  ;;  %v1166_v28 = vld [vmem:[#allocation16 + $0x90] sm:$0xff]  ;;  %v1751_v39 = vld [vmem:[#allocation17 + $0xd8] sm:$0xff] }
 0x4d3   : > { %4532 = vmatprep.subr.bf16.mxu0 %v4531_v34  ;;  %v4547_v34 = vpack.c.bf16 %v2287_v43, %v2281_v37  ;;  %v1757_v41 = vld [vmem:[#allocation17 + $0x108] sm:$0xff]  ;;  %v1179_v43 = vld [vmem:[#allocation16 + $0xf8] sm:$0xff] }
 0x4d4   : > { %v1173_v37 = vld [vmem:[#allocation16 + $0xc8] sm:$0xff]  ;;  %v1215_v16 = vld [vmem:[#allocation16 + $0x218] sm:$0xff] }
 0x4d5   : > { %4150 = vmatpush1.bf16.msra.mxu1 %v4149_v35  ;;  %v570_v35 = vadd.f32 %v569_v49, %v568_v20 }
 0x4d6   : > { %4534 = vmatpush1.bf16.msra.mxu0 %v4533_v54  ;;  %4152 = vmatprep.subr.bf16.mxu1 %v4151_v57  ;;  %v4549_v54 = vpack.c.bf16 %v2286_v48, %v2280_v46  ;;  %v4167_v57 = vpack.c.bf16 %v2295_v50, %v2289_v33  ;;  %v1172_v46 = vld [vmem:[#allocation16 + $0xc0] sm:$0xff]  ;;  %v1178_v48 = vld [vmem:[#allocation16 + $0xf0] sm:$0xff]  ;;  %v1763_v33 = vld [vmem:[#allocation17 + $0x138] sm:$0xff] }
 0x4d7   : > { %4536 = vmatprep.subr.bf16.mxu0 %v4535_v63  ;;  %v4551_v63 = vpack.c.bf16 %v2299_v38, %v2293_v58  ;;  %v571_v7 = vrot.slane %v570_v35, 1  ;;  %v1769_v50 = vld [vmem:[#allocation17 + $0x168] sm:$0xff]  ;;  %v1191_v38 = vld [vmem:[#allocation16 + $0x158] sm:$0xff] }
 0x4d8   : > { %v1185_v58 = vld [vmem:[#allocation16 + $0x128] sm:$0xff] }
 0x4d9   : > { %4154 = vmatpush1.bf16.msra.mxu1 %v4153_v8  ;;  %v4169_v8 = vpack.c.bf16 %v2294_v60, %v2288_v59  ;;  %v572_v20 = vadd.f32 %v571_v7, %v570_v35  ;;  %v4181_v35 = vpack.c.bf16 %v1756_v44, %v1750_v42  ;;  %v1184_v59 = vld [vmem:[#allocation16 + $0x120] sm:$0xff]  ;;  %v4567_v60 = vpack.c.bf16 %v1191_v38, %v1185_v58  ;;  %v1226_v42 = vld [vmem:[#allocation16 + $0x270] sm:$0xff]  ;;  %v1811_v44 = vld [vmem:[#allocation17 + $0x2b8] sm:$0xff] }
 0x4da   : > { %4538 = vmatpush1.bf16.msra.mxu0 %v4537_v9  ;;  %4156 = vmatprep.subr.bf16.mxu1 %v4155_v10  ;;  %v4553_v9 = vpack.c.bf16 %v2298_v1, %v2292_v62  ;;  %v4171_v10 = vpack.c.bf16 %v1733_v3, %v1727_v2  ;;  %v1190_v62 = vld [vmem:[#allocation16 + $0x150] sm:$0xff]  ;;  %v1781_v1 = vld [vmem:[#allocation17 + $0x1c8] sm:$0xff]  ;;  %v1203_v3 = vld [vmem:[#allocation16 + $0x1b8] sm:$0xff] }
 0x4db   : > { %4540 = vmatprep.subr.bf16.mxu0 %v4539_v14  ;;  %v1148_v14 = vld [vmem:[#allocation16] sm:$0xff]  ;;  %v6322_v49 = vmul.f32 0.125, %v572_v20  ;;  %v1197_v2 = vld [vmem:[#allocation16 + $0x188] sm:$0xff]  ;;  %v4569_v6 = vpack.c.bf16 %v1190_v62, %v1184_v59  ;;  %v1786_v20 = vld [vmem:[#allocation17 + $0x1f0] sm:$0xff] }
 0x4dc   : > { %v1810_v38 = vld [vmem:[#allocation17 + $0x2b0] sm:$0xff]  ;;  %v1829_v59 = vld [vmem:[#allocation17 + $0x348] sm:$0xff]  ;;  %v1251_v62 = vld [vmem:[#allocation16 + $0x338] sm:$0xff] }
 0x4dd   : > { %4158 = vmatpush1.bf16.msra.mxu1 %v4157_v21  ;;  %v4173_v21 = vpack.c.bf16 %v1732_v12, %v1726_v11  ;;  %v4571_v11 = vpack.c.bf16 %v1203_v3, %v1197_v2  ;;  %v1202_v12 = vld [vmem:[#allocation16 + $0x1b0] sm:$0xff] }
 0x4de   : > { %4542 = vmatpush1.bf16.msra.mxu0 %v4541_v22  ;;  %4160 = vmatprep.subr.bf16.mxu1 %v4159_v23  ;;  %v4557_v22 = vpack.c.bf16 %v1154_v15, %v1148_v14  ;;  %v1738_v23 = vld [vmem:[#allocation17 + $0x70] sm:$0xff]  ;;  %v1793_v14 = vld [vmem:[#allocation17 + $0x228] sm:$0xff] }
 0x4df   : > { %4544 = vmatprep.subr.bf16.mxu0 %v4543_v27  ;;  %v4559_v27 = vpack.c.bf16 %v1167_v19, %v1161_v18  ;;  %v1209_v15 = vld [vmem:[#allocation16 + $0x1e8] sm:$0xff]  ;;  %v1822_v3 = vld [vmem:[#allocation17 + $0x310] sm:$0xff] }
 0x4e1   : > { %4162 = vmatpush1.bf16.msra.mxu1 %v4161_v55  ;;  %v4177_v55 = vpack.c.bf16 %v1744_v24, %v1738_v23  ;;  %v4575_v23 = vpack.c.bf16 %v1215_v16, %v1209_v15  ;;  %v1214_v24 = vld [vmem:[#allocation16 + $0x210] sm:$0xff] }
 0x4e2   : > { %4546 = vmatpush1.bf16.msra.mxu0 %v4545_v30  ;;  %4164 = vmatprep.subr.bf16.mxu1 %v4163_v29  ;;  %v4561_v30 = vpack.c.bf16 %v1166_v28, %v1160_v25  ;;  %v4179_v29 = vpack.c.bf16 %v1757_v41, %v1751_v39  ;;  %v1799_v25 = vld [vmem:[#allocation17 + $0x258] sm:$0xff]  ;;  %v1834_v16 = vld [vmem:[#allocation17 + $0x370] sm:$0xff] }
 0x4e3   : > { %4548 = vmatprep.subr.bf16.mxu0 %v4547_v34  ;;  %v4563_v34 = vpack.c.bf16 %v1179_v43, %v1173_v37  ;;  %v1227_v28 = vld [vmem:[#allocation16 + $0x278] sm:$0xff]  ;;  %v1798_v43 = vld [vmem:[#allocation17 + $0x250] sm:$0xff] }
 0x4e5   : > { %4166 = vmatpush1.bf16.msra.mxu1 %v4165_v53  ;;  %v4183_v53 = vpack.c.bf16 %v1769_v50, %v1763_v33 }
 0x4e6   : > { %4550 = vmatpush1.bf16.msra.mxu0 %v4549_v54  ;;  %4168 = vmatprep.subr.bf16.mxu1 %v4167_v57  ;;  %v1762_v54 = vld [vmem:[#allocation17 + $0x130] sm:$0xff]  ;;  %v1768_v57 = vld [vmem:[#allocation17 + $0x160] sm:$0xff] }
 0x4e7   : > { %4552 = vmatprep.subr.bf16.mxu0 %v4551_v63  ;;  %v1775_v63 = vld [vmem:[#allocation17 + $0x198] sm:$0xff]  ;;  %v4185_v4 = vpack.c.bf16 %v1768_v57, %v1762_v54  ;;  %v1238_v54 = vld [vmem:[#allocation16 + $0x2d0] sm:$0xff] }
 0x4e8   : > { %v4187_v7 = vpack.c.bf16 %v1781_v1, %v1775_v63  ;;  %v1823_v57 = vld [vmem:[#allocation17 + $0x318] sm:$0xff] }
 0x4e9   : > { %4170 = vmatpush1.bf16.msra.mxu1 %v4169_v8  ;;  %v1774_v8 = vld [vmem:[#allocation17 + $0x190] sm:$0xff]  ;;  %v4203_v2 = vpack.c.bf16 %v1829_v59, %v1823_v57  ;;  %v1877_v57 = vld [vmem:[#allocation17 + $0x4c8] sm:$0xff] }
 0x4ea   : > { %4554 = vmatpush1.bf16.msra.mxu0 %v4553_v9  ;;  %4172 = vmatprep.subr.bf16.mxu1 %v4171_v10  ;;  %v1780_v9 = vld [vmem:[#allocation17 + $0x1c0] sm:$0xff] }
 0x4eb   : > { %4556 = vmatprep.subr.bf16.mxu0 %v4555_v13  ;;  %v1196_v10 = vld [vmem:[#allocation16 + $0x180] sm:$0xff]  ;;  %v1787_v13 = vld [vmem:[#allocation17 + $0x1f8] sm:$0xff]  ;;  %v4189_v17 = vpack.c.bf16 %v1780_v9, %v1774_v8  ;;  %v1250_v8 = vld [vmem:[#allocation16 + $0x330] sm:$0xff] }
 0x4ec   : > { %2507 = vmatmul.mubr.f32.vlgmr.msra.gmra.mrb[4].mxu1 %v6312_v0  ;;  %v4573_v18 = vpack.c.bf16 %v1202_v12, %v1196_v10  ;;  %v4191_v19 = vpack.c.bf16 %v1793_v14, %v1787_v13  ;;  %v1835_v9 = vld [vmem:[#allocation17 + $0x378] sm:$0xff]  ;;  %v1841_v10 = vld [vmem:[#allocation17 + $0x3a8] sm:$0xff] }
 0x4ed   : > { %2933 = vmatmul.mubr.f32.vlgmr.msra.gmra.mrb[4].mxu0 %v6312_v0  ;;  %4174 = vmatpush1.bf16.msra.mxu1 %v4173_v21  ;;  %v1792_v21 = vld [vmem:[#allocation17 + $0x220] sm:$0xff]  ;;  %v1263_v12 = vld [vmem:[#allocation16 + $0x398] sm:$0xff]  ;;  %v4207_v15 = vpack.c.bf16 %v1841_v10, %v1835_v9  ;;  %v1298_v9 = vld [vmem:[#allocation16 + $0x4b0] sm:$0xff] }
 0x4ee   : > { %2577 = vmatprep.mubr.f32.mxu1 %v6298_v51  ;;  %4558 = vmatpush1.bf16.msra.mxu0 %v4557_v22  ;;  %v4565_v51 = vpack.c.bf16 %v1178_v48, %v1172_v46  ;;  %v1208_v22 = vld [vmem:[#allocation16 + $0x1e0] sm:$0xff]  ;;  %v4193_v39 = vpack.c.bf16 %v1792_v21, %v1786_v20  ;;  %v1817_v46 = vld [vmem:[#allocation17 + $0x2e8] sm:$0xff]  ;;  %v1239_v48 = vld [vmem:[#allocation16 + $0x2d8] sm:$0xff] }
 0x4ef   : > { %4176 = vmatprep.subr.bf16.mxu1 %v4175_v26  ;;  %4560 = vmatprep.subr.bf16.mxu0 %v4559_v27  ;;  %v1805_v26 = vld [vmem:[#allocation17 + $0x288] sm:$0xff]  ;;  %v4577_v41 = vpack.c.bf16 %v1214_v24, %v1208_v22  ;;  %v4199_v58 = vpack.c.bf16 %v1817_v46, %v1811_v44  ;;  %v1262_v20 = vld [vmem:[#allocation16 + $0x390] sm:$0xff]  ;;  %v1847_v21 = vld [vmem:[#allocation17 + $0x3d8] sm:$0xff] }
 0x4f0   : > { %3003 = vmatprep.mubr.f32.mxu0 %v6322_v49  ;;  %v1221_v27 = vld [vmem:[#allocation16 + $0x248] sm:$0xff]  ;;  %v4195_v37 = vpack.c.bf16 %v1805_v26, %v1799_v25  ;;  %v1275_v24 = vld [vmem:[#allocation16 + $0x3f8] sm:$0xff]  ;;  %v1846_v26 = vld [vmem:[#allocation17 + $0x3d0] sm:$0xff] }
 0x4f1   : > { %4178 = vmatpush1.bf16.msra.mxu1 %v4177_v55  ;;  %v1804_v55 = vld [vmem:[#allocation17 + $0x280] sm:$0xff]  ;;  %v1853_v22 = vld [vmem:[#allocation17 + $0x408] sm:$0xff]  ;;  %v1287_v44 = vld [vmem:[#allocation16 + $0x458] sm:$0xff] }
 0x4f2   : > { %4562 = vmatpush1.bf16.msra.mxu0 %v4561_v30  ;;  %4180 = vmatprep.subr.bf16.mxu1 %v4179_v29  ;;  %v1220_v30 = vld [vmem:[#allocation16 + $0x240] sm:$0xff]  ;;  %v4579_v29 = vpack.c.bf16 %v1227_v28, %v1221_v27  ;;  %v4197_v33 = vpack.c.bf16 %v1804_v55, %v1798_v43  ;;  %v4211_v28 = vpack.c.bf16 %v1853_v22, %v1847_v21  ;;  %v1859_v55 = vld [vmem:[#allocation17 + $0x438] sm:$0xff] }
 0x4f3   : > { %4564 = vmatprep.subr.bf16.mxu0 %v4563_v34  ;;  %v1233_v34 = vld [vmem:[#allocation16 + $0x2a8] sm:$0xff]  ;;  %v4581_v50 = vpack.c.bf16 %v1226_v42, %v1220_v30  ;;  %v1883_v10 = vld [vmem:[#allocation17 + $0x4f8] sm:$0xff] }
 0x4f4   : > { %v1865_v30 = vld [vmem:[#allocation17 + $0x468] sm:$0xff] }
 0x4f5   : > { %4182 = vmatpush1.bf16.msra.mxu1 %v4181_v35  ;;  %v1816_v35 = vld [vmem:[#allocation17 + $0x2e0] sm:$0xff]  ;;  %v1281_v42 = vld [vmem:[#allocation16 + $0x428] sm:$0xff] }
 0x4f6   : > { %4566 = vmatpush1.bf16.msra.mxu0 %v4565_v51  ;;  %4184 = vmatprep.subr.bf16.mxu1 %v4183_v53  ;;  %v1232_v51 = vld [vmem:[#allocation16 + $0x2a0] sm:$0xff]  ;;  %v4583_v53 = vpack.c.bf16 %v1239_v48, %v1233_v34  ;;  %v4201_v63 = vpack.c.bf16 %v1816_v35, %v1810_v38 }
 0x4f7   : > { %4568 = vmatprep.subr.bf16.mxu0 %v4567_v60  ;;  %v1245_v60 = vld [vmem:[#allocation16 + $0x308] sm:$0xff]  ;;  %v4585_v1 = vpack.c.bf16 %v1238_v54, %v1232_v51  ;;  %v1280_v38 = vld [vmem:[#allocation16 + $0x420] sm:$0xff]  ;;  %v4599_v51 = vpack.c.bf16 %v1287_v44, %v1281_v42  ;;  %v1871_v54 = vld [vmem:[#allocation17 + $0x498] sm:$0xff] }
 0x4f8   : > { %v558_v46 = vld [vmem:[%s6165_s3 + $0x18] sm:$0xff] }
 0x4f9   : > { %4186 = vmatpush1.bf16.msra.mxu1 %v4185_v4  ;;  %v1828_v4 = vld [vmem:[#allocation17 + $0x340] sm:$0xff]  ;;  %v579_v59 = vrot.slane %v558_v46, 4  ;;  %v1322_v44 = vld [vmem:[#allocation16 + $0x570] sm:$0xff] }
 0x4fa   : > { %4570 = vmatpush1.bf16.msra.mxu0 %v4569_v6  ;;  %4188 = vmatprep.subr.bf16.mxu1 %v4187_v7  ;;  %v1244_v6 = vld [vmem:[#allocation16 + $0x300] sm:$0xff]  ;;  %v4587_v7 = vpack.c.bf16 %v1251_v62, %v1245_v60  ;;  %v4205_v13 = vpack.c.bf16 %v1828_v4, %v1822_v3  ;;  %v1293_v60 = vld [vmem:[#allocation16 + $0x488] sm:$0xff]  ;;  %v1299_v62 = vld [vmem:[#allocation16 + $0x4b8] sm:$0xff] }
 0x4fb   : > { %4572 = vmatprep.subr.bf16.mxu0 %v4571_v11  ;;  %v1257_v11 = vld [vmem:[#allocation16 + $0x368] sm:$0xff]  ;;  %v4589_v14 = vpack.c.bf16 %v1250_v8, %v1244_v6  ;;  %v1870_v3 = vld [vmem:[#allocation17 + $0x490] sm:$0xff]  ;;  %v1876_v4 = vld [vmem:[#allocation17 + $0x4c0] sm:$0xff]  ;;  %v4603_v8 = vpack.c.bf16 %v1299_v62, %v1293_v60 }
 0x4fc   : > { %v1292_v6 = vld [vmem:[#allocation16 + $0x480] sm:$0xff]  ;;  %v1334_v60 = vld [vmem:[#allocation16 + $0x5d0] sm:$0xff]  ;;  %v1919_v62 = vld [vmem:[#allocation17 + $0x618] sm:$0xff] }
 0x4fd   : > { %4190 = vmatpush1.bf16.msra.mxu1 %v4189_v17  ;;  %v1840_v17 = vld [vmem:[#allocation17 + $0x3a0] sm:$0xff] }
 0x4fe   : > { %4574 = vmatpush1.bf16.msra.mxu0 %v4573_v18  ;;  %4192 = vmatprep.subr.bf16.mxu1 %v4191_v19  ;;  %v1256_v18 = vld [vmem:[#allocation16 + $0x360] sm:$0xff]  ;;  %v4591_v19 = vpack.c.bf16 %v1263_v12, %v1257_v11  ;;  %v4209_v25 = vpack.c.bf16 %v1840_v17, %v1834_v16  ;;  %v1889_v11 = vld [vmem:[#allocation17 + $0x528] sm:$0xff]  ;;  %v580_v12 = vadd.f32 %v579_v59, %v558_v46  ;;  %v1907_v46 = vld [vmem:[#allocation17 + $0x5b8] sm:$0xff] }
 0x4ff   : > { %4576 = vmatprep.subr.bf16.mxu0 %v4575_v23  ;;  %v1269_v23 = vld [vmem:[#allocation16 + $0x3c8] sm:$0xff]  ;;  %v4593_v27 = vpack.c.bf16 %v1262_v20, %v1256_v18  ;;  %v4605_v16 = vpack.c.bf16 %v1298_v9, %v1292_v6  ;;  %v4223_v17 = vpack.c.bf16 %v1889_v11, %v1883_v10  ;;  %v1882_v18 = vld [vmem:[#allocation17 + $0x4f0] sm:$0xff]  ;;  %v1304_v20 = vld [vmem:[#allocation16 + $0x4e0] sm:$0xff] }
 0x500   : > { %v4595_v43 = vpack.c.bf16 %v1275_v24, %v1269_v23  ;;  %v1310_v23 = vld [vmem:[#allocation16 + $0x510] sm:$0xff]  ;;  %v1895_v24 = vld [vmem:[#allocation17 + $0x558] sm:$0xff]  ;;  %v1924_v9 = vld [vmem:[#allocation17 + $0x640] sm:$0xff] }
 0x501   : > { %4194 = vmatpush1.bf16.msra.mxu1 %v4193_v39  ;;  %v1852_v39 = vld [vmem:[#allocation17 + $0x400] sm:$0xff] }
 0x502   : > { %4578 = vmatpush1.bf16.msra.mxu0 %v4577_v41  ;;  %4196 = vmatprep.subr.bf16.mxu1 %v4195_v37  ;;  %v1268_v41 = vld [vmem:[#allocation16 + $0x3c0] sm:$0xff]  ;;  %v1274_v37 = vld [vmem:[#allocation16 + $0x3f0] sm:$0xff]  ;;  %v4213_v34 = vpack.c.bf16 %v1852_v39, %v1846_v26  ;;  %v581_v26 = vrot.slane %v580_v12, 2 }
 0x503   : > { %4580 = vmatprep.subr.bf16.mxu0 %v4579_v29  ;;  %v555_v29 = vld [vmem:[%s6165_s3] sm:$0xff]  ;;  %v4597_v48 = vpack.c.bf16 %v1274_v37, %v1268_v41  ;;  %v4609_v41 = vpack.c.bf16 %v1310_v23, %v1304_v20 }
 0x504   : > { %v561_v35 = vrot.slane %v555_v29, 4  ;;  %v1936_v23 = vld [vmem:[#allocation17 + $0x6a0] sm:$0xff] }
 0x505   : > { %4198 = vmatpush1.bf16.msra.mxu1 %v4197_v33  ;;  %v4215_v33 = vpack.c.bf16 %v1865_v30, %v1859_v55  ;;  %v1900_v55 = vld [vmem:[#allocation17 + $0x580] sm:$0xff] }
 0x506   : > { %4582 = vmatpush1.bf16.msra.mxu0 %v4581_v50  ;;  %4200 = vmatprep.subr.bf16.mxu1 %v4199_v58  ;;  %v1858_v50 = vld [vmem:[#allocation17 + $0x430] sm:$0xff]  ;;  %v1864_v58 = vld [vmem:[#allocation17 + $0x460] sm:$0xff] }
 0x507   : > { %4584 = vmatprep.subr.bf16.mxu0 %v4583_v53  ;;  %v1286_v53 = vld [vmem:[#allocation16 + $0x450] sm:$0xff]  ;;  %v1316_v30 = vld [vmem:[#allocation16 + $0x540] sm:$0xff] }
 0x509   : > { %4202 = vmatpush1.bf16.msra.mxu1 %v4201_v63  ;;  %v4217_v63 = vpack.c.bf16 %v1864_v58, %v1858_v50  ;;  %v1335_v50 = vld [vmem:[#allocation16 + $0x5d8] sm:$0xff] }
 0x50a   : > { %4586 = vmatpush1.bf16.msra.mxu0 %v4585_v1  ;;  %4204 = vmatprep.subr.bf16.mxu1 %v4203_v2  ;;  %v4601_v1 = vpack.c.bf16 %v1286_v53, %v1280_v38  ;;  %v4219_v2 = vpack.c.bf16 %v1877_v57, %v1871_v54  ;;  %v4613_v38 = vpack.c.bf16 %v1322_v44, %v1316_v30  ;;  %v1912_v53 = vld [vmem:[#allocation17 + $0x5e0] sm:$0xff] }
 0x50b   : > { %4588 = vmatprep.subr.bf16.mxu0 %v4587_v7  ;;  %v562_v7 = vadd.f32 %v561_v35, %v555_v29  ;;  %v1328_v54 = vld [vmem:[#allocation16 + $0x5a0] sm:$0xff] }
 0x50c   : > { %v4617_v6 = vpack.c.bf16 %v1334_v60, %v1328_v54  ;;  %v1967_v54 = vld [vmem:[#allocation17 + $0x798] sm:$0xff]  ;;  %v1376_v60 = vld [vmem:[#allocation16 + $0x720] sm:$0xff] }
 0x50d   : > { %4206 = vmatpush1.bf16.msra.mxu1 %v4205_v13  ;;  %v1305_v13 = vld [vmem:[#allocation16 + $0x4e8] sm:$0xff]  ;;  %v563_v21 = vrot.slane %v562_v7, 2 }
 0x50e   : > { %4590 = vmatpush1.bf16.msra.mxu0 %v4589_v14  ;;  %4208 = vmatprep.subr.bf16.mxu1 %v4207_v15  ;;  %v1311_v14 = vld [vmem:[#allocation16 + $0x518] sm:$0xff]  ;;  %v4221_v15 = vpack.c.bf16 %v1876_v4, %v1870_v3 }
 0x50f   : > { %4592 = vmatprep.subr.bf16.mxu0 %v4591_v19  ;;  %v1888_v19 = vld [vmem:[#allocation17 + $0x520] sm:$0xff]  ;;  %v4607_v22 = vpack.c.bf16 %v1311_v14, %v1305_v13  ;;  %v564_v29 = vadd.f32 %v563_v21, %v562_v7  ;;  %v1347_v3 = vld [vmem:[#allocation16 + $0x638] sm:$0xff]  ;;  %v1937_v13 = vld [vmem:[#allocation17 + $0x6a8] sm:$0xff] }
 0x510   : > { %v4225_v39 = vpack.c.bf16 %v1888_v19, %v1882_v18  ;;  %v1353_v18 = vld [vmem:[#allocation16 + $0x668] sm:$0xff]  ;;  %v1359_v19 = vld [vmem:[#allocation16 + $0x698] sm:$0xff] }
 0x511   : > { %4210 = vmatpush1.bf16.msra.mxu1 %v4209_v25  ;;  %v1901_v25 = vld [vmem:[#allocation17 + $0x588] sm:$0xff]  ;;  %v565_v57 = vrot.slane %v564_v29, 1 }
 0x512   : > { %4594 = vmatpush1.bf16.msra.mxu0 %v4593_v27  ;;  %4212 = vmatprep.subr.bf16.mxu1 %v4211_v28  ;;  %v1317_v27 = vld [vmem:[#allocation16 + $0x548] sm:$0xff]  ;;  %v1323_v28 = vld [vmem:[#allocation16 + $0x578] sm:$0xff]  ;;  %v4227_v37 = vpack.c.bf16 %v1901_v25, %v1895_v24 }
 0x513   : > { %4596 = vmatprep.subr.bf16.mxu0 %v4595_v43  ;;  %v1894_v43 = vld [vmem:[#allocation17 + $0x550] sm:$0xff]  ;;  %v4611_v42 = vpack.c.bf16 %v1323_v28, %v1317_v27  ;;  %v566_v10 = vadd.f32 %v565_v57, %v564_v29  ;;  %v1943_v25 = vld [vmem:[#allocation17 + $0x6d8] sm:$0xff]  ;;  %v4623_v28 = vpack.c.bf16 %v1359_v19, %v1353_v18  ;;  %v1973_v57 = vld [vmem:[#allocation17 + $0x7c8] sm:$0xff] }
 0x514   : > { %v4229_v58 = vpack.c.bf16 %v1900_v55, %v1894_v43  ;;  %v1365_v43 = vld [vmem:[#allocation16 + $0x6c8] sm:$0xff]  ;;  %v1371_v55 = vld [vmem:[#allocation16 + $0x6f8] sm:$0xff]  ;;  %v1942_v29 = vld [vmem:[#allocation17 + $0x6d0] sm:$0xff] }
 0x515   : > { %4214 = vmatpush1.bf16.msra.mxu1 %v4213_v34  ;;  %v1913_v34 = vld [vmem:[#allocation17 + $0x5e8] sm:$0xff]  ;;  %v6329_v20 = vmul.f32 0.125, %v566_v10  ;;  %v1984_v18 = vld [vmem:[#allocation17 + $0x820] sm:$0xff] }
 0x516   : > { %4598 = vmatpush1.bf16.msra.mxu0 %v4597_v48  ;;  %4216 = vmatprep.subr.bf16.mxu1 %v4215_v33  ;;  %v582_v48 = vadd.f32 %v581_v26, %v580_v12  ;;  %v1329_v33 = vld [vmem:[#allocation16 + $0x5a8] sm:$0xff]  ;;  %v4231_v35 = vpack.c.bf16 %v1913_v34, %v1907_v46  ;;  %v1931_v12 = vld [vmem:[#allocation17 + $0x678] sm:$0xff] }
 0x517   : > { %4600 = vmatprep.subr.bf16.mxu0 %v4599_v51  ;;  %v1906_v51 = vld [vmem:[#allocation17 + $0x5b0] sm:$0xff]  ;;  %v4615_v59 = vpack.c.bf16 %v1335_v50, %v1329_v33  ;;  %v4239_v21 = vpack.c.bf16 %v1937_v13, %v1931_v12  ;;  %v1949_v26 = vld [vmem:[#allocation17 + $0x708] sm:$0xff]  ;;  %v1955_v46 = vld [vmem:[#allocation17 + $0x738] sm:$0xff] }
 0x518   : > { %v4233_v4 = vpack.c.bf16 %v1912_v53, %v1906_v51  ;;  %v4243_v30 = vpack.c.bf16 %v1949_v26, %v1943_v25  ;;  %v1961_v34 = vld [vmem:[#allocation17 + $0x768] sm:$0xff]  ;;  %v1370_v33 = vld [vmem:[#allocation16 + $0x6f0] sm:$0xff]  ;;  %v1960_v51 = vld [vmem:[#allocation17 + $0x760] sm:$0xff] }
 0x519   : > { %4218 = vmatpush1.bf16.msra.mxu1 %v4217_v63  ;;  %v1925_v63 = vld [vmem:[#allocation17 + $0x648] sm:$0xff]  ;;  %v1394_v12 = vld [vmem:[#allocation16 + $0x7b0] sm:$0xff] }
 0x51a   : > { %4602 = vmatpush1.bf16.msra.mxu0 %v4601_v1  ;;  %4220 = vmatprep.subr.bf16.mxu1 %v4219_v2  ;;  %v583_v1 = vrot.slane %v582_v48, 1  ;;  %v1341_v2 = vld [vmem:[#allocation16 + $0x608] sm:$0xff]  ;;  %v4235_v7 = vpack.c.bf16 %v1925_v63, %v1919_v62  ;;  %v1382_v62 = vld [vmem:[#allocation16 + $0x750] sm:$0xff] }
 0x51b   : > { %4604 = vmatprep.subr.bf16.mxu0 %v4603_v8  ;;  %v1918_v8 = vld [vmem:[#allocation17 + $0x610] sm:$0xff]  ;;  %v4619_v11 = vpack.c.bf16 %v1347_v3, %v1341_v2  ;;  %v1377_v50 = vld [vmem:[#allocation16 + $0x728] sm:$0xff]  ;;  %v1395_v2 = vld [vmem:[#allocation16 + $0x7b8] sm:$0xff]  ;;  %v4251_v3 = vpack.c.bf16 %v1973_v57, %v1967_v54 }
 0x51c   : > { %v584_v14 = vadd.f32 %v583_v1, %v582_v48  ;;  %v1364_v48 = vld [vmem:[#allocation16 + $0x6c0] sm:$0xff]  ;;  %v1389_v1 = vld [vmem:[#allocation16 + $0x788] sm:$0xff]  ;;  %v1406_v25 = vld [vmem:[#allocation16 + $0x810] sm:$0xff] }
 0x51d   : > { %4222 = vmatpush1.bf16.msra.mxu1 %v4221_v15  ;;  %v1340_v15 = vld [vmem:[#allocation16 + $0x600] sm:$0xff]  ;;  %v4629_v53 = vpack.c.bf16 %v1370_v33, %v1364_v48  ;;  %v4635_v10 = vpack.c.bf16 %v1395_v2, %v1389_v1  ;;  %v1431_v48 = vld [vmem:[#allocation16 + $0x8d8] sm:$0xff]  ;;  %v1430_v54 = vld [vmem:[#allocation16 + $0x8d0] sm:$0xff] }
 0x51e   : > { %4606 = vmatpush1.bf16.msra.mxu0 %v4605_v16  ;;  %4224 = vmatprep.subr.bf16.mxu1 %v4223_v17  ;;  %v1346_v16 = vld [vmem:[#allocation16 + $0x630] sm:$0xff]  ;;  %v4237_v17 = vpack.c.bf16 %v1924_v9, %v1918_v8  ;;  %v6331_v27 = vmul.f32 0.125, %v584_v14  ;;  %v1979_v8 = vld [vmem:[#allocation17 + $0x7f8] sm:$0xff]  ;;  %v1985_v9 = vld [vmem:[#allocation17 + $0x828] sm:$0xff] }
 0x51f   : > { %4608 = vmatprep.subr.bf16.mxu0 %v4607_v22  ;;  %v1930_v22 = vld [vmem:[#allocation17 + $0x670] sm:$0xff]  ;;  %v4621_v24 = vpack.c.bf16 %v1346_v16, %v1340_v15  ;;  %v1401_v14 = vld [vmem:[#allocation16 + $0x7e8] sm:$0xff]  ;;  %v1407_v15 = vld [vmem:[#allocation16 + $0x818] sm:$0xff]  ;;  %v4255_v16 = vpack.c.bf16 %v1985_v9, %v1979_v8 }
 0x520   : > { %v2020_v1 = vld [vmem:[#allocation17 + $0x940] sm:$0xff]  ;;  %v1442_v8 = vld [vmem:[#allocation16 + $0x930] sm:$0xff] }
 0x521   : > { %4226 = vmatpush1.bf16.msra.mxu1 %v4225_v39  ;;  %v1352_v39 = vld [vmem:[#allocation16 + $0x660] sm:$0xff] }
 0x522   : > { %4610 = vmatpush1.bf16.msra.mxu0 %v4609_v41  ;;  %4228 = vmatprep.subr.bf16.mxu1 %v4227_v37  ;;  %v1358_v41 = vld [vmem:[#allocation16 + $0x690] sm:$0xff]  ;;  %v4241_v37 = vpack.c.bf16 %v1936_v23, %v1930_v22  ;;  %v1997_v22 = vld [vmem:[#allocation17 + $0x888] sm:$0xff]  ;;  %v4639_v23 = vpack.c.bf16 %v1407_v15, %v1401_v14  ;;  %v2032_v14 = vld [vmem:[#allocation17 + $0x9a0] sm:$0xff] }
 0x523   : > { %4612 = vmatprep.subr.bf16.mxu0 %v4611_v42  ;;  %v1948_v42 = vld [vmem:[#allocation17 + $0x700] sm:$0xff]  ;;  %v4625_v44 = vpack.c.bf16 %v1358_v41, %v1352_v39  ;;  %v1419_v39 = vld [vmem:[#allocation16 + $0x878] sm:$0xff] }
 0x525   : > { %4230 = vmatpush1.bf16.msra.mxu1 %v4229_v58  ;;  %v1383_v58 = vld [vmem:[#allocation16 + $0x758] sm:$0xff] }
 0x526   : > { %4614 = vmatpush1.bf16.msra.mxu0 %v4613_v38  ;;  %4232 = vmatprep.subr.bf16.mxu1 %v4231_v35  ;;  %v4247_v38 = vpack.c.bf16 %v1961_v34, %v1955_v46  ;;  %v1954_v35 = vld [vmem:[#allocation17 + $0x730] sm:$0xff] }
 0x527   : > { %4616 = vmatprep.subr.bf16.mxu0 %v4615_v59  ;;  %v4631_v59 = vpack.c.bf16 %v1383_v58, %v1377_v50  ;;  %v4249_v63 = vpack.c.bf16 %v1960_v51, %v1954_v35  ;;  %v1418_v46 = vld [vmem:[#allocation16 + $0x870] sm:$0xff]  ;;  %v2008_v50 = vld [vmem:[#allocation17 + $0x8e0] sm:$0xff]  ;;  %v2021_v35 = vld [vmem:[#allocation17 + $0x948] sm:$0xff] }
 0x529   : > { %4234 = vmatpush1.bf16.msra.mxu1 %v4233_v4  ;;  %v1966_v4 = vld [vmem:[#allocation17 + $0x790] sm:$0xff] }
 0x52a   : > { %4618 = vmatpush1.bf16.msra.mxu0 %v4617_v6  ;;  %4236 = vmatprep.subr.bf16.mxu1 %v4235_v7  ;;  %v1972_v6 = vld [vmem:[#allocation17 + $0x7c0] sm:$0xff]  ;;  %v4633_v7 = vpack.c.bf16 %v1382_v62, %v1376_v60  ;;  %v1443_v60 = vld [vmem:[#allocation16 + $0x938] sm:$0xff] }
 0x52b   : > { %4620 = vmatprep.subr.bf16.mxu0 %v4619_v11  ;;  %v1388_v11 = vld [vmem:[#allocation16 + $0x780] sm:$0xff]  ;;  %v4253_v13 = vpack.c.bf16 %v1972_v6, %v1966_v4  ;;  %v2033_v4 = vld [vmem:[#allocation17 + $0x9a8] sm:$0xff] }
 0x52c   : > { %2578 = vmatmul.mubr.f32.vlgmr.msra.gmra.mrb[6].mxu1 %v6300_v52  ;;  %v4627_v52 = vpack.c.bf16 %v1371_v55, %v1365_v43  ;;  %v4637_v19 = vpack.c.bf16 %v1394_v12, %v1388_v11  ;;  %v1996_v43 = vld [vmem:[#allocation17 + $0x880] sm:$0xff]  ;;  %v1455_v11 = vld [vmem:[#allocation16 + $0x998] sm:$0xff] }
 0x52d   : > { %4238 = vmatpush1.bf16.msra.mxu1 %v4237_v17  ;;  %2648 = vmatprep.mubr.f32.mxu1 %v6310_v5  ;;  %v4245_v5 = vpack.c.bf16 %v1948_v42, %v1942_v29  ;;  %v1978_v17 = vld [vmem:[#allocation17 + $0x7f0] sm:$0xff]  ;;  %v2009_v29 = vld [vmem:[#allocation17 + $0x8e8] sm:$0xff] }
 0x52e   : > { %3004 = vmatmul.mubr.f32.vlgmr.msra.gmra.mrb[6].mxu0 %v6329_v20  ;;  %4240 = vmatprep.subr.bf16.mxu1 %v4239_v21  ;;  %v1991_v21 = vld [vmem:[#allocation17 + $0x858] sm:$0xff]  ;;  %v4257_v26 = vpack.c.bf16 %v1984_v18, %v1978_v17  ;;  %v2045_v17 = vld [vmem:[#allocation17 + $0xa08] sm:$0xff] }
 0x52f   : > { %4622 = vmatpush1.bf16.msra.mxu0 %v4621_v24  ;;  %3074 = vmatprep.mubr.f32.mxu0 %v6331_v27  ;;  %v1400_v24 = vld [vmem:[#allocation16 + $0x7e0] sm:$0xff]  ;;  %v4259_v41 = vpack.c.bf16 %v1997_v22, %v1991_v21  ;;  %v1454_v21 = vld [vmem:[#allocation16 + $0x990] sm:$0xff] }
 0x530   : > { %4624 = vmatprep.subr.bf16.mxu0 %v4623_v28  ;;  %v1413_v28 = vld [vmem:[#allocation16 + $0x848] sm:$0xff]  ;;  %v4641_v55 = vpack.c.bf16 %v1406_v25, %v1400_v24  ;;  %v1467_v24 = vld [vmem:[#allocation16 + $0x9f8] sm:$0xff] }
 0x531   : > { %4242 = vmatpush1.bf16.msra.mxu1 %v4241_v37  ;;  %v1990_v37 = vld [vmem:[#allocation17 + $0x850] sm:$0xff]  ;;  %v4643_v42 = vpack.c.bf16 %v1419_v39, %v1413_v28  ;;  %v2044_v28 = vld [vmem:[#allocation17 + $0xa00] sm:$0xff] }
 0x532   : > { %4244 = vmatprep.subr.bf16.mxu1 %v4243_v30  ;;  %v2003_v30 = vld [vmem:[#allocation17 + $0x8b8] sm:$0xff]  ;;  %v4261_v34 = vpack.c.bf16 %v1996_v43, %v1990_v37  ;;  %v2057_v37 = vld [vmem:[#allocation17 + $0xa68] sm:$0xff] }
 0x533   : > { %4626 = vmatpush1.bf16.msra.mxu0 %v4625_v44  ;;  %v1412_v44 = vld [vmem:[#allocation16 + $0x840] sm:$0xff]  ;;  %v4263_v33 = vpack.c.bf16 %v2009_v29, %v2003_v30  ;;  %v1466_v29 = vld [vmem:[#allocation16 + $0x9f0] sm:$0xff] }
 0x534   : > { %4628 = vmatprep.subr.bf16.mxu0 %v4627_v52  ;;  %v1425_v52 = vld [vmem:[#allocation16 + $0x8a8] sm:$0xff]  ;;  %v4645_v58 = vpack.c.bf16 %v1418_v46, %v1412_v44  ;;  %v1460_v30 = vld [vmem:[#allocation16 + $0x9c0] sm:$0xff] }
 0x535   : > { %4246 = vmatpush1.bf16.msra.mxu1 %v4245_v5  ;;  %v2002_v5 = vld [vmem:[#allocation17 + $0x8b0] sm:$0xff]  ;;  %v4647_v51 = vpack.c.bf16 %v1431_v48, %v1425_v52  ;;  %v1473_v46 = vld [vmem:[#allocation16 + $0xa28] sm:$0xff] }
 0x536   : > { %4248 = vmatprep.subr.bf16.mxu1 %v4247_v38  ;;  %v2015_v38 = vld [vmem:[#allocation17 + $0x918] sm:$0xff]  ;;  %v4265_v57 = vpack.c.bf16 %v2008_v50, %v2002_v5  ;;  %v2050_v48 = vld [vmem:[#allocation17 + $0xa30] sm:$0xff]  ;;  %v4661_v50 = vpack.c.bf16 %v1466_v29, %v1460_v30 }
 0x537   : > { %4630 = vmatpush1.bf16.msra.mxu0 %v4629_v53  ;;  %v1424_v53 = vld [vmem:[#allocation16 + $0x8a0] sm:$0xff]  ;;  %v4267_v62 = vpack.c.bf16 %v2021_v35, %v2015_v38  ;;  %v2069_v38 = vld [vmem:[#allocation17 + $0xac8] sm:$0xff]  ;;  %v2099_v29 = vld [vmem:[#allocation17 + $0xbb8] sm:$0xff] }
 0x538   : > { %4632 = vmatprep.subr.bf16.mxu0 %v4631_v59  ;;  %v1437_v59 = vld [vmem:[#allocation16 + $0x908] sm:$0xff]  ;;  %v4649_v2 = vpack.c.bf16 %v1430_v54, %v1424_v53  ;;  %v1472_v53 = vld [vmem:[#allocation16 + $0xa20] sm:$0xff]  ;;  %v1478_v54 = vld [vmem:[#allocation16 + $0xa50] sm:$0xff] }
 0x539   : > { %4250 = vmatpush1.bf16.msra.mxu1 %v4249_v63  ;;  %v2014_v63 = vld [vmem:[#allocation17 + $0x910] sm:$0xff]  ;;  %v4651_v6 = vpack.c.bf16 %v1443_v60, %v1437_v59  ;;  %v1485_v59 = vld [vmem:[#allocation16 + $0xa88] sm:$0xff]  ;;  %v1491_v60 = vld [vmem:[#allocation16 + $0xab8] sm:$0xff] }
 0x53a   : > { %4252 = vmatprep.subr.bf16.mxu1 %v4251_v3  ;;  %v2027_v3 = vld [vmem:[#allocation17 + $0x978] sm:$0xff]  ;;  %v4269_v9 = vpack.c.bf16 %v2020_v1, %v2014_v63  ;;  %v2062_v63 = vld [vmem:[#allocation17 + $0xa90] sm:$0xff]  ;;  %v2068_v1 = vld [vmem:[#allocation17 + $0xac0] sm:$0xff] }
 0x53b   : > { %4634 = vmatpush1.bf16.msra.mxu0 %v4633_v7  ;;  %v1436_v7 = vld [vmem:[#allocation16 + $0x900] sm:$0xff]  ;;  %v4271_v12 = vpack.c.bf16 %v2033_v4, %v2027_v3  ;;  %v4665_v3 = vpack.c.bf16 %v1478_v54, %v1472_v53  ;;  %v2075_v4 = vld [vmem:[#allocation17 + $0xaf8] sm:$0xff]  ;;  %v2117_v54 = vld [vmem:[#allocation17 + $0xc48] sm:$0xff] }
 0x53c   : > { %4636 = vmatprep.subr.bf16.mxu0 %v4635_v10  ;;  %v1449_v10 = vld [vmem:[#allocation16 + $0x968] sm:$0xff]  ;;  %v4653_v15 = vpack.c.bf16 %v1442_v8, %v1436_v7  ;;  %v4667_v8 = vpack.c.bf16 %v1491_v60, %v1485_v59  ;;  %v2111_v53 = vld [vmem:[#allocation17 + $0xc18] sm:$0xff]  ;;  %v1520_v60 = vld [vmem:[#allocation16 + $0xba0] sm:$0xff] }
 0x53d   : > { %4254 = vmatpush1.bf16.msra.mxu1 %v4253_v13  ;;  %v2026_v13 = vld [vmem:[#allocation17 + $0x970] sm:$0xff]  ;;  %v4655_v18 = vpack.c.bf16 %v1455_v11, %v1449_v10  ;;  %v4285_v11 = vpack.c.bf16 %v2068_v1, %v2062_v63  ;;  %v1533_v1 = vld [vmem:[#allocation16 + $0xc08] sm:$0xff] }
 0x53e   : > { %4256 = vmatprep.subr.bf16.mxu1 %v4255_v16  ;;  %v2039_v16 = vld [vmem:[#allocation17 + $0x9d8] sm:$0xff]  ;;  %v4273_v22 = vpack.c.bf16 %v2032_v14, %v2026_v13  ;;  %v1490_v10 = vld [vmem:[#allocation16 + $0xab0] sm:$0xff] }
 0x53f   : > { %4638 = vmatpush1.bf16.msra.mxu0 %v4637_v19  ;;  %v1448_v19 = vld [vmem:[#allocation16 + $0x960] sm:$0xff]  ;;  %v4275_v25 = vpack.c.bf16 %v2045_v17, %v2039_v16  ;;  %v1503_v13 = vld [vmem:[#allocation16 + $0xb18] sm:$0xff] }
 0x540   : > { %4640 = vmatprep.subr.bf16.mxu0 %v4639_v23  ;;  %v1461_v23 = vld [vmem:[#allocation16 + $0x9c8] sm:$0xff]  ;;  %v4657_v39 = vpack.c.bf16 %v1454_v21, %v1448_v19  ;;  %v2080_v16 = vld [vmem:[#allocation17 + $0xb20] sm:$0xff]  ;;  %v2087_v19 = vld [vmem:[#allocation17 + $0xb58] sm:$0xff] }
 0x541   : > { %4258 = vmatpush1.bf16.msra.mxu1 %v4257_v26  ;;  %v2038_v26 = vld [vmem:[#allocation17 + $0x9d0] sm:$0xff]  ;;  %v2093_v21 = vld [vmem:[#allocation17 + $0xb88] sm:$0xff] }
 0x542   : > { %4260 = vmatprep.subr.bf16.mxu1 %v4259_v41  ;;  %v2051_v41 = vld [vmem:[#allocation17 + $0xa38] sm:$0xff]  ;;  %v4277_v44 = vpack.c.bf16 %v2044_v28, %v2038_v26  ;;  %v1509_v28 = vld [vmem:[#allocation16 + $0xb48] sm:$0xff] }
 0x543   : > { %4642 = vmatpush1.bf16.msra.mxu0 %v4641_v55  ;;  %v557_v43 = vld [vmem:[%s6165_s3 + $0x10] sm:$0xff]  ;;  %v4659_v55 = vpack.c.bf16 %v1467_v24, %v1461_v23  ;;  %v4279_v52 = vpack.c.bf16 %v2057_v37, %v2051_v41  ;;  %v4291_v41 = vpack.c.bf16 %v2093_v21, %v2087_v19 }
 0x544   : > { %4644 = vmatprep.subr.bf16.mxu0 %v4643_v42  ;;  %v560_v42 = vld [vmem:[%s6165_s3 + $0x28] sm:$0xff]  ;;  %v573_v5 = vrot.slane %v557_v43, 4 }
 0x545   : > { %4262 = vmatpush1.bf16.msra.mxu1 %v4261_v34  ;;  %v1479_v34 = vld [vmem:[#allocation16 + $0xa58] sm:$0xff]  ;;  %v591_v35 = vrot.slane %v560_v42, 4  ;;  %v1496_v24 = vld [vmem:[#allocation16 + $0xae0] sm:$0xff]  ;;  %v2086_v37 = vld [vmem:[#allocation17 + $0xb50] sm:$0xff] }
 0x546   : > { %4264 = vmatprep.subr.bf16.mxu1 %v4263_v33  ;;  %v2056_v33 = vld [vmem:[#allocation17 + $0xa60] sm:$0xff]  ;;  %v2122_v21 = vld [vmem:[#allocation17 + $0xc70] sm:$0xff] }
 0x547   : > { %4646 = vmatpush1.bf16.msra.mxu0 %v4645_v58  ;;  %v2063_v58 = vld [vmem:[#allocation17 + $0xa98] sm:$0xff]  ;;  %v592_v7 = vadd.f32 %v591_v35, %v560_v42  ;;  %v2105_v42 = vld [vmem:[#allocation17 + $0xbe8] sm:$0xff] }
 0x548   : > { %4648 = vmatprep.subr.bf16.mxu0 %v4647_v51  ;;  %v4663_v51 = vpack.c.bf16 %v1479_v34, %v1473_v46  ;;  %v1508_v34 = vld [vmem:[#allocation16 + $0xb40] sm:$0xff] }
 0x549   : > { %4266 = vmatpush1.bf16.msra.mxu1 %v4265_v57  ;;  %v4281_v57 = vpack.c.bf16 %v2056_v33, %v2050_v48  ;;  %v1521_v33 = vld [vmem:[#allocation16 + $0xba8] sm:$0xff] }
 0x54a   : > { %4268 = vmatprep.subr.bf16.mxu1 %v4267_v62  ;;  %v4283_v62 = vpack.c.bf16 %v2069_v38, %v2063_v58  ;;  %v2098_v58 = vld [vmem:[#allocation17 + $0xbb0] sm:$0xff]  ;;  %v2104_v38 = vld [vmem:[#allocation17 + $0xbe0] sm:$0xff] }
 0x54b   : > { %4650 = vmatpush1.bf16.msra.mxu0 %v4649_v2  ;;  %v574_v2 = vadd.f32 %v573_v5, %v557_v43  ;;  %v2092_v43 = vld [vmem:[#allocation17 + $0xb80] sm:$0xff]  ;;  %v1527_v5 = vld [vmem:[#allocation16 + $0xbd8] sm:$0xff]  ;;  %v4297_v63 = vpack.c.bf16 %v2104_v38, %v2098_v58  ;;  %v2146_v58 = vld [vmem:[#allocation17 + $0xd30] sm:$0xff] }
 0x54c   : > { %4652 = vmatprep.subr.bf16.mxu0 %v4651_v6  ;;  %v2081_v6 = vld [vmem:[#allocation17 + $0xb28] sm:$0xff]  ;;  %v4293_v48 = vpack.c.bf16 %v2092_v43, %v2086_v37  ;;  %v4679_v59 = vpack.c.bf16 %v1527_v5, %v1521_v33  ;;  %v1575_v5 = vld [vmem:[#allocation16 + $0xd58] sm:$0xff]  ;;  %v2152_v38 = vld [vmem:[#allocation17 + $0xd60] sm:$0xff] }
 0x54d   : > { %4270 = vmatpush1.bf16.msra.mxu1 %v4269_v9  ;;  %v1484_v9 = vld [vmem:[#allocation16 + $0xa80] sm:$0xff]  ;;  %v4287_v14 = vpack.c.bf16 %v2081_v6, %v2075_v4  ;;  %v575_v17 = vrot.slane %v574_v2, 2  ;;  %v2110_v4 = vld [vmem:[#allocation17 + $0xc10] sm:$0xff]  ;;  %v1557_v43 = vld [vmem:[#allocation16 + $0xcc8] sm:$0xff] }
 0x54e   : > { %4272 = vmatprep.subr.bf16.mxu1 %v4271_v12  ;;  %v1497_v12 = vld [vmem:[#allocation16 + $0xae8] sm:$0xff]  ;;  %v2116_v6 = vld [vmem:[#allocation17 + $0xc40] sm:$0xff] }
 0x54f   : > { %4654 = vmatpush1.bf16.msra.mxu0 %v4653_v15  ;;  %v2074_v15 = vld [vmem:[#allocation17 + $0xaf0] sm:$0xff]  ;;  %v4671_v23 = vpack.c.bf16 %v1503_v13, %v1497_v12  ;;  %v1532_v13 = vld [vmem:[#allocation16 + $0xc00] sm:$0xff]  ;;  %v1569_v33 = vld [vmem:[#allocation16 + $0xd28] sm:$0xff] }
 0x550   : > { %4656 = vmatprep.subr.bf16.mxu0 %v4655_v18  ;;  %v4669_v18 = vpack.c.bf16 %v1490_v10, %v1484_v9  ;;  %v4289_v26 = vpack.c.bf16 %v2080_v16, %v2074_v15  ;;  %v2123_v9 = vld [vmem:[#allocation17 + $0xc78] sm:$0xff]  ;;  %v2129_v10 = vld [vmem:[#allocation17 + $0xca8] sm:$0xff]  ;;  %v4301_v15 = vpack.c.bf16 %v2116_v6, %v2110_v4 }
 0x551   : > { %4274 = vmatpush1.bf16.msra.mxu1 %v4273_v22  ;;  %v593_v22 = vrot.slane %v592_v7, 2  ;;  %v1545_v16 = vld [vmem:[#allocation16 + $0xc68] sm:$0xff]  ;;  %v4303_v19 = vpack.c.bf16 %v2129_v10, %v2123_v9  ;;  %v2171_v6 = vld [vmem:[#allocation17 + $0xdf8] sm:$0xff]  ;;  %v1580_v9 = vld [vmem:[#allocation16 + $0xd80] sm:$0xff] }
 0x552   : > { %4276 = vmatprep.subr.bf16.mxu1 %v4275_v25  ;;  %v1502_v25 = vld [vmem:[#allocation16 + $0xb10] sm:$0xff] }
 0x553   : > { %4658 = vmatpush1.bf16.msra.mxu0 %v4657_v39  ;;  %v1515_v39 = vld [vmem:[#allocation16 + $0xb78] sm:$0xff]  ;;  %v4673_v30 = vpack.c.bf16 %v1502_v25, %v1496_v24  ;;  %v2141_v25 = vld [vmem:[#allocation17 + $0xd08] sm:$0xff]  ;;  %v1586_v10 = vld [vmem:[#allocation16 + $0xdb0] sm:$0xff] }
 0x554   : > { %4660 = vmatprep.subr.bf16.mxu0 %v4659_v55  ;;  %v576_v55 = vadd.f32 %v575_v17, %v574_v2  ;;  %v4675_v46 = vpack.c.bf16 %v1515_v39, %v1509_v28  ;;  %v1539_v2 = vld [vmem:[#allocation16 + $0xc38] sm:$0xff]  ;;  %v1544_v39 = vld [vmem:[#allocation16 + $0xc60] sm:$0xff] }
 0x555   : > { %4278 = vmatpush1.bf16.msra.mxu1 %v4277_v44  ;;  %v594_v44 = vadd.f32 %v593_v22, %v592_v7  ;;  %v4683_v12 = vpack.c.bf16 %v1539_v2, %v1533_v1  ;;  %v1551_v17 = vld [vmem:[#allocation16 + $0xc98] sm:$0xff]  ;;  %v2128_v22 = vld [vmem:[#allocation17 + $0xca0] sm:$0xff]  ;;  %v2158_v2 = vld [vmem:[#allocation17 + $0xd90] sm:$0xff] }
 0x556   : > { %4280 = vmatprep.subr.bf16.mxu1 %v4279_v52  ;;  %v1514_v52 = vld [vmem:[#allocation16 + $0xb70] sm:$0xff]  ;;  %v577_v35 = vrot.slane %v576_v55, 1  ;;  %v2135_v24 = vld [vmem:[#allocation17 + $0xcd8] sm:$0xff]  ;;  %v4687_v28 = vpack.c.bf16 %v1551_v17, %v1545_v16  ;;  %v4305_v37 = vpack.c.bf16 %v2128_v22, %v2122_v21  ;;  %v2176_v16 = vld [vmem:[#allocation17 + $0xe20] sm:$0xff]  ;;  %v4701_v17 = vpack.c.bf16 %v1586_v10, %v1580_v9 }
 0x557   : > { %4662 = vmatpush1.bf16.msra.mxu0 %v4661_v50  ;;  %v4295_v50 = vpack.c.bf16 %v2105_v42, %v2099_v29  ;;  %v2134_v29 = vld [vmem:[#allocation17 + $0xcd0] sm:$0xff]  ;;  %v2140_v42 = vld [vmem:[#allocation17 + $0xd00] sm:$0xff]  ;;  %v2189_v21 = vld [vmem:[#allocation17 + $0xe88] sm:$0xff] }
 0x558   : > { %4664 = vmatprep.subr.bf16.mxu0 %v4663_v51  ;;  %v4677_v51 = vpack.c.bf16 %v1514_v52, %v1508_v34  ;;  %v578_v7 = vadd.f32 %v577_v35, %v576_v55  ;;  %v1563_v55 = vld [vmem:[#allocation16 + $0xcf8] sm:$0xff]  ;;  %v1556_v52 = vld [vmem:[#allocation16 + $0xcc0] sm:$0xff] }
 0x559   : > { %4282 = vmatpush1.bf16.msra.mxu1 %v4281_v57  ;;  %v595_v57 = vrot.slane %v594_v44, 1  ;;  %v4691_v34 = vpack.c.bf16 %v1563_v55, %v1557_v43  ;;  %v2188_v43 = vld [vmem:[#allocation17 + $0xe80] sm:$0xff]  ;;  %v1647_v9 = vld [vmem:[#allocation16 + $0xf98] sm:$0xff] }
 0x55a   : > { %4284 = vmatprep.subr.bf16.mxu1 %v4283_v62  ;;  %v1526_v62 = vld [vmem:[#allocation16 + $0xbd0] sm:$0xff] }
 0x55b   : > { %4666 = vmatpush1.bf16.msra.mxu0 %v4665_v3  ;;  %v4299_v3 = vpack.c.bf16 %v2117_v54, %v2111_v53  ;;  %v2165_v53 = vld [vmem:[#allocation17 + $0xdc8] sm:$0xff]  ;;  %v4695_v54 = vpack.c.bf16 %v1575_v5, %v1569_v33  ;;  %v2200_v33 = vld [vmem:[#allocation17 + $0xee0] sm:$0xff] }
 0x55c   : > { %4668 = vmatprep.subr.bf16.mxu0 %v4667_v8  ;;  %v4681_v8 = vpack.c.bf16 %v1526_v62, %v1520_v60  ;;  %v4313_v60 = vpack.c.bf16 %v2152_v38, %v2146_v58  ;;  %v1581_v62 = vld [vmem:[#allocation16 + $0xd88] sm:$0xff] }
 0x55d   : > { %4286 = vmatpush1.bf16.msra.mxu1 %v4285_v11  ;;  %v596_v11 = vadd.f32 %v595_v57, %v594_v44  ;;  %v1568_v57 = vld [vmem:[#allocation16 + $0xd20] sm:$0xff]  ;;  %v2213_v58 = vld [vmem:[#allocation17 + $0xf48] sm:$0xff] }
 0x55e   : > { %4288 = vmatprep.subr.bf16.mxu1 %v4287_v14  ;;  %v1538_v14 = vld [vmem:[#allocation16 + $0xc30] sm:$0xff] }
 0x55f   : > { %4670 = vmatpush1.bf16.msra.mxu0 %v4669_v18  ;;  %v6339_v18 = vmul.f32 0.125, %v578_v7  ;;  %v2177_v7 = vld [vmem:[#allocation17 + $0xe28] sm:$0xff] }
 0x560   : > { %4672 = vmatprep.subr.bf16.mxu0 %v4671_v23  ;;  %v4685_v23 = vpack.c.bf16 %v1538_v14, %v1532_v13  ;;  %v1599_v13 = vld [vmem:[#allocation16 + $0xe18] sm:$0xff]  ;;  %v4319_v14 = vpack.c.bf16 %v2177_v7, %v2171_v6  ;;  %v1634_v6 = vld [vmem:[#allocation16 + $0xf30] sm:$0xff] }
 0x561   : > { %4290 = vmatpush1.bf16.msra.mxu1 %v4289_v26  ;;  %v6341_v26 = vmul.f32 0.125, %v596_v11 }
 0x562   : > { %4292 = vmatprep.subr.bf16.mxu1 %v4291_v41  ;;  %v1550_v41 = vld [vmem:[#allocation16 + $0xc90] sm:$0xff] }
 0x563   : > { %4674 = vmatpush1.bf16.msra.mxu0 %v4673_v30  ;;  %v4307_v30 = vpack.c.bf16 %v2141_v25, %v2135_v24  ;;  %v4689_v44 = vpack.c.bf16 %v1550_v41, %v1544_v39  ;;  %v1598_v24 = vld [vmem:[#allocation16 + $0xe10] sm:$0xff]  ;;  %v1611_v39 = vld [vmem:[#allocation16 + $0xe78] sm:$0xff] }
 0x564   : > { %4676 = vmatprep.subr.bf16.mxu0 %v4675_v46  ;;  %v2147_v46 = vld [vmem:[#allocation17 + $0xd38] sm:$0xff] }
 0x565   : > { %4294 = vmatpush1.bf16.msra.mxu1 %v4293_v48  ;;  %v1562_v48 = vld [vmem:[#allocation16 + $0xcf0] sm:$0xff] }
 0x566   : > { %4296 = vmatprep.subr.bf16.mxu1 %v4295_v50  ;;  %v4693_v35 = vpack.c.bf16 %v1562_v48, %v1556_v52  ;;  %v1623_v52 = vld [vmem:[#allocation16 + $0xed8] sm:$0xff] }
 0x567   : > { %4678 = vmatpush1.bf16.msra.mxu0 %v4677_v51  ;;  %v2159_v51 = vld [vmem:[#allocation17 + $0xd98] sm:$0xff] }
 0x568   : > { %4680 = vmatprep.subr.bf16.mxu0 %v4679_v59  ;;  %v1574_v59 = vld [vmem:[#allocation16 + $0xd50] sm:$0xff]  ;;  %v4315_v1 = vpack.c.bf16 %v2165_v53, %v2159_v51 }
 0x569   : > { %4298 = vmatpush1.bf16.msra.mxu1 %v4297_v63  ;;  %v1587_v63 = vld [vmem:[#allocation16 + $0xdb8] sm:$0xff]  ;;  %v4697_v4 = vpack.c.bf16 %v1574_v59, %v1568_v57  ;;  %v1622_v51 = vld [vmem:[#allocation16 + $0xed0] sm:$0xff] }
 0x56a   : > { %4300 = vmatprep.subr.bf16.mxu1 %v4299_v3  ;;  %v2164_v3 = vld [vmem:[#allocation17 + $0xdc0] sm:$0xff]  ;;  %v1635_v57 = vld [vmem:[#allocation16 + $0xf38] sm:$0xff] }
 0x56b   : > { %4682 = vmatpush1.bf16.msra.mxu0 %v4681_v8  ;;  %v4699_v8 = vpack.c.bf16 %v1587_v63, %v1581_v62  ;;  %v4317_v11 = vpack.c.bf16 %v2164_v3, %v2158_v2  ;;  %v2212_v62 = vld [vmem:[#allocation17 + $0xf40] sm:$0xff]  ;;  %v2225_v2 = vld [vmem:[#allocation17 + $0xfa8] sm:$0xff] }
 0x56c   : > { %2649 = vmatmul.mubr.f32.vlgmr.msra.gmra.mrb[6].mxu1 %v6302_v56  ;;  %4684 = vmatprep.subr.bf16.mxu0 %v4683_v12  ;;  %v2153_v56 = vld [vmem:[#allocation17 + $0xd68] sm:$0xff] }
 0x56d   : > { %4302 = vmatpush1.bf16.msra.mxu1 %v4301_v15  ;;  %2719 = vmatprep.mubr.f32.mxu1 %v6304_v61  ;;  %v4309_v61 = vpack.c.bf16 %v2140_v42, %v2134_v29  ;;  %v4311_v50 = vpack.c.bf16 %v2153_v56, %v2147_v46  ;;  %v1593_v12 = vld [vmem:[#allocation16 + $0xde8] sm:$0xff]  ;;  %v2170_v15 = vld [vmem:[#allocation17 + $0xdf0] sm:$0xff] }
 0x56e   : > { %3075 = vmatmul.mubr.f32.vlgmr.msra.gmra.mrb[6].mxu0 %v6339_v18  ;;  %4304 = vmatprep.subr.bf16.mxu1 %v4303_v19  ;;  %v2183_v19 = vld [vmem:[#allocation17 + $0xe58] sm:$0xff]  ;;  %v4703_v22 = vpack.c.bf16 %v1599_v13, %v1593_v12  ;;  %v4321_v25 = vpack.c.bf16 %v2176_v16, %v2170_v15  ;;  %v2201_v29 = vld [vmem:[#allocation17 + $0xee8] sm:$0xff]  ;;  %v1610_v46 = vld [vmem:[#allocation16 + $0xe70] sm:$0xff] }
 0x56f   : > { %4686 = vmatpush1.bf16.msra.mxu0 %v4685_v23  ;;  %3145 = vmatprep.mubr.f32.mxu0 %v6341_v26  ;;  %v1592_v23 = vld [vmem:[#allocation16 + $0xde0] sm:$0xff]  ;;  %v4323_v41 = vpack.c.bf16 %v2189_v21, %v2183_v19  ;;  %v2237_v15 = vld [vmem:[#allocation17 + $0x1008] sm:$0xff]  ;;  %v1646_v19 = vld [vmem:[#allocation16 + $0xf90] sm:$0xff] }
 0x570   : > { %4688 = vmatprep.subr.bf16.mxu0 %v4687_v28  ;;  %v1605_v28 = vld [vmem:[#allocation16 + $0xe48] sm:$0xff]  ;;  %v4705_v55 = vpack.c.bf16 %v1598_v24, %v1592_v23  ;;  %v2224_v12 = vld [vmem:[#allocation17 + $0xfa0] sm:$0xff]  ;;  %v1659_v23 = vld [vmem:[#allocation16 + $0xff8] sm:$0xff] }
 0x571   : > { %4306 = vmatpush1.bf16.msra.mxu1 %v4305_v37  ;;  %v2182_v37 = vld [vmem:[#allocation17 + $0xe50] sm:$0xff]  ;;  %v4707_v42 = vpack.c.bf16 %v1611_v39, %v1605_v28  ;;  %v2236_v28 = vld [vmem:[#allocation17 + $0x1000] sm:$0xff] }
 0x572   : > { %4308 = vmatprep.subr.bf16.mxu1 %v4307_v30  ;;  %v2195_v30 = vld [vmem:[#allocation17 + $0xeb8] sm:$0xff]  ;;  %v4325_v56 = vpack.c.bf16 %v2188_v43, %v2182_v37  ;;  %v2249_v37 = vld [vmem:[#allocation17 + $0x1068] sm:$0xff] }
 0x573   : > { %4690 = vmatpush1.bf16.msra.mxu0 %v4689_v44  ;;  %v1604_v44 = vld [vmem:[#allocation16 + $0xe40] sm:$0xff]  ;;  %v4327_v48 = vpack.c.bf16 %v2201_v29, %v2195_v30  ;;  %v1658_v29 = vld [vmem:[#allocation16 + $0xff0] sm:$0xff] }
 0x574   : > { %4692 = vmatprep.subr.bf16.mxu0 %v4691_v34  ;;  %v1617_v34 = vld [vmem:[#allocation16 + $0xea8] sm:$0xff]  ;;  %v4709_v5 = vpack.c.bf16 %v1610_v46, %v1604_v44  ;;  %v1652_v30 = vld [vmem:[#allocation16 + $0xfc0] sm:$0xff]  ;;  %v1671_v46 = vld [vmem:[#allocation16 + $0x1058] sm:$0xff] }
 0x575   : > { %4310 = vmatpush1.bf16.msra.mxu1 %v4309_v61  ;;  %v2194_v61 = vld [vmem:[#allocation17 + $0xeb0] sm:$0xff]  ;;  %v4711_v38 = vpack.c.bf16 %v1623_v52, %v1617_v34  ;;  %v1665_v44 = vld [vmem:[#allocation16 + $0x1028] sm:$0xff]  ;;  %v2248_v52 = vld [vmem:[#allocation17 + $0x1060] sm:$0xff] }
 0x576   : > { %4312 = vmatprep.subr.bf16.mxu1 %v4311_v50  ;;  %v2207_v50 = vld [vmem:[#allocation17 + $0xf18] sm:$0xff]  ;;  %v4329_v53 = vpack.c.bf16 %v2200_v33, %v2194_v61  ;;  %v2242_v34 = vld [vmem:[#allocation17 + $0x1030] sm:$0xff]  ;;  %v4725_v61 = vpack.c.bf16 %v1658_v29, %v1652_v30  ;;  %v1700_v30 = vld [vmem:[#allocation16 + $0x1140] sm:$0xff] }
 0x577   : > { %4694 = vmatpush1.bf16.msra.mxu0 %v4693_v35  ;;  %v1616_v35 = vld [vmem:[#allocation16 + $0xea0] sm:$0xff]  ;;  %v4331_v59 = vpack.c.bf16 %v2213_v58, %v2207_v50  ;;  %v2255_v33 = vld [vmem:[#allocation17 + $0x1098] sm:$0xff]  ;;  %v4727_v50 = vpack.c.bf16 %v1671_v46, %v1665_v44  ;;  %v1706_v29 = vld [vmem:[#allocation16 + $0x1170] sm:$0xff] }
 0x578   : > { %4696 = vmatprep.subr.bf16.mxu0 %v4695_v54  ;;  %v1629_v54 = vld [vmem:[#allocation16 + $0xf08] sm:$0xff]  ;;  %v4713_v63 = vpack.c.bf16 %v1622_v51, %v1616_v35  ;;  %v1664_v58 = vld [vmem:[#allocation16 + $0x1020] sm:$0xff]  ;;  %v4345_v35 = vpack.c.bf16 %v2248_v52, %v2242_v34  ;;  %v1719_v46 = vld [vmem:[#allocation16 + $0x11d8] sm:$0xff] }
 0x579   : > { %4314 = vmatpush1.bf16.msra.mxu1 %v4313_v60  ;;  %v2206_v60 = vld [vmem:[#allocation17 + $0xf10] sm:$0xff]  ;;  %v4715_v3 = vpack.c.bf16 %v1635_v57, %v1629_v54  ;;  %v1677_v51 = vld [vmem:[#allocation16 + $0x1088] sm:$0xff]  ;;  %v2296_v52 = vld [vmem:[#allocation17 + $0x11e0] sm:$0xff] }
 0x57a   : > { %4316 = vmatprep.subr.bf16.mxu1 %v4315_v1  ;;  %v2219_v1 = vld [vmem:[#allocation17 + $0xf78] sm:$0xff]  ;;  %v4333_v7 = vpack.c.bf16 %v2212_v62, %v2206_v60  ;;  %v2254_v57 = vld [vmem:[#allocation17 + $0x1090] sm:$0xff]  ;;  %v1713_v44 = vld [vmem:[#allocation16 + $0x11a8] sm:$0xff] }
 0x57b   : > { %4698 = vmatpush1.bf16.msra.mxu0 %v4697_v4  ;;  %v1628_v4 = vld [vmem:[#allocation16 + $0xf00] sm:$0xff]  ;;  %v4335_v10 = vpack.c.bf16 %v2225_v2, %v2219_v1  ;;  %v2273_v1 = vld [vmem:[#allocation17 + $0x1128] sm:$0xff]  ;;  %v2290_v34 = vld [vmem:[#allocation17 + $0x11b0] sm:$0xff] }
 0x57c   : > { %4700 = vmatprep.subr.bf16.mxu0 %v4699_v8  ;;  %v1641_v8 = vld [vmem:[#allocation16 + $0xf68] sm:$0xff]  ;;  %v4717_v13 = vpack.c.bf16 %v1634_v6, %v1628_v4  ;;  %v1682_v4 = vld [vmem:[#allocation16 + $0x10b0] sm:$0xff] }
 0x57d   : > { %4318 = vmatpush1.bf16.msra.mxu1 %v4317_v11  ;;  %v2218_v11 = vld [vmem:[#allocation17 + $0xf70] sm:$0xff]  ;;  %v4719_v16 = vpack.c.bf16 %v1647_v9, %v1641_v8  ;;  %v1695_v8 = vld [vmem:[#allocation16 + $0x1118] sm:$0xff] }
 0x57e   : > { %4320 = vmatprep.subr.bf16.mxu1 %v4319_v14  ;;  %v2231_v14 = vld [vmem:[#allocation17 + $0xfd8] sm:$0xff]  ;;  %v4337_v21 = vpack.c.bf16 %v2224_v12, %v2218_v11  ;;  %v2272_v11 = vld [vmem:[#allocation17 + $0x1120] sm:$0xff] }
 0x57f   : > { %4702 = vmatpush1.bf16.msra.mxu0 %v4701_v17  ;;  %v1640_v17 = vld [vmem:[#allocation16 + $0xf60] sm:$0xff]  ;;  %v4339_v24 = vpack.c.bf16 %v2237_v15, %v2231_v14  ;;  %v2279_v14 = vld [vmem:[#allocation17 + $0x1158] sm:$0xff]  ;;  %v2285_v15 = vld [vmem:[#allocation17 + $0x1188] sm:$0xff] }
 0x580   : > { %4704 = vmatprep.subr.bf16.mxu0 %v4703_v22  ;;  %v1653_v22 = vld [vmem:[#allocation16 + $0xfc8] sm:$0xff]  ;;  %v4721_v39 = vpack.c.bf16 %v1646_v19, %v1640_v17  ;;  %v1688_v17 = vld [vmem:[#allocation16 + $0x10e0] sm:$0xff]  ;;  %v1694_v19 = vld [vmem:[#allocation16 + $0x1110] sm:$0xff] }
 0x581   : > { %4322 = vmatpush1.bf16.msra.mxu1 %v4321_v25  ;;  %v2230_v25 = vld [vmem:[#allocation17 + $0xfd0] sm:$0xff] }
 0x582   : > { %4324 = vmatprep.subr.bf16.mxu1 %v4323_v41  ;;  %v2243_v41 = vld [vmem:[#allocation17 + $0x1038] sm:$0xff] }
 0x583   : > { %4706 = vmatpush1.bf16.msra.mxu0 %v4705_v55  ;;  %v559_v43 = vld [vmem:[%s6165_s3 + $0x20] sm:$0xff]  ;;  %v4723_v55 = vpack.c.bf16 %v1659_v23, %v1653_v22 }
 0x584   : > { %4708 = vmatprep.subr.bf16.mxu0 %v4707_v42  ;;  %v4341_v42 = vpack.c.bf16 %v2236_v28, %v2230_v25  ;;  %v1701_v22 = vld [vmem:[#allocation16 + $0x1148] sm:$0xff]  ;;  %v1707_v23 = vld [vmem:[#allocation16 + $0x1178] sm:$0xff]  ;;  %v2278_v25 = vld [vmem:[#allocation17 + $0x1150] sm:$0xff] }
 0x585   : > { %4326 = vmatpush1.bf16.msra.mxu1 %v4325_v56  ;;  %v4343_v56 = vpack.c.bf16 %v2249_v37, %v2243_v41  ;;  %v2284_v28 = vld [vmem:[#allocation17 + $0x1180] sm:$0xff]  ;;  %v4737_v41 = vpack.c.bf16 %v1694_v19, %v1688_v17  ;;  %v2291_v37 = vld [vmem:[#allocation17 + $0x11b8] sm:$0xff]  ;;  %v1170_v19 = vld [vmem:[#allocation16 + $0xb0] sm:$0xff] }
 0x586   : > { %4328 = vmatprep.subr.bf16.mxu1 %v4327_v48  ;;  %v585_v48 = vrot.slane %v559_v43, 4  ;;  %v1164_v17 = vld [vmem:[#allocation16 + $0x80] sm:$0xff] }
 0x587   : > { %4710 = vmatpush1.bf16.msra.mxu0 %v4709_v5  ;;  %v2261_v5 = vld [vmem:[#allocation17 + $0x10c8] sm:$0xff] }
 0x588   : > { %4712 = vmatprep.subr.bf16.mxu0 %v4711_v38  ;;  %v1670_v38 = vld [vmem:[#allocation16 + $0x1050] sm:$0xff]  ;;  %v4347_v54 = vpack.c.bf16 %v2261_v5, %v2255_v33  ;;  %v586_v60 = vadd.f32 %v585_v48, %v559_v43  ;;  %v2297_v43 = vld [vmem:[#allocation17 + $0x11e8] sm:$0xff]  ;;  %v1151_v33 = vld [vmem:[#allocation16 + $0x18] sm:$0xff] }
 0x589   : > { %4330 = vmatpush1.bf16.msra.mxu1 %v4329_v53  ;;  %v1683_v53 = vld [vmem:[#allocation16 + $0x10b8] sm:$0xff]  ;;  %v4729_v62 = vpack.c.bf16 %v1670_v38, %v1664_v58  ;;  %v1157_v5 = vld [vmem:[#allocation16 + $0x48] sm:$0xff]  ;;  %v1712_v58 = vld [vmem:[#allocation16 + $0x11a0] sm:$0xff] }
 0x58a   : > { %4332 = vmatprep.subr.bf16.mxu1 %v4331_v59  ;;  %v2260_v59 = vld [vmem:[#allocation17 + $0x10c0] sm:$0xff]  ;;  %v4731_v2 = vpack.c.bf16 %v1683_v53, %v1677_v51  ;;  %v587_v12 = vrot.slane %v586_v60, 2  ;;  %v1718_v38 = vld [vmem:[#allocation16 + $0x11d0] sm:$0xff]  ;;  %v1153_v51 = vld [vmem:[#allocation16 + $0x28] sm:$0xff] }
 0x58b   : > { %4714 = vmatpush1.bf16.msra.mxu0 %v4713_v63  ;;  %v2267_v63 = vld [vmem:[#allocation17 + $0x10f8] sm:$0xff]  ;;  %v4349_v6 = vpack.c.bf16 %v2260_v59, %v2254_v57  ;;  %v4747_v57 = vpack.c.bf16 %v1157_v5, %v1151_v33  ;;  %v1150_v59 = vld [vmem:[#allocation16 + $0x10] sm:$0xff]  ;;  %v1188_v33 = vld [vmem:[#allocation16 + $0x140] sm:$0xff] }
 0x58c   : > { %4716 = vmatprep.subr.bf16.mxu0 %v4715_v3  ;;  %v1676_v3 = vld [vmem:[#allocation16 + $0x1080] sm:$0xff]  ;;  %v4351_v9 = vpack.c.bf16 %v2273_v1, %v2267_v63  ;;  %v1159_v53 = vld [vmem:[#allocation16 + $0x58] sm:$0xff]  ;;  %v1169_v1 = vld [vmem:[#allocation16 + $0xa8] sm:$0xff] }
 0x58d   : > { %4334 = vmatpush1.bf16.msra.mxu1 %v4333_v7  ;;  %v1689_v7 = vld [vmem:[#allocation16 + $0x10e8] sm:$0xff]  ;;  %v1163_v63 = vld [vmem:[#allocation16 + $0x78] sm:$0xff] }
 0x58e   : > { %4336 = vmatprep.subr.bf16.mxu1 %v4335_v10  ;;  %v2266_v10 = vld [vmem:[#allocation17 + $0x10f0] sm:$0xff] }
 0x58f   : > { %4718 = vmatpush1.bf16.msra.mxu0 %v4717_v13  ;;  %v4733_v13 = vpack.c.bf16 %v1682_v4, %v1676_v3  ;;  %v1152_v3 = vld [vmem:[#allocation16 + $0x20] sm:$0xff]  ;;  %v1158_v4 = vld [vmem:[#allocation16 + $0x50] sm:$0xff] }
 0x590   : > { %4720 = vmatprep.subr.bf16.mxu0 %v4719_v16  ;;  %v4735_v16 = vpack.c.bf16 %v1695_v8, %v1689_v7  ;;  %v1165_v7 = vld [vmem:[#allocation16 + $0x88] sm:$0xff]  ;;  %v1171_v8 = vld [vmem:[#allocation16 + $0xb8] sm:$0xff] }
 0x591   : > { %4338 = vmatpush1.bf16.msra.mxu1 %v4337_v21  ;;  %v4353_v21 = vpack.c.bf16 %v2272_v11, %v2266_v10  ;;  %v4751_v10 = vpack.c.bf16 %v1169_v1, %v1163_v63  ;;  %v1162_v11 = vld [vmem:[#allocation16 + $0x70] sm:$0xff]  ;;  %v1213_v1 = vld [vmem:[#allocation16 + $0x208] sm:$0xff] }
 0x592   : > { %4340 = vmatprep.subr.bf16.mxu1 %v4339_v24  ;;  %v4355_v24 = vpack.c.bf16 %v2285_v15, %v2279_v14  ;;  %v1175_v14 = vld [vmem:[#allocation16 + $0xd8] sm:$0xff]  ;;  %v1181_v15 = vld [vmem:[#allocation16 + $0x108] sm:$0xff] }
 0x593   : > { %4722 = vmatpush1.bf16.msra.mxu0 %v4721_v39  ;;  %v588_v39 = vadd.f32 %v587_v12, %v586_v60  ;;  %v1156_v60 = vld [vmem:[#allocation16 + $0x40] sm:$0xff] }
 0x594   : > { %4724 = vmatprep.subr.bf16.mxu0 %v4723_v55  ;;  %v4739_v55 = vpack.c.bf16 %v1707_v23, %v1701_v22  ;;  %v1168_v12 = vld [vmem:[#allocation16 + $0xa0] sm:$0xff]  ;;  %v1177_v22 = vld [vmem:[#allocation16 + $0xe8] sm:$0xff]  ;;  %v1183_v23 = vld [vmem:[#allocation16 + $0x118] sm:$0xff] }
 0x595   : > { %4342 = vmatpush1.bf16.msra.mxu1 %v4341_v42  ;;  %v4357_v42 = vpack.c.bf16 %v2284_v28, %v2278_v25  ;;  %v589_v48 = vrot.slane %v588_v39, 1  ;;  %v1174_v25 = vld [vmem:[#allocation16 + $0xd0] sm:$0xff]  ;;  %v1180_v28 = vld [vmem:[#allocation16 + $0x100] sm:$0xff] }
 0x596   : > { %4344 = vmatprep.subr.bf16.mxu1 %v4343_v56  ;;  %v4359_v56 = vpack.c.bf16 %v2297_v43, %v2291_v37  ;;  %v4947_v37 = vpack.c.bf16 %v1183_v23, %v1177_v22  ;;  %v1176_v43 = vld [vmem:[#allocation16 + $0xe0] sm:$0xff] }
 0x597   : > { %4726 = vmatpush1.bf16.msra.mxu0 %v4725_v61  ;;  %v4741_v61 = vpack.c.bf16 %v1706_v29, %v1700_v30  ;;  %v4757_v30 = vpack.c.bf16 %v1180_v28, %v1174_v25  ;;  %v1189_v29 = vld [vmem:[#allocation16 + $0x148] sm:$0xff] }
 0x598   : > { %4728 = vmatprep.subr.bf16.mxu0 %v4727_v50  ;;  %v4743_v50 = vpack.c.bf16 %v1719_v46, %v1713_v44  ;;  %v1186_v46 = vld [vmem:[#allocation16 + $0x130] sm:$0xff]  ;;  %v1241_v25 = vld [vmem:[#allocation16 + $0x2e8] sm:$0xff] }
 0x599   : > { %4346 = vmatpush1.bf16.msra.mxu1 %v4345_v35  ;;  %v4361_v35 = vpack.c.bf16 %v2296_v52, %v2290_v34  ;;  %v1199_v52 = vld [vmem:[#allocation16 + $0x198] sm:$0xff] }
 0x59a   : > { %4348 = vmatprep.subr.bf16.mxu1 %v4347_v54  ;;  %v590_v54 = vadd.f32 %v589_v48, %v588_v39  ;;  %v4945_v39 = vpack.c.bf16 %v1170_v19, %v1164_v17  ;;  %v1205_v48 = vld [vmem:[#allocation16 + $0x1c8] sm:$0xff]  ;;  %v1222_v19 = vld [vmem:[#allocation16 + $0x250] sm:$0xff] }
 0x59b   : > { %4730 = vmatpush1.bf16.msra.mxu0 %v4729_v62  ;;  %v4745_v62 = vpack.c.bf16 %v1718_v38, %v1712_v58  ;;  %v1207_v58 = vld [vmem:[#allocation16 + $0x1d8] sm:$0xff]  ;;  %v4763_v38 = vpack.c.bf16 %v1205_v48, %v1199_v52  ;;  %v1236_v52 = vld [vmem:[#allocation16 + $0x2c0] sm:$0xff]  ;;  %v1242_v48 = vld [vmem:[#allocation16 + $0x2f0] sm:$0xff] }
 0x59c   : > { %4732 = vmatprep.subr.bf16.mxu0 %v4731_v2  ;;  %v4939_v2 = vpack.c.bf16 %v1159_v53, %v1153_v51  ;;  %v1204_v51 = vld [vmem:[#allocation16 + $0x1c0] sm:$0xff] }
 0x59d   : > { %4350 = vmatpush1.bf16.msra.mxu1 %v4349_v6  ;;  %v4749_v6 = vpack.c.bf16 %v1156_v60, %v1150_v59  ;;  %v1200_v60 = vld [vmem:[#allocation16 + $0x1a0] sm:$0xff] }
 0x59e   : > { %4352 = vmatprep.subr.bf16.mxu1 %v4351_v9  ;;  %v6348_v9 = vmul.f32 0.125, %v590_v54  ;;  %v1211_v54 = vld [vmem:[#allocation16 + $0x1f8] sm:$0xff] }
 0x59f   : > { %4734 = vmatpush1.bf16.msra.mxu0 %v4733_v13  ;;  %v4941_v13 = vpack.c.bf16 %v1158_v4, %v1152_v3  ;;  %v1210_v4 = vld [vmem:[#allocation16 + $0x1f0] sm:$0xff] }
 0x5a0   : > { %4736 = vmatprep.subr.bf16.mxu0 %v4735_v16  ;;  %v4943_v16 = vpack.c.bf16 %v1171_v8, %v1165_v7  ;;  %v1223_v8 = vld [vmem:[#allocation16 + $0x258] sm:$0xff] }
 0x5a1   : > { %4354 = vmatpush1.bf16.msra.mxu1 %v4353_v21  ;;  %v4753_v21 = vpack.c.bf16 %v1168_v12, %v1162_v11  ;;  %v1212_v12 = vld [vmem:[#allocation16 + $0x200] sm:$0xff] }
 0x5a2   : > { %4356 = vmatprep.subr.bf16.mxu1 %v4355_v24  ;;  %v4755_v24 = vpack.c.bf16 %v1181_v15, %v1175_v14  ;;  %v1225_v15 = vld [vmem:[#allocation16 + $0x268] sm:$0xff] }
 0x5a3   : > { %4738 = vmatpush1.bf16.msra.mxu0 %v4737_v41  ;;  %v1187_v41 = vld [vmem:[#allocation16 + $0x138] sm:$0xff] }
 0x5a4   : > { %4740 = vmatprep.subr.bf16.mxu0 %v4739_v55  ;;  %v1182_v55 = vld [vmem:[#allocation16 + $0x110] sm:$0xff] }
 0x5a5   : > { %4358 = vmatpush1.bf16.msra.mxu1 %v4357_v42  ;;  %v1195_v42 = vld [vmem:[#allocation16 + $0x178] sm:$0xff]  ;;  %v4949_v34 = vpack.c.bf16 %v1182_v55, %v1176_v43  ;;  %v1237_v43 = vld [vmem:[#allocation16 + $0x2c8] sm:$0xff] }
 0x5a6   : > { %4360 = vmatprep.subr.bf16.mxu1 %v4359_v56  ;;  %v1192_v56 = vld [vmem:[#allocation16 + $0x160] sm:$0xff]  ;;  %v1243_v55 = vld [vmem:[#allocation16 + $0x2f8] sm:$0xff] }
 0x5a7   : > { %4742 = vmatpush1.bf16.msra.mxu0 %v4741_v61  ;;  %v4951_v61 = vpack.c.bf16 %v1195_v42, %v1189_v29  ;;  %v4761_v5 = vpack.c.bf16 %v1192_v56, %v1186_v46  ;;  %v1234_v29 = vld [vmem:[#allocation16 + $0x2b0] sm:$0xff]  ;;  %v1240_v42 = vld [vmem:[#allocation16 + $0x2e0] sm:$0xff]  ;;  %v1247_v46 = vld [vmem:[#allocation16 + $0x318] sm:$0xff] }
 0x5a8   : > { %4744 = vmatprep.subr.bf16.mxu0 %v4743_v50  ;;  %v1201_v50 = vld [vmem:[#allocation16 + $0x1a8] sm:$0xff] }
 0x5a9   : > { %4362 = vmatpush1.bf16.msra.mxu1 %v4361_v35  ;;  %v1198_v35 = vld [vmem:[#allocation16 + $0x190] sm:$0xff]  ;;  %v4955_v59 = vpack.c.bf16 %v1207_v58, %v1201_v50  ;;  %v1253_v56 = vld [vmem:[#allocation16 + $0x348] sm:$0xff]  ;;  %v1252_v58 = vld [vmem:[#allocation16 + $0x340] sm:$0xff] }
 0x5aa   : > { %4748 = vmatprep.subr.bf16.mxu1 %v4747_v57  ;;  %v1217_v57 = vld [vmem:[#allocation16 + $0x228] sm:$0xff]  ;;  %v4765_v63 = vpack.c.bf16 %v1204_v51, %v1198_v35  ;;  %v1246_v50 = vld [vmem:[#allocation16 + $0x310] sm:$0xff]  ;;  %v1259_v35 = vld [vmem:[#allocation16 + $0x378] sm:$0xff] }
 0x5ab   : > { %4746 = vmatpush1.bf16.msra.mxu0 %v4745_v62  ;;  %v1206_v62 = vld [vmem:[#allocation16 + $0x1d0] sm:$0xff]  ;;  %v4767_v3 = vpack.c.bf16 %v1217_v57, %v1211_v54  ;;  %v1265_v51 = vld [vmem:[#allocation16 + $0x3a8] sm:$0xff]  ;;  %v1248_v54 = vld [vmem:[#allocation16 + $0x320] sm:$0xff] }
 0x5ac   : > { %2720 = vmatmul.mubr.f32.vlgmr.msra.gmra.mrb[6].mxu1 %v6312_v0  ;;  %4940 = vmatprep.subr.bf16.mxu0 %v4939_v2  ;;  %v1193_v0 = vld [vmem:[#allocation16 + $0x168] sm:$0xff]  ;;  %v1219_v2 = vld [vmem:[#allocation16 + $0x238] sm:$0xff]  ;;  %v4957_v7 = vpack.c.bf16 %v1206_v62, %v1200_v60  ;;  %v1254_v57 = vld [vmem:[#allocation16 + $0x350] sm:$0xff] }
 0x5ad   : > { %4750 = vmatpush1.bf16.msra.mxu1 %v4749_v6  ;;  %3216 = vmatprep.mubr.f32.mxu1 %v6322_v49  ;;  %v4759_v44 = vpack.c.bf16 %v1193_v0, %v1187_v41  ;;  %v1216_v6 = vld [vmem:[#allocation16 + $0x220] sm:$0xff]  ;;  %v4959_v11 = vpack.c.bf16 %v1219_v2, %v1213_v1  ;;  %v1230_v0 = vld [vmem:[#allocation16 + $0x290] sm:$0xff]  ;;  %v1261_v60 = vld [vmem:[#allocation16 + $0x388] sm:$0xff] }
 0x5ae   : > { %3146 = vmatmul.mubr.f32.vlgmr.msra.gmra.mrb[6].mxu0 %v6348_v9  ;;  %4752 = vmatprep.subr.bf16.mxu1 %v4751_v10  ;;  %v1229_v10 = vld [vmem:[#allocation16 + $0x288] sm:$0xff]  ;;  %v4769_v14 = vpack.c.bf16 %v1216_v6, %v1210_v4  ;;  %v1224_v41 = vld [vmem:[#allocation16 + $0x260] sm:$0xff]  ;;  %v1267_v62 = vld [vmem:[#allocation16 + $0x3b8] sm:$0xff] }
 0x5af   : > { %4942 = vmatpush1.bf16.msra.mxu0 %v4941_v13  ;;  %3429 = vmatprep.mubr.f32.mxu0 %v6322_v49  ;;  %v1194_v49 = vld [vmem:[#allocation16 + $0x170] sm:$0xff]  ;;  %v4771_v17 = vpack.c.bf16 %v1229_v10, %v1223_v8  ;;  %v1264_v2 = vld [vmem:[#allocation16 + $0x3a0] sm:$0xff]  ;;  %v1271_v4 = vld [vmem:[#allocation16 + $0x3d8] sm:$0xff] }
 0x5b0   : > { %4944 = vmatprep.subr.bf16.mxu0 %v4943_v16  ;;  %v4953_v53 = vpack.c.bf16 %v1194_v49, %v1188_v33  ;;  %v1218_v13 = vld [vmem:[#allocation16 + $0x230] sm:$0xff]  ;;  %v1231_v16 = vld [vmem:[#allocation16 + $0x298] sm:$0xff]  ;;  %v1249_v33 = vld [vmem:[#allocation16 + $0x328] sm:$0xff] }
 0x5b1   : > { %4754 = vmatpush1.bf16.msra.mxu1 %v4753_v21  ;;  %v1228_v21 = vld [vmem:[#allocation16 + $0x280] sm:$0xff]  ;;  %v4961_v23 = vpack.c.bf16 %v1218_v13, %v1212_v12  ;;  %v1255_v49 = vld [vmem:[#allocation16 + $0x358] sm:$0xff]  ;;  %v1258_v1 = vld [vmem:[#allocation16 + $0x370] sm:$0xff] }
 0x5b2   : > { %4756 = vmatprep.subr.bf16.mxu1 %v4755_v24  ;;  %v1235_v24 = vld [vmem:[#allocation16 + $0x2b8] sm:$0xff]  ;;  %v1277_v6 = vld [vmem:[#allocation16 + $0x408] sm:$0xff]  ;;  %v1260_v8 = vld [vmem:[#allocation16 + $0x380] sm:$0xff] }
 0x5b3   : > { %4946 = vmatpush1.bf16.msra.mxu0 %v4945_v39  ;;  %v4963_v39 = vpack.c.bf16 %v1231_v16, %v1225_v15  ;;  %v1266_v10 = vld [vmem:[#allocation16 + $0x3b0] sm:$0xff]  ;;  %v1273_v12 = vld [vmem:[#allocation16 + $0x3e8] sm:$0xff]  ;;  %v1279_v13 = vld [vmem:[#allocation16 + $0x418] sm:$0xff] }
 0x5b4   : > { %4948 = vmatprep.subr.bf16.mxu0 %v4947_v37  ;;  %v4773_v37 = vpack.c.bf16 %v1228_v21, %v1222_v19  ;;  %v1270_v15 = vld [vmem:[#allocation16 + $0x3d0] sm:$0xff]  ;;  %v1276_v16 = vld [vmem:[#allocation16 + $0x400] sm:$0xff]  ;;  %v1283_v19 = vld [vmem:[#allocation16 + $0x438] sm:$0xff] }
 0x5b5   : > { %4758 = vmatpush1.bf16.msra.mxu1 %v4757_v30  ;;  %v4775_v30 = vpack.c.bf16 %v1241_v25, %v1235_v24  ;;  %v1289_v21 = vld [vmem:[#allocation16 + $0x468] sm:$0xff]  ;;  %v1272_v24 = vld [vmem:[#allocation16 + $0x3e0] sm:$0xff]  ;;  %v1278_v25 = vld [vmem:[#allocation16 + $0x410] sm:$0xff] }
 0x5b6   : > { %4760 = vmatprep.subr.bf16.mxu1 %v4759_v44  ;;  %v4965_v44 = vpack.c.bf16 %v1230_v0, %v1224_v41  ;;  %v1285_v41 = vld [vmem:[#allocation16 + $0x448] sm:$0xff]  ;;  %v1291_v0 = vld [vmem:[#allocation16 + $0x478] sm:$0xff] }
 0x5b7   : > { %4950 = vmatpush1.bf16.msra.mxu0 %v4949_v34  ;;  %v4967_v34 = vpack.c.bf16 %v1243_v55, %v1237_v43  ;;  %v1282_v43 = vld [vmem:[#allocation16 + $0x430] sm:$0xff]  ;;  %v1288_v55 = vld [vmem:[#allocation16 + $0x460] sm:$0xff] }
 0x5b8   : > { %4952 = vmatprep.subr.bf16.mxu0 %v4951_v61  ;;  %v4777_v61 = vpack.c.bf16 %v1240_v42, %v1234_v29  ;;  %v1295_v29 = vld [vmem:[#allocation16 + $0x498] sm:$0xff]  ;;  %v1301_v42 = vld [vmem:[#allocation16 + $0x4c8] sm:$0xff] }
 0x5b9   : > { %4762 = vmatpush1.bf16.msra.mxu1 %v4761_v5  ;;  %v4779_v5 = vpack.c.bf16 %v1253_v56, %v1247_v46  ;;  %v1284_v46 = vld [vmem:[#allocation16 + $0x440] sm:$0xff]  ;;  %v1290_v56 = vld [vmem:[#allocation16 + $0x470] sm:$0xff] }
 0x5ba   : > { %4764 = vmatprep.subr.bf16.mxu1 %v4763_v38  ;;  %v4969_v38 = vpack.c.bf16 %v1242_v48, %v1236_v52  ;;  %v1297_v52 = vld [vmem:[#allocation16 + $0x4a8] sm:$0xff]  ;;  %v1303_v48 = vld [vmem:[#allocation16 + $0x4d8] sm:$0xff] }
 0x5bb   : > { %4954 = vmatpush1.bf16.msra.mxu0 %v4953_v53  ;;  %v4971_v53 = vpack.c.bf16 %v1255_v49, %v1249_v33  ;;  %v1294_v33 = vld [vmem:[#allocation16 + $0x490] sm:$0xff]  ;;  %v1300_v49 = vld [vmem:[#allocation16 + $0x4c0] sm:$0xff] }
 0x5bc   : > { %4956 = vmatprep.subr.bf16.mxu0 %v4955_v59  ;;  %v4781_v59 = vpack.c.bf16 %v1252_v58, %v1246_v50  ;;  %v1307_v50 = vld [vmem:[#allocation16 + $0x4f8] sm:$0xff]  ;;  %v1313_v58 = vld [vmem:[#allocation16 + $0x528] sm:$0xff] }
 0x5bd   : > { %4766 = vmatpush1.bf16.msra.mxu1 %v4765_v63  ;;  %v4783_v63 = vpack.c.bf16 %v1265_v51, %v1259_v35  ;;  %v1296_v35 = vld [vmem:[#allocation16 + $0x4a0] sm:$0xff]  ;;  %v1302_v51 = vld [vmem:[#allocation16 + $0x4d0] sm:$0xff] }
 0x5be   : > { %4768 = vmatprep.subr.bf16.mxu1 %v4767_v3  ;;  %v4973_v3 = vpack.c.bf16 %v1254_v57, %v1248_v54  ;;  %v1309_v54 = vld [vmem:[#allocation16 + $0x508] sm:$0xff]  ;;  %v1315_v57 = vld [vmem:[#allocation16 + $0x538] sm:$0xff] }
 0x5bf   : > { %4958 = vmatpush1.bf16.msra.mxu0 %v4957_v7  ;;  %v6354_v22 = vpop.f32.mrb[4].mxu1  ;;  %v4975_v7 = vpack.c.bf16 %v1267_v62, %v1261_v60  ;;  %v1306_v60 = vld [vmem:[#allocation16 + $0x4f0] sm:$0xff]  ;;  %v1312_v62 = vld [vmem:[#allocation16 + $0x520] sm:$0xff] }
 0x5c0   : > { %v6356_v28 = vpop.f32.mrb[5].mxu1  ;;  %4960 = vmatprep.subr.bf16.mxu0 %v4959_v11  ;;  %v4785_v11 = vpack.c.bf16 %v1264_v2, %v1258_v1  ;;  %v1319_v1 = vld [vmem:[#allocation16 + $0x558] sm:$0xff]  ;;  %v1325_v2 = vld [vmem:[#allocation16 + $0x588] sm:$0xff] }
 0x5c1   : > { %4770 = vmatpush1.bf16.msra.mxu1 %v4769_v14  ;;  %v4787_v14 = vpack.c.bf16 %v1277_v6, %v1271_v4  ;;  %v1308_v4 = vld [vmem:[#allocation16 + $0x500] sm:$0xff]  ;;  %v1314_v6 = vld [vmem:[#allocation16 + $0x530] sm:$0xff] }
 0x5c2   : > { %4772 = vmatprep.subr.bf16.mxu1 %v4771_v17  ;;  %v4977_v17 = vpack.c.bf16 %v1266_v10, %v1260_v8  ;;  %v1321_v8 = vld [vmem:[#allocation16 + $0x568] sm:$0xff]  ;;  %v1327_v10 = vld [vmem:[#allocation16 + $0x598] sm:$0xff] }
 0x5c3   : > { %4962 = vmatpush1.bf16.msra.mxu0 %v4961_v23  ;;  %v4979_v23 = vpack.c.bf16 %v1279_v13, %v1273_v12  ;;  %v1318_v12 = vld [vmem:[#allocation16 + $0x550] sm:$0xff]  ;;  %v1324_v13 = vld [vmem:[#allocation16 + $0x580] sm:$0xff] }
 0x5c4   : > { %4964 = vmatprep.subr.bf16.mxu0 %v4963_v39  ;;  %v4789_v39 = vpack.c.bf16 %v1276_v16, %v1270_v15  ;;  %v1331_v15 = vld [vmem:[#allocation16 + $0x5b8] sm:$0xff]  ;;  %v1337_v16 = vld [vmem:[#allocation16 + $0x5e8] sm:$0xff] }
 0x5c5   : > { %4774 = vmatpush1.bf16.msra.mxu1 %v4773_v37  ;;  %v4791_v37 = vpack.c.bf16 %v1289_v21, %v1283_v19  ;;  %v1320_v19 = vld [vmem:[#allocation16 + $0x560] sm:$0xff]  ;;  %v1326_v21 = vld [vmem:[#allocation16 + $0x590] sm:$0xff] }
 0x5c6   : > { %4776 = vmatprep.subr.bf16.mxu1 %v4775_v30  ;;  %v4981_v30 = vpack.c.bf16 %v1278_v25, %v1272_v24  ;;  %v1333_v24 = vld [vmem:[#allocation16 + $0x5c8] sm:$0xff]  ;;  %v1339_v25 = vld [vmem:[#allocation16 + $0x5f8] sm:$0xff] }
 0x5c7   : > { %4966 = vmatpush1.bf16.msra.mxu0 %v4965_v44  ;;  %v4983_v44 = vpack.c.bf16 %v1291_v0, %v1285_v41  ;;  %v1330_v41 = vld [vmem:[#allocation16 + $0x5b0] sm:$0xff]  ;;  %v1336_v0 = vld [vmem:[#allocation16 + $0x5e0] sm:$0xff] }
 0x5c8   : > { %4968 = vmatprep.subr.bf16.mxu0 %v4967_v34  ;;  %v4793_v34 = vpack.c.bf16 %v1288_v55, %v1282_v43  ;;  %v1343_v43 = vld [vmem:[#allocation16 + $0x618] sm:$0xff]  ;;  %v1349_v55 = vld [vmem:[#allocation16 + $0x648] sm:$0xff] }
 0x5c9   : > { %4778 = vmatpush1.bf16.msra.mxu1 %v4777_v61  ;;  %v4795_v61 = vpack.c.bf16 %v1301_v42, %v1295_v29  ;;  %v1332_v29 = vld [vmem:[#allocation16 + $0x5c0] sm:$0xff]  ;;  %v1338_v42 = vld [vmem:[#allocation16 + $0x5f0] sm:$0xff] }
 0x5ca   : > { %4780 = vmatprep.subr.bf16.mxu1 %v4779_v5  ;;  %v4985_v5 = vpack.c.bf16 %v1290_v56, %v1284_v46  ;;  %v1345_v46 = vld [vmem:[#allocation16 + $0x628] sm:$0xff]  ;;  %v1351_v56 = vld [vmem:[#allocation16 + $0x658] sm:$0xff] }
 0x5cb   : > { %4970 = vmatpush1.bf16.msra.mxu0 %v4969_v38  ;;  %v4987_v38 = vpack.c.bf16 %v1303_v48, %v1297_v52  ;;  %v1342_v52 = vld [vmem:[#allocation16 + $0x610] sm:$0xff]  ;;  %v1348_v48 = vld [vmem:[#allocation16 + $0x640] sm:$0xff] }
 0x5cc   : > { %4972 = vmatprep.subr.bf16.mxu0 %v4971_v53  ;;  %v4797_v53 = vpack.c.bf16 %v1300_v49, %v1294_v33  ;;  %v1355_v33 = vld [vmem:[#allocation16 + $0x678] sm:$0xff]  ;;  %v1361_v49 = vld [vmem:[#allocation16 + $0x6a8] sm:$0xff] }
 0x5cd   : > { %4782 = vmatpush1.bf16.msra.mxu1 %v4781_v59  ;;  %v4799_v59 = vpack.c.bf16 %v1313_v58, %v1307_v50  ;;  %v1344_v50 = vld [vmem:[#allocation16 + $0x620] sm:$0xff]  ;;  %v1350_v58 = vld [vmem:[#allocation16 + $0x650] sm:$0xff] }
 0x5ce   : > { %4784 = vmatprep.subr.bf16.mxu1 %v4783_v63  ;;  %v4989_v63 = vpack.c.bf16 %v1302_v51, %v1296_v35  ;;  %v1357_v35 = vld [vmem:[#allocation16 + $0x688] sm:$0xff]  ;;  %v1363_v51 = vld [vmem:[#allocation16 + $0x6b8] sm:$0xff] }
 0x5cf   : > { %4974 = vmatpush1.bf16.msra.mxu0 %v4973_v3  ;;  %v4991_v3 = vpack.c.bf16 %v1315_v57, %v1309_v54  ;;  %v1354_v54 = vld [vmem:[#allocation16 + $0x670] sm:$0xff]  ;;  %v1360_v57 = vld [vmem:[#allocation16 + $0x6a0] sm:$0xff] }
 0x5d0   : > { %4976 = vmatprep.subr.bf16.mxu0 %v4975_v7  ;;  %v4801_v7 = vpack.c.bf16 %v1312_v62, %v1306_v60  ;;  %v1367_v60 = vld [vmem:[#allocation16 + $0x6d8] sm:$0xff]  ;;  %v1373_v62 = vld [vmem:[#allocation16 + $0x708] sm:$0xff] }
 0x5d1   : > { %4786 = vmatpush1.bf16.msra.mxu1 %v4785_v11  ;;  %v4803_v11 = vpack.c.bf16 %v1325_v2, %v1319_v1  ;;  %v1356_v1 = vld [vmem:[#allocation16 + $0x680] sm:$0xff]  ;;  %v1362_v2 = vld [vmem:[#allocation16 + $0x6b0] sm:$0xff] }
 0x5d2   : > { %4788 = vmatprep.subr.bf16.mxu1 %v4787_v14  ;;  %v4993_v14 = vpack.c.bf16 %v1314_v6, %v1308_v4  ;;  %v1369_v4 = vld [vmem:[#allocation16 + $0x6e8] sm:$0xff]  ;;  %v1375_v6 = vld [vmem:[#allocation16 + $0x718] sm:$0xff] }
 0x5d3   : > { %4978 = vmatpush1.bf16.msra.mxu0 %v4977_v17  ;;  %v4995_v17 = vpack.c.bf16 %v1327_v10, %v1321_v8  ;;  %v1366_v8 = vld [vmem:[#allocation16 + $0x6d0] sm:$0xff]  ;;  %v1372_v10 = vld [vmem:[#allocation16 + $0x700] sm:$0xff] }
 0x5d4   : > { %4980 = vmatprep.subr.bf16.mxu0 %v4979_v23  ;;  %v4805_v23 = vpack.c.bf16 %v1324_v13, %v1318_v12  ;;  %v1379_v12 = vld [vmem:[#allocation16 + $0x738] sm:$0xff]  ;;  %v1385_v13 = vld [vmem:[#allocation16 + $0x768] sm:$0xff] }
 0x5d5   : > { %4790 = vmatpush1.bf16.msra.mxu1 %v4789_v39  ;;  %v4807_v39 = vpack.c.bf16 %v1337_v16, %v1331_v15  ;;  %v1368_v15 = vld [vmem:[#allocation16 + $0x6e0] sm:$0xff]  ;;  %v1374_v16 = vld [vmem:[#allocation16 + $0x710] sm:$0xff] }
 0x5d6   : > { %4792 = vmatprep.subr.bf16.mxu1 %v4791_v37  ;;  %v4997_v37 = vpack.c.bf16 %v1326_v21, %v1320_v19  ;;  %v1381_v19 = vld [vmem:[#allocation16 + $0x748] sm:$0xff]  ;;  %v1387_v21 = vld [vmem:[#allocation16 + $0x778] sm:$0xff] }
 0x5d7   : > { %4982 = vmatpush1.bf16.msra.mxu0 %v4981_v30  ;;  %v4999_v30 = vpack.c.bf16 %v1339_v25, %v1333_v24  ;;  %v1384_v24 = vld [vmem:[#allocation16 + $0x760] sm:$0xff]  ;;  %v5013_v25 = vpack.c.bf16 %v1374_v16, %v1368_v15  ;;  %v1426_v16 = vld [vmem:[#allocation16 + $0x8b0] sm:$0xff] }
 0x5d8   : > { %4984 = vmatprep.subr.bf16.mxu0 %v4983_v44  ;;  %v4809_v44 = vpack.c.bf16 %v1336_v0, %v1330_v41  ;;  %v1397_v41 = vld [vmem:[#allocation16 + $0x7c8] sm:$0xff]  ;;  %v5015_v0 = vpack.c.bf16 %v1387_v21, %v1381_v19  ;;  %v1439_v21 = vld [vmem:[#allocation16 + $0x918] sm:$0xff] }
 0x5d9   : > { %4794 = vmatpush1.bf16.msra.mxu1 %v4793_v34  ;;  %v4811_v34 = vpack.c.bf16 %v1349_v55, %v1343_v43  ;;  %v1393_v55 = vld [vmem:[#allocation16 + $0x7a8] sm:$0xff] }
 0x5da   : > { %4796 = vmatprep.subr.bf16.mxu1 %v4795_v61  ;;  %v5001_v61 = vpack.c.bf16 %v1338_v42, %v1332_v29  ;;  %v1390_v42 = vld [vmem:[#allocation16 + $0x790] sm:$0xff] }
 0x5db   : > { %4986 = vmatpush1.bf16.msra.mxu0 %v4985_v5  ;;  %v5003_v5 = vpack.c.bf16 %v1351_v56, %v1345_v46  ;;  %v1403_v56 = vld [vmem:[#allocation16 + $0x7f8] sm:$0xff] }
 0x5dc   : > { %4988 = vmatprep.subr.bf16.mxu0 %v4987_v38  ;;  %v4813_v38 = vpack.c.bf16 %v1348_v48, %v1342_v52  ;;  %v1392_v48 = vld [vmem:[#allocation16 + $0x7a0] sm:$0xff] }
 0x5dd   : > { %4798 = vmatpush1.bf16.msra.mxu1 %v4797_v53  ;;  %v4815_v53 = vpack.c.bf16 %v1361_v49, %v1355_v33  ;;  %v1405_v49 = vld [vmem:[#allocation16 + $0x808] sm:$0xff] }
 0x5de   : > { %4800 = vmatprep.subr.bf16.mxu1 %v4799_v59  ;;  %v5005_v59 = vpack.c.bf16 %v1350_v58, %v1344_v50  ;;  %v1402_v58 = vld [vmem:[#allocation16 + $0x7f0] sm:$0xff] }
 0x5df   : > { %4990 = vmatpush1.bf16.msra.mxu0 %v4989_v63  ;;  %v5007_v63 = vpack.c.bf16 %v1363_v51, %v1357_v35  ;;  %v1415_v51 = vld [vmem:[#allocation16 + $0x858] sm:$0xff] }
 0x5e0   : > { %4992 = vmatprep.subr.bf16.mxu0 %v4991_v3  ;;  %v4817_v3 = vpack.c.bf16 %v1360_v57, %v1354_v54  ;;  %v1404_v57 = vld [vmem:[#allocation16 + $0x800] sm:$0xff] }
 0x5e1   : > { %4802 = vmatpush1.bf16.msra.mxu1 %v4801_v7  ;;  %v4819_v7 = vpack.c.bf16 %v1373_v62, %v1367_v60  ;;  %v1417_v62 = vld [vmem:[#allocation16 + $0x868] sm:$0xff] }
 0x5e2   : > { %4804 = vmatprep.subr.bf16.mxu1 %v4803_v11  ;;  %v5009_v11 = vpack.c.bf16 %v1362_v2, %v1356_v1  ;;  %v1414_v2 = vld [vmem:[#allocation16 + $0x850] sm:$0xff] }
 0x5e3   : > { %4994 = vmatpush1.bf16.msra.mxu0 %v4993_v14  ;;  %v5011_v14 = vpack.c.bf16 %v1375_v6, %v1369_v4  ;;  %v1427_v6 = vld [vmem:[#allocation16 + $0x8b8] sm:$0xff] }
 0x5e4   : > { %4996 = vmatprep.subr.bf16.mxu0 %v4995_v17  ;;  %v4821_v17 = vpack.c.bf16 %v1372_v10, %v1366_v8  ;;  %v1416_v10 = vld [vmem:[#allocation16 + $0x860] sm:$0xff] }
 0x5e5   : > { %4806 = vmatpush1.bf16.msra.mxu1 %v4805_v23  ;;  %v1378_v23 = vld [vmem:[#allocation16 + $0x730] sm:$0xff] }
 0x5e6   : > { %4808 = vmatprep.subr.bf16.mxu1 %v4807_v39  ;;  %v1391_v39 = vld [vmem:[#allocation16 + $0x798] sm:$0xff]  ;;  %v4825_v43 = vpack.c.bf16 %v1384_v24, %v1378_v23  ;;  %v1428_v24 = vld [vmem:[#allocation16 + $0x8c0] sm:$0xff] }
 0x5e7   : > { %4998 = vmatpush1.bf16.msra.mxu0 %v4997_v37  ;;  %v1380_v37 = vld [vmem:[#allocation16 + $0x740] sm:$0xff]  ;;  %v4827_v29 = vpack.c.bf16 %v1397_v41, %v1391_v39  ;;  %v1441_v41 = vld [vmem:[#allocation16 + $0x928] sm:$0xff] }
 0x5e8   : > { %5000 = vmatprep.subr.bf16.mxu0 %v4999_v30  ;;  %v1399_v30 = vld [vmem:[#allocation16 + $0x7d8] sm:$0xff] }
 0x5e9   : > { %4810 = vmatpush1.bf16.msra.mxu1 %v4809_v44  ;;  %v1396_v44 = vld [vmem:[#allocation16 + $0x7c0] sm:$0xff]  ;;  %v5019_v52 = vpack.c.bf16 %v1399_v30, %v1393_v55  ;;  %v1451_v30 = vld [vmem:[#allocation16 + $0x978] sm:$0xff] }
 0x5ea   : > { %4812 = vmatprep.subr.bf16.mxu1 %v4811_v34  ;;  %v1409_v34 = vld [vmem:[#allocation16 + $0x828] sm:$0xff]  ;;  %v4829_v33 = vpack.c.bf16 %v1396_v44, %v1390_v42  ;;  %v1440_v44 = vld [vmem:[#allocation16 + $0x920] sm:$0xff] }
 0x5eb   : > { %5002 = vmatpush1.bf16.msra.mxu0 %v5001_v61  ;;  %v1398_v61 = vld [vmem:[#allocation16 + $0x7d0] sm:$0xff]  ;;  %v4831_v50 = vpack.c.bf16 %v1409_v34, %v1403_v56  ;;  %v1453_v34 = vld [vmem:[#allocation16 + $0x988] sm:$0xff] }
 0x5ec   : > { %5004 = vmatprep.subr.bf16.mxu0 %v5003_v5  ;;  %3217 = vmatmul.mubr.f32.vlgmr.msra.gmra.mrb[6].mxu1 %v6329_v20  ;;  %v1411_v5 = vld [vmem:[#allocation16 + $0x838] sm:$0xff]  ;;  %v5021_v35 = vpack.c.bf16 %v1398_v61, %v1392_v48  ;;  %v1450_v61 = vld [vmem:[#allocation16 + $0x970] sm:$0xff] }
 0x5ed   : > { %4814 = vmatpush1.bf16.msra.mxu1 %v4813_v38  ;;  %3287 = vmatprep.mubr.f32.mxu1 %v6331_v27  ;;  %v1408_v38 = vld [vmem:[#allocation16 + $0x820] sm:$0xff]  ;;  %v5023_v54 = vpack.c.bf16 %v1411_v5, %v1405_v49  ;;  %v1463_v5 = vld [vmem:[#allocation16 + $0x9d8] sm:$0xff] }
 0x5ee   : > { %3430 = vmatmul.mubr.f32.vlgmr.msra.gmra.mrb[4].mxu0 %v6329_v20  ;;  %4816 = vmatprep.subr.bf16.mxu1 %v4815_v53  ;;  %v4823_v20 = vpack.c.bf16 %v1385_v13, %v1379_v12  ;;  %v1421_v53 = vld [vmem:[#allocation16 + $0x888] sm:$0xff]  ;;  %v4833_v60 = vpack.c.bf16 %v1408_v38, %v1402_v58  ;;  %v1452_v38 = vld [vmem:[#allocation16 + $0x980] sm:$0xff] }
 0x5ef   : > { %5006 = vmatpush1.bf16.msra.mxu0 %v5005_v59  ;;  %3500 = vmatprep.mubr.f32.mxu0 %v6331_v27  ;;  %v1386_v27 = vld [vmem:[#allocation16 + $0x770] sm:$0xff]  ;;  %v4835_v1 = vpack.c.bf16 %v1421_v53, %v1415_v51  ;;  %v1429_v13 = vld [vmem:[#allocation16 + $0x8c8] sm:$0xff] }
 0x5f0   : > { %5008 = vmatprep.subr.bf16.mxu0 %v5007_v63  ;;  %v5017_v46 = vpack.c.bf16 %v1386_v27, %v1380_v37  ;;  %v1410_v59 = vld [vmem:[#allocation16 + $0x830] sm:$0xff]  ;;  %v1423_v63 = vld [vmem:[#allocation16 + $0x898] sm:$0xff]  ;;  %v1465_v53 = vld [vmem:[#allocation16 + $0x9e8] sm:$0xff] }
 0x5f1   : > { %4818 = vmatpush1.bf16.msra.mxu1 %v4817_v3  ;;  %v1420_v3 = vld [vmem:[#allocation16 + $0x880] sm:$0xff]  ;;  %v5025_v4 = vpack.c.bf16 %v1410_v59, %v1404_v57  ;;  %v5027_v8 = vpack.c.bf16 %v1423_v63, %v1417_v62  ;;  %v1438_v27 = vld [vmem:[#allocation16 + $0x910] sm:$0xff]  ;;  %v1475_v63 = vld [vmem:[#allocation16 + $0xa38] sm:$0xff] }
 0x5f2   : > { %4820 = vmatprep.subr.bf16.mxu1 %v4819_v7  ;;  %v1433_v7 = vld [vmem:[#allocation16 + $0x8e8] sm:$0xff]  ;;  %v4837_v12 = vpack.c.bf16 %v1420_v3, %v1414_v2  ;;  %v1462_v59 = vld [vmem:[#allocation16 + $0x9d0] sm:$0xff]  ;;  %v1464_v3 = vld [vmem:[#allocation16 + $0x9e0] sm:$0xff] }
 0x5f3   : > { %5010 = vmatpush1.bf16.msra.mxu0 %v5009_v11  ;;  %v1422_v11 = vld [vmem:[#allocation16 + $0x890] sm:$0xff]  ;;  %v4839_v15 = vpack.c.bf16 %v1433_v7, %v1427_v6  ;;  %v1477_v7 = vld [vmem:[#allocation16 + $0xa48] sm:$0xff] }
 0x5f4   : > { %5012 = vmatprep.subr.bf16.mxu0 %v5011_v14  ;;  %v1435_v14 = vld [vmem:[#allocation16 + $0x8f8] sm:$0xff]  ;;  %v5029_v19 = vpack.c.bf16 %v1422_v11, %v1416_v10  ;;  %v1474_v11 = vld [vmem:[#allocation16 + $0xa30] sm:$0xff] }
 0x5f5   : > { %4822 = vmatpush1.bf16.msra.mxu1 %v4821_v17  ;;  %v1432_v17 = vld [vmem:[#allocation16 + $0x8e0] sm:$0xff]  ;;  %v5031_v23 = vpack.c.bf16 %v1435_v14, %v1429_v13  ;;  %v1487_v14 = vld [vmem:[#allocation16 + $0xa98] sm:$0xff] }
 0x5f6   : > { %4824 = vmatprep.subr.bf16.mxu1 %v4823_v20  ;;  %v1445_v20 = vld [vmem:[#allocation16 + $0x948] sm:$0xff]  ;;  %v4841_v39 = vpack.c.bf16 %v1432_v17, %v1426_v16  ;;  %v1476_v17 = vld [vmem:[#allocation16 + $0xa40] sm:$0xff] }
 0x5f7   : > { %5014 = vmatpush1.bf16.msra.mxu0 %v5013_v25  ;;  %v1434_v25 = vld [vmem:[#allocation16 + $0x8f0] sm:$0xff]  ;;  %v4843_v37 = vpack.c.bf16 %v1445_v20, %v1439_v21  ;;  %v1489_v20 = vld [vmem:[#allocation16 + $0xaa8] sm:$0xff] }
 0x5f8   : > { %5016 = vmatprep.subr.bf16.mxu0 %v5015_v0  ;;  %v1447_v0 = vld [vmem:[#allocation16 + $0x958] sm:$0xff]  ;;  %v5033_v55 = vpack.c.bf16 %v1434_v25, %v1428_v24  ;;  %v1486_v25 = vld [vmem:[#allocation16 + $0xa90] sm:$0xff] }
 0x5f9   : > { %4826 = vmatpush1.bf16.msra.mxu1 %v4825_v43  ;;  %v1444_v43 = vld [vmem:[#allocation16 + $0x940] sm:$0xff]  ;;  %v5035_v42 = vpack.c.bf16 %v1447_v0, %v1441_v41  ;;  %v1499_v0 = vld [vmem:[#allocation16 + $0xaf8] sm:$0xff] }
 0x5fa   : > { %4828 = vmatprep.subr.bf16.mxu1 %v4827_v29  ;;  %v1457_v29 = vld [vmem:[#allocation16 + $0x9a8] sm:$0xff]  ;;  %v4845_v56 = vpack.c.bf16 %v1444_v43, %v1438_v27  ;;  %v1488_v43 = vld [vmem:[#allocation16 + $0xaa0] sm:$0xff] }
 0x5fb   : > { %5018 = vmatpush1.bf16.msra.mxu0 %v5017_v46  ;;  %v1446_v46 = vld [vmem:[#allocation16 + $0x950] sm:$0xff]  ;;  %v4847_v48 = vpack.c.bf16 %v1457_v29, %v1451_v30  ;;  %v1501_v29 = vld [vmem:[#allocation16 + $0xb08] sm:$0xff] }
 0x5fc   : > { %5020 = vmatprep.subr.bf16.mxu0 %v5019_v52  ;;  %v1459_v52 = vld [vmem:[#allocation16 + $0x9b8] sm:$0xff]  ;;  %v5037_v49 = vpack.c.bf16 %v1446_v46, %v1440_v44  ;;  %v1498_v46 = vld [vmem:[#allocation16 + $0xaf0] sm:$0xff] }
 0x5fd   : > { %4830 = vmatpush1.bf16.msra.mxu1 %v4829_v33  ;;  %v1456_v33 = vld [vmem:[#allocation16 + $0x9a0] sm:$0xff]  ;;  %v5039_v58 = vpack.c.bf16 %v1459_v52, %v1453_v34  ;;  %v1511_v52 = vld [vmem:[#allocation16 + $0xb58] sm:$0xff] }
 0x5fe   : > { %4832 = vmatprep.subr.bf16.mxu1 %v4831_v50  ;;  %v1469_v50 = vld [vmem:[#allocation16 + $0xa08] sm:$0xff]  ;;  %v4849_v51 = vpack.c.bf16 %v1456_v33, %v1450_v61  ;;  %v1500_v33 = vld [vmem:[#allocation16 + $0xb00] sm:$0xff] }
 0x5ff   : > { %5022 = vmatpush1.bf16.msra.mxu0 %v5021_v35  ;;  %v1458_v35 = vld [vmem:[#allocation16 + $0x9b0] sm:$0xff]  ;;  %v4851_v57 = vpack.c.bf16 %v1469_v50, %v1463_v5  ;;  %v1513_v50 = vld [vmem:[#allocation16 + $0xb68] sm:$0xff] }
 0x600   : > { %5024 = vmatprep.subr.bf16.mxu0 %v5023_v54  ;;  %v1471_v54 = vld [vmem:[#allocation16 + $0xa18] sm:$0xff]  ;;  %v5041_v62 = vpack.c.bf16 %v1458_v35, %v1452_v38  ;;  %v1510_v35 = vld [vmem:[#allocation16 + $0xb50] sm:$0xff] }
 0x601   : > { %4834 = vmatpush1.bf16.msra.mxu1 %v4833_v60  ;;  %v1468_v60 = vld [vmem:[#allocation16 + $0xa00] sm:$0xff]  ;;  %v5043_v2 = vpack.c.bf16 %v1471_v54, %v1465_v53  ;;  %v1523_v54 = vld [vmem:[#allocation16 + $0xbb8] sm:$0xff] }
 0x602   : > { %4836 = vmatprep.subr.bf16.mxu1 %v4835_v1  ;;  %v1481_v1 = vld [vmem:[#allocation16 + $0xa68] sm:$0xff]  ;;  %v4853_v6 = vpack.c.bf16 %v1468_v60, %v1462_v59  ;;  %v1512_v60 = vld [vmem:[#allocation16 + $0xb60] sm:$0xff] }
 0x603   : > { %5026 = vmatpush1.bf16.msra.mxu0 %v5025_v4  ;;  %v1470_v4 = vld [vmem:[#allocation16 + $0xa10] sm:$0xff]  ;;  %v4855_v10 = vpack.c.bf16 %v1481_v1, %v1475_v63  ;;  %v1525_v1 = vld [vmem:[#allocation16 + $0xbc8] sm:$0xff] }
 0x604   : > { %5028 = vmatprep.subr.bf16.mxu0 %v5027_v8  ;;  %v1483_v8 = vld [vmem:[#allocation16 + $0xa78] sm:$0xff]  ;;  %v5045_v13 = vpack.c.bf16 %v1470_v4, %v1464_v3  ;;  %v1522_v4 = vld [vmem:[#allocation16 + $0xbb0] sm:$0xff] }
 0x605   : > { %4838 = vmatpush1.bf16.msra.mxu1 %v4837_v12  ;;  %v1480_v12 = vld [vmem:[#allocation16 + $0xa60] sm:$0xff]  ;;  %v5047_v16 = vpack.c.bf16 %v1483_v8, %v1477_v7  ;;  %v1535_v8 = vld [vmem:[#allocation16 + $0xc18] sm:$0xff] }
 0x606   : > { %4840 = vmatprep.subr.bf16.mxu1 %v4839_v15  ;;  %v1493_v15 = vld [vmem:[#allocation16 + $0xac8] sm:$0xff]  ;;  %v4857_v21 = vpack.c.bf16 %v1480_v12, %v1474_v11  ;;  %v1524_v12 = vld [vmem:[#allocation16 + $0xbc0] sm:$0xff] }
 0x607   : > { %5030 = vmatpush1.bf16.msra.mxu0 %v5029_v19  ;;  %v1482_v19 = vld [vmem:[#allocation16 + $0xa70] sm:$0xff]  ;;  %v4859_v24 = vpack.c.bf16 %v1493_v15, %v1487_v14  ;;  %v1537_v15 = vld [vmem:[#allocation16 + $0xc28] sm:$0xff] }
 0x608   : > { %5032 = vmatprep.subr.bf16.mxu0 %v5031_v23  ;;  %v1495_v23 = vld [vmem:[#allocation16 + $0xad8] sm:$0xff]  ;;  %v5049_v41 = vpack.c.bf16 %v1482_v19, %v1476_v17  ;;  %v1534_v19 = vld [vmem:[#allocation16 + $0xc10] sm:$0xff] }
 0x609   : > { %4842 = vmatpush1.bf16.msra.mxu1 %v4841_v39  ;;  %v1492_v39 = vld [vmem:[#allocation16 + $0xac0] sm:$0xff]  ;;  %v5051_v27 = vpack.c.bf16 %v1495_v23, %v1489_v20  ;;  %v1547_v23 = vld [vmem:[#allocation16 + $0xc78] sm:$0xff] }
 0x60a   : > { %4844 = vmatprep.subr.bf16.mxu1 %v4843_v37  ;;  %v1505_v37 = vld [vmem:[#allocation16 + $0xb28] sm:$0xff]  ;;  %v4861_v30 = vpack.c.bf16 %v1492_v39, %v1486_v25  ;;  %v1536_v39 = vld [vmem:[#allocation16 + $0xc20] sm:$0xff] }
 0x60b   : > { %5034 = vmatpush1.bf16.msra.mxu0 %v5033_v55  ;;  %v1494_v55 = vld [vmem:[#allocation16 + $0xad0] sm:$0xff]  ;;  %v4863_v44 = vpack.c.bf16 %v1505_v37, %v1499_v0  ;;  %v1549_v37 = vld [vmem:[#allocation16 + $0xc88] sm:$0xff] }
 0x60c   : > { %5036 = vmatprep.subr.bf16.mxu0 %v5035_v42  ;;  %v1507_v42 = vld [vmem:[#allocation16 + $0xb38] sm:$0xff]  ;;  %v5053_v34 = vpack.c.bf16 %v1494_v55, %v1488_v43  ;;  %v1546_v55 = vld [vmem:[#allocation16 + $0xc70] sm:$0xff] }
 0x60d   : > { %4846 = vmatpush1.bf16.msra.mxu1 %v4845_v56  ;;  %v1504_v56 = vld [vmem:[#allocation16 + $0xb20] sm:$0xff]  ;;  %v5055_v61 = vpack.c.bf16 %v1507_v42, %v1501_v29  ;;  %v1559_v42 = vld [vmem:[#allocation16 + $0xcd8] sm:$0xff] }
 0x60e   : > { %4848 = vmatprep.subr.bf16.mxu1 %v4847_v48  ;;  %v1517_v48 = vld [vmem:[#allocation16 + $0xb88] sm:$0xff]  ;;  %v4865_v5 = vpack.c.bf16 %v1504_v56, %v1498_v46  ;;  %v1548_v56 = vld [vmem:[#allocation16 + $0xc80] sm:$0xff] }
 0x60f   : > { %5038 = vmatpush1.bf16.msra.mxu0 %v5037_v49  ;;  %v1506_v49 = vld [vmem:[#allocation16 + $0xb30] sm:$0xff]  ;;  %v4867_v38 = vpack.c.bf16 %v1517_v48, %v1511_v52  ;;  %v1561_v48 = vld [vmem:[#allocation16 + $0xce8] sm:$0xff] }
 0x610   : > { %5040 = vmatprep.subr.bf16.mxu0 %v5039_v58  ;;  %v1519_v58 = vld [vmem:[#allocation16 + $0xb98] sm:$0xff]  ;;  %v5057_v53 = vpack.c.bf16 %v1506_v49, %v1500_v33  ;;  %v1558_v49 = vld [vmem:[#allocation16 + $0xcd0] sm:$0xff] }
 0x611   : > { %4850 = vmatpush1.bf16.msra.mxu1 %v4849_v51  ;;  %v1516_v51 = vld [vmem:[#allocation16 + $0xb80] sm:$0xff]  ;;  %v5059_v59 = vpack.c.bf16 %v1519_v58, %v1513_v50  ;;  %v1571_v58 = vld [vmem:[#allocation16 + $0xd38] sm:$0xff] }
 0x612   : > { %4852 = vmatprep.subr.bf16.mxu1 %v4851_v57  ;;  %v1529_v57 = vld [vmem:[#allocation16 + $0xbe8] sm:$0xff]  ;;  %v4869_v63 = vpack.c.bf16 %v1516_v51, %v1510_v35  ;;  %v1560_v51 = vld [vmem:[#allocation16 + $0xce0] sm:$0xff] }
 0x613   : > { %5042 = vmatpush1.bf16.msra.mxu0 %v5041_v62  ;;  %v1518_v62 = vld [vmem:[#allocation16 + $0xb90] sm:$0xff]  ;;  %v4871_v3 = vpack.c.bf16 %v1529_v57, %v1523_v54  ;;  %v1573_v57 = vld [vmem:[#allocation16 + $0xd48] sm:$0xff] }
 0x614   : > { %5044 = vmatprep.subr.bf16.mxu0 %v5043_v2  ;;  %v1531_v2 = vld [vmem:[#allocation16 + $0xbf8] sm:$0xff]  ;;  %v5061_v7 = vpack.c.bf16 %v1518_v62, %v1512_v60  ;;  %v1570_v60 = vld [vmem:[#allocation16 + $0xd30] sm:$0xff]  ;;  %v1576_v62 = vld [vmem:[#allocation16 + $0xd60] sm:$0xff] }
 0x615   : > { %4854 = vmatpush1.bf16.msra.mxu1 %v4853_v6  ;;  %v1528_v6 = vld [vmem:[#allocation16 + $0xbe0] sm:$0xff]  ;;  %v5063_v11 = vpack.c.bf16 %v1531_v2, %v1525_v1  ;;  %v1583_v1 = vld [vmem:[#allocation16 + $0xd98] sm:$0xff]  ;;  %v1589_v2 = vld [vmem:[#allocation16 + $0xdc8] sm:$0xff] }
 0x616   : > { %4856 = vmatprep.subr.bf16.mxu1 %v4855_v10  ;;  %v1541_v10 = vld [vmem:[#allocation16 + $0xc48] sm:$0xff]  ;;  %v4873_v14 = vpack.c.bf16 %v1528_v6, %v1522_v4  ;;  %v1572_v4 = vld [vmem:[#allocation16 + $0xd40] sm:$0xff]  ;;  %v4889_v6 = vpack.c.bf16 %v1576_v62, %v1570_v60  ;;  %v1626_v60 = vld [vmem:[#allocation16 + $0xef0] sm:$0xff] }
 0x617   : > { %5046 = vmatpush1.bf16.msra.mxu0 %v5045_v13  ;;  %v1530_v13 = vld [vmem:[#allocation16 + $0xbf0] sm:$0xff]  ;;  %v4875_v17 = vpack.c.bf16 %v1541_v10, %v1535_v8  ;;  %v1591_v8 = vld [vmem:[#allocation16 + $0xdd8] sm:$0xff]  ;;  %v4891_v10 = vpack.c.bf16 %v1589_v2, %v1583_v1 }
 0x618   : > { %5048 = vmatprep.subr.bf16.mxu0 %v5047_v16  ;;  %v1543_v16 = vld [vmem:[#allocation16 + $0xc58] sm:$0xff]  ;;  %v5065_v20 = vpack.c.bf16 %v1530_v13, %v1524_v12  ;;  %v1588_v12 = vld [vmem:[#allocation16 + $0xdc0] sm:$0xff] }
 0x619   : > { %4858 = vmatpush1.bf16.msra.mxu1 %v4857_v21  ;;  %v1540_v21 = vld [vmem:[#allocation16 + $0xc40] sm:$0xff]  ;;  %v5067_v25 = vpack.c.bf16 %v1543_v16, %v1537_v15  ;;  %v1601_v15 = vld [vmem:[#allocation16 + $0xe28] sm:$0xff]  ;;  %v1639_v1 = vld [vmem:[#allocation16 + $0xf58] sm:$0xff] }
 0x61a   : > { %4860 = vmatprep.subr.bf16.mxu1 %v4859_v24  ;;  %v1553_v24 = vld [vmem:[#allocation16 + $0xca8] sm:$0xff]  ;;  %v4877_v0 = vpack.c.bf16 %v1540_v21, %v1534_v19  ;;  %v1590_v19 = vld [vmem:[#allocation16 + $0xdd0] sm:$0xff] }
 0x61b   : > { %5050 = vmatpush1.bf16.msra.mxu0 %v5049_v41  ;;  %v1542_v41 = vld [vmem:[#allocation16 + $0xc50] sm:$0xff]  ;;  %v4879_v43 = vpack.c.bf16 %v1553_v24, %v1547_v23  ;;  %v1603_v23 = vld [vmem:[#allocation16 + $0xe38] sm:$0xff] }
 0x61c   : > { %5052 = vmatprep.subr.bf16.mxu0 %v5051_v27  ;;  %v1555_v27 = vld [vmem:[#allocation16 + $0xcb8] sm:$0xff]  ;;  %v5069_v29 = vpack.c.bf16 %v1542_v41, %v1536_v39  ;;  %v1600_v39 = vld [vmem:[#allocation16 + $0xe20] sm:$0xff] }
 0x61d   : > { %4862 = vmatpush1.bf16.msra.mxu1 %v4861_v30  ;;  %v1552_v30 = vld [vmem:[#allocation16 + $0xca0] sm:$0xff]  ;;  %v5071_v46 = vpack.c.bf16 %v1555_v27, %v1549_v37  ;;  %v1613_v37 = vld [vmem:[#allocation16 + $0xe88] sm:$0xff] }
 0x61e   : > { %4864 = vmatprep.subr.bf16.mxu1 %v4863_v44  ;;  %v1565_v44 = vld [vmem:[#allocation16 + $0xd08] sm:$0xff]  ;;  %v4881_v52 = vpack.c.bf16 %v1552_v30, %v1546_v55  ;;  %v1602_v55 = vld [vmem:[#allocation16 + $0xe30] sm:$0xff] }
 0x61f   : > { %5054 = vmatpush1.bf16.msra.mxu0 %v5053_v34  ;;  %v1554_v34 = vld [vmem:[#allocation16 + $0xcb0] sm:$0xff]  ;;  %v4883_v33 = vpack.c.bf16 %v1565_v44, %v1559_v42  ;;  %v1615_v42 = vld [vmem:[#allocation16 + $0xe98] sm:$0xff] }
 0x620   : > { %5056 = vmatprep.subr.bf16.mxu0 %v5055_v61  ;;  %v1567_v61 = vld [vmem:[#allocation16 + $0xd18] sm:$0xff]  ;;  %v5073_v50 = vpack.c.bf16 %v1554_v34, %v1548_v56  ;;  %v1612_v56 = vld [vmem:[#allocation16 + $0xe80] sm:$0xff] }
 0x621   : > { %4866 = vmatpush1.bf16.msra.mxu1 %v4865_v5  ;;  %v1564_v5 = vld [vmem:[#allocation16 + $0xd00] sm:$0xff]  ;;  %v5075_v35 = vpack.c.bf16 %v1567_v61, %v1561_v48  ;;  %v1625_v48 = vld [vmem:[#allocation16 + $0xee8] sm:$0xff] }
 0x622   : > { %4868 = vmatprep.subr.bf16.mxu1 %v4867_v38  ;;  %v1577_v38 = vld [vmem:[#allocation16 + $0xd68] sm:$0xff]  ;;  %v4885_v54 = vpack.c.bf16 %v1564_v5, %v1558_v49  ;;  %v1614_v49 = vld [vmem:[#allocation16 + $0xe90] sm:$0xff] }
 0x623   : > { %5058 = vmatpush1.bf16.msra.mxu0 %v5057_v53  ;;  %v1566_v53 = vld [vmem:[#allocation16 + $0xd10] sm:$0xff] }
 0x624   : > { %5060 = vmatprep.subr.bf16.mxu0 %v5059_v59  ;;  %v1579_v59 = vld [vmem:[#allocation16 + $0xd78] sm:$0xff] }
 0x625   : > { %4870 = vmatpush1.bf16.msra.mxu1 %v4869_v63  ;;  %v5077_v63 = vpack.c.bf16 %v1566_v53, %v1560_v51  ;;  %v1624_v51 = vld [vmem:[#allocation16 + $0xee0] sm:$0xff] }
 0x626   : > { %4872 = vmatprep.subr.bf16.mxu1 %v4871_v3  ;;  %v5079_v3 = vpack.c.bf16 %v1579_v59, %v1573_v57  ;;  %v1637_v57 = vld [vmem:[#allocation16 + $0xf48] sm:$0xff] }
 0x627   : > { %5062 = vmatpush1.bf16.msra.mxu0 %v5061_v7  ;;  %v1585_v7 = vld [vmem:[#allocation16 + $0xda8] sm:$0xff] }
 0x628   : > { %5064 = vmatprep.subr.bf16.mxu0 %v5063_v11  ;;  %v1582_v11 = vld [vmem:[#allocation16 + $0xd90] sm:$0xff]  ;;  %v5083_v16 = vpack.c.bf16 %v1591_v8, %v1585_v7  ;;  %v1649_v7 = vld [vmem:[#allocation16 + $0xfa8] sm:$0xff] }
 0x629   : > { %4874 = vmatpush1.bf16.msra.mxu1 %v4873_v14  ;;  %v1595_v14 = vld [vmem:[#allocation16 + $0xdf8] sm:$0xff]  ;;  %v4893_v21 = vpack.c.bf16 %v1588_v12, %v1582_v11  ;;  %v1638_v11 = vld [vmem:[#allocation16 + $0xf50] sm:$0xff] }
 0x62a   : > { %4876 = vmatprep.subr.bf16.mxu1 %v4875_v17  ;;  %v1584_v17 = vld [vmem:[#allocation16 + $0xda0] sm:$0xff]  ;;  %v4895_v24 = vpack.c.bf16 %v1601_v15, %v1595_v14  ;;  %v1651_v14 = vld [vmem:[#allocation16 + $0xfb8] sm:$0xff] }
 0x62b   : > { %5066 = vmatpush1.bf16.msra.mxu0 %v5065_v20  ;;  %v1597_v20 = vld [vmem:[#allocation16 + $0xe08] sm:$0xff]  ;;  %v5085_v41 = vpack.c.bf16 %v1590_v19, %v1584_v17  ;;  %v1648_v17 = vld [vmem:[#allocation16 + $0xfa0] sm:$0xff] }
 0x62c   : > { %5068 = vmatprep.subr.bf16.mxu0 %v5067_v25  ;;  %3288 = vmatmul.mubr.f32.vlgmr.msra.gmra.mrb[6].mxu1 %v6339_v18  ;;  %v1594_v25 = vld [vmem:[#allocation16 + $0xdf0] sm:$0xff]  ;;  %v5087_v27 = vpack.c.bf16 %v1603_v23, %v1597_v20  ;;  %v1661_v20 = vld [vmem:[#allocation16 + $0x1008] sm:$0xff] }
 0x62d   : > { %4878 = vmatpush1.bf16.msra.mxu1 %v4877_v0  ;;  %3358 = vmatprep.mubr.f32.mxu1 %v6341_v26  ;;  %v1607_v0 = vld [vmem:[#allocation16 + $0xe58] sm:$0xff]  ;;  %v4897_v30 = vpack.c.bf16 %v1600_v39, %v1594_v25  ;;  %v1650_v25 = vld [vmem:[#allocation16 + $0xfb0] sm:$0xff] }
 0x62e   : > { %3501 = vmatmul.mubr.f32.vlgmr.msra.gmra.mrb[4].mxu0 %v6339_v18  ;;  %4880 = vmatprep.subr.bf16.mxu1 %v4879_v43  ;;  %v4887_v18 = vpack.c.bf16 %v1577_v38, %v1571_v58  ;;  %v1596_v43 = vld [vmem:[#allocation16 + $0xe00] sm:$0xff]  ;;  %v4899_v44 = vpack.c.bf16 %v1613_v37, %v1607_v0  ;;  %v1627_v58 = vld [vmem:[#allocation16 + $0xef8] sm:$0xff] }
 0x62f   : > { %5070 = vmatpush1.bf16.msra.mxu0 %v5069_v29  ;;  %3571 = vmatprep.mubr.f32.mxu0 %v6341_v26  ;;  %v1578_v26 = vld [vmem:[#allocation16 + $0xd70] sm:$0xff]  ;;  %v1609_v29 = vld [vmem:[#allocation16 + $0xe68] sm:$0xff]  ;;  %v5089_v34 = vpack.c.bf16 %v1602_v55, %v1596_v43  ;;  %v1663_v0 = vld [vmem:[#allocation16 + $0x1018] sm:$0xff] }
 0x630   : > { %5072 = vmatprep.subr.bf16.mxu0 %v5071_v46  ;;  %v5081_v13 = vpack.c.bf16 %v1578_v26, %v1572_v4  ;;  %v1606_v46 = vld [vmem:[#allocation16 + $0xe50] sm:$0xff]  ;;  %v5091_v61 = vpack.c.bf16 %v1615_v42, %v1609_v29  ;;  %v1636_v4 = vld [vmem:[#allocation16 + $0xf40] sm:$0xff]  ;;  %v1673_v29 = vld [vmem:[#allocation16 + $0x1068] sm:$0xff] }
 0x631   : > { %4882 = vmatpush1.bf16.msra.mxu1 %v4881_v52  ;;  %v1619_v52 = vld [vmem:[#allocation16 + $0xeb8] sm:$0xff]  ;;  %v4901_v5 = vpack.c.bf16 %v1612_v56, %v1606_v46  ;;  %v1660_v43 = vld [vmem:[#allocation16 + $0x1000] sm:$0xff]  ;;  %v1662_v46 = vld [vmem:[#allocation16 + $0x1010] sm:$0xff] }
 0x632   : > { %4884 = vmatprep.subr.bf16.mxu1 %v4883_v33  ;;  %v1608_v33 = vld [vmem:[#allocation16 + $0xe60] sm:$0xff]  ;;  %v4903_v38 = vpack.c.bf16 %v1625_v48, %v1619_v52  ;;  %v1675_v52 = vld [vmem:[#allocation16 + $0x1078] sm:$0xff] }
 0x633   : > { %5074 = vmatpush1.bf16.msra.mxu0 %v5073_v50  ;;  %v1621_v50 = vld [vmem:[#allocation16 + $0xec8] sm:$0xff]  ;;  %v5093_v53 = vpack.c.bf16 %v1614_v49, %v1608_v33  ;;  %v1672_v33 = vld [vmem:[#allocation16 + $0x1060] sm:$0xff] }
 0x634   : > { %5076 = vmatprep.subr.bf16.mxu0 %v5075_v35  ;;  %v1618_v35 = vld [vmem:[#allocation16 + $0xeb0] sm:$0xff]  ;;  %v5095_v59 = vpack.c.bf16 %v1627_v58, %v1621_v50  ;;  %v1685_v50 = vld [vmem:[#allocation16 + $0x10c8] sm:$0xff] }
 0x635   : > { %4886 = vmatpush1.bf16.msra.mxu1 %v4885_v54  ;;  %v1631_v54 = vld [vmem:[#allocation16 + $0xf18] sm:$0xff]  ;;  %v4905_v62 = vpack.c.bf16 %v1624_v51, %v1618_v35  ;;  %v1674_v35 = vld [vmem:[#allocation16 + $0x1070] sm:$0xff] }
 0x636   : > { %4888 = vmatprep.subr.bf16.mxu1 %v4887_v18  ;;  %v1620_v18 = vld [vmem:[#allocation16 + $0xec0] sm:$0xff]  ;;  %v4907_v2 = vpack.c.bf16 %v1637_v57, %v1631_v54  ;;  %v1687_v54 = vld [vmem:[#allocation16 + $0x10d8] sm:$0xff] }
 0x637   : > { %5078 = vmatpush1.bf16.msra.mxu0 %v5077_v63  ;;  %v1633_v63 = vld [vmem:[#allocation16 + $0xf28] sm:$0xff]  ;;  %v5097_v26 = vpack.c.bf16 %v1626_v60, %v1620_v18  ;;  %v1684_v18 = vld [vmem:[#allocation16 + $0x10c0] sm:$0xff] }
 0x638   : > { %5080 = vmatprep.subr.bf16.mxu0 %v5079_v3  ;;  %v1630_v3 = vld [vmem:[#allocation16 + $0xf10] sm:$0xff]  ;;  %v5099_v8 = vpack.c.bf16 %v1639_v1, %v1633_v63  ;;  %v1697_v63 = vld [vmem:[#allocation16 + $0x1128] sm:$0xff] }
 0x639   : > { %4890 = vmatpush1.bf16.msra.mxu1 %v4889_v6  ;;  %v1643_v6 = vld [vmem:[#allocation16 + $0xf78] sm:$0xff]  ;;  %v4909_v12 = vpack.c.bf16 %v1636_v4, %v1630_v3  ;;  %v1686_v3 = vld [vmem:[#allocation16 + $0x10d0] sm:$0xff] }
 0x63a   : > { %4892 = vmatprep.subr.bf16.mxu1 %v4891_v10  ;;  %v1632_v10 = vld [vmem:[#allocation16 + $0xf20] sm:$0xff]  ;;  %v4911_v15 = vpack.c.bf16 %v1649_v7, %v1643_v6  ;;  %v1699_v6 = vld [vmem:[#allocation16 + $0x1138] sm:$0xff] }
 0x63b   : > { %5082 = vmatpush1.bf16.msra.mxu0 %v5081_v13  ;;  %v1645_v13 = vld [vmem:[#allocation16 + $0xf88] sm:$0xff]  ;;  %v5101_v19 = vpack.c.bf16 %v1638_v11, %v1632_v10  ;;  %v1696_v10 = vld [vmem:[#allocation16 + $0x1120] sm:$0xff] }
 0x63c   : > { %5084 = vmatprep.subr.bf16.mxu0 %v5083_v16  ;;  %v1642_v16 = vld [vmem:[#allocation16 + $0xf70] sm:$0xff]  ;;  %v5103_v23 = vpack.c.bf16 %v1651_v14, %v1645_v13  ;;  %v1709_v13 = vld [vmem:[#allocation16 + $0x1188] sm:$0xff] }
 0x63d   : > { %4894 = vmatpush1.bf16.msra.mxu1 %v4893_v21  ;;  %v1655_v21 = vld [vmem:[#allocation16 + $0xfd8] sm:$0xff]  ;;  %v4913_v39 = vpack.c.bf16 %v1648_v17, %v1642_v16  ;;  %v1698_v16 = vld [vmem:[#allocation16 + $0x1130] sm:$0xff] }
 0x63e   : > { %4896 = vmatprep.subr.bf16.mxu1 %v4895_v24  ;;  %v1644_v24 = vld [vmem:[#allocation16 + $0xf80] sm:$0xff]  ;;  %v4915_v37 = vpack.c.bf16 %v1661_v20, %v1655_v21  ;;  %v1711_v21 = vld [vmem:[#allocation16 + $0x1198] sm:$0xff] }
 0x63f   : > { %5086 = vmatpush1.bf16.msra.mxu0 %v5085_v41  ;;  %v1657_v41 = vld [vmem:[#allocation16 + $0xfe8] sm:$0xff]  ;;  %v5105_v55 = vpack.c.bf16 %v1650_v25, %v1644_v24  ;;  %v1708_v24 = vld [vmem:[#allocation16 + $0x1180] sm:$0xff] }
 0x640   : > { %5088 = vmatprep.subr.bf16.mxu0 %v5087_v27  ;;  %v1654_v27 = vld [vmem:[#allocation16 + $0xfd0] sm:$0xff]  ;;  %v5107_v42 = vpack.c.bf16 %v1663_v0, %v1657_v41  ;;  %v1721_v41 = vld [vmem:[#allocation16 + $0x11e8] sm:$0xff] }
 0x641   : > { %4898 = vmatpush1.bf16.msra.mxu1 %v4897_v30  ;;  %v1667_v30 = vld [vmem:[#allocation16 + $0x1038] sm:$0xff]  ;;  %v4917_v56 = vpack.c.bf16 %v1660_v43, %v1654_v27  ;;  %v1710_v27 = vld [vmem:[#allocation16 + $0x1190] sm:$0xff] }
 0x642   : > { %4900 = vmatprep.subr.bf16.mxu1 %v4899_v44  ;;  %v1656_v44 = vld [vmem:[#allocation16 + $0xfe0] sm:$0xff]  ;;  %v4919_v48 = vpack.c.bf16 %v1673_v29, %v1667_v30  ;;  %v1723_v30 = vld [vmem:[#allocation16 + $0x11f8] sm:$0xff] }
 0x643   : > { %5090 = vmatpush1.bf16.msra.mxu0 %v5089_v34  ;;  %v1669_v34 = vld [vmem:[#allocation16 + $0x1048] sm:$0xff]  ;;  %v5109_v49 = vpack.c.bf16 %v1662_v46, %v1656_v44  ;;  %v1720_v44 = vld [vmem:[#allocation16 + $0x11e0] sm:$0xff] }
 0x644   : > { %5092 = vmatprep.subr.bf16.mxu0 %v5091_v61  ;;  %v1666_v61 = vld [vmem:[#allocation16 + $0x1030] sm:$0xff]  ;;  %v5111_v58 = vpack.c.bf16 %v1675_v52, %v1669_v34  ;;  %v1716_v34 = vld [vmem:[#allocation16 + $0x11c0] sm:$0xff] }
 0x645   : > { %4902 = vmatpush1.bf16.msra.mxu1 %v4901_v5  ;;  %v1679_v5 = vld [vmem:[#allocation16 + $0x1098] sm:$0xff]  ;;  %v4921_v51 = vpack.c.bf16 %v1672_v33, %v1666_v61  ;;  %v1722_v52 = vld [vmem:[#allocation16 + $0x11f0] sm:$0xff]  ;;  %v3578_v33 = vld [vmem:[#allocation19] sm:$0x3f] }
 0x646   : > { %4904 = vmatprep.subr.bf16.mxu1 %v4903_v38  ;;  %v1668_v38 = vld [vmem:[#allocation16 + $0x1040] sm:$0xff]  ;;  %v4923_v57 = vpack.c.bf16 %v1685_v50, %v1679_v5  ;;  %v5129_v61 = vpack.c.bf16 %v1722_v52, %v1716_v34  ;;  %v3587_v50 = vrot.slane %v3578_v33, %v6204_v32  ;;  %v3591_v32 = vrot.slane %v3578_v33, %v6208_v36 }
 0x647   : > { %5094 = vmatpush1.bf16.msra.mxu0 %v5093_v53  ;;  %v1681_v53 = vld [vmem:[#allocation16 + $0x10a8] sm:$0xff]  ;;  %v5113_v60 = vpack.c.bf16 %v1674_v35, %v1668_v38 }
 0x648   : > { %5096 = vmatprep.subr.bf16.mxu0 %v5095_v59  ;;  %v1678_v59 = vld [vmem:[#allocation16 + $0x1090] sm:$0xff]  ;;  %v5115_v1 = vpack.c.bf16 %v1687_v54, %v1681_v53 }
 0x649   : > { %4906 = vmatpush1.bf16.msra.mxu1 %v4905_v62  ;;  %v1691_v62 = vld [vmem:[#allocation16 + $0x10f8] sm:$0xff]  ;;  %v4925_v4 = vpack.c.bf16 %v1684_v18, %v1678_v59 }
 0x64a   : > { %4908 = vmatprep.subr.bf16.mxu1 %v4907_v2  ;;  %v1680_v2 = vld [vmem:[#allocation16 + $0x10a0] sm:$0xff]  ;;  %v4927_v7 = vpack.c.bf16 %v1697_v63, %v1691_v62 }
 0x64b   : > { %5098 = vmatpush1.bf16.msra.mxu0 %v5097_v26  ;;  %v1693_v26 = vld [vmem:[#allocation16 + $0x1108] sm:$0xff]  ;;  %v5117_v11 = vpack.c.bf16 %v1686_v3, %v1680_v2  ;;  %v3603_v2 = vrot.slane %v3578_v33, %v6226_v47 }
 0x64c   : > { %5100 = vmatprep.subr.bf16.mxu0 %v5099_v8  ;;  %v1690_v8 = vld [vmem:[#allocation16 + $0x10f0] sm:$0xff]  ;;  %v5119_v14 = vpack.c.bf16 %v1699_v6, %v1693_v26 }
 0x64d   : > { %4910 = vmatpush1.bf16.msra.mxu1 %v4909_v12  ;;  %v1703_v12 = vld [vmem:[#allocation16 + $0x1158] sm:$0xff]  ;;  %v4929_v17 = vpack.c.bf16 %v1696_v10, %v1690_v8 }
 0x64e   : > { %4912 = vmatprep.subr.bf16.mxu1 %v4911_v15  ;;  %v1692_v15 = vld [vmem:[#allocation16 + $0x1100] sm:$0xff]  ;;  %v4931_v20 = vpack.c.bf16 %v1709_v13, %v1703_v12 }
 0x64f   : > { %5102 = vmatpush1.bf16.msra.mxu0 %v5101_v19  ;;  %v1705_v19 = vld [vmem:[#allocation16 + $0x1168] sm:$0xff]  ;;  %v5121_v25 = vpack.c.bf16 %v1698_v16, %v1692_v15 }
 0x650   : > { %5104 = vmatprep.subr.bf16.mxu0 %v5103_v23  ;;  %v1702_v23 = vld [vmem:[#allocation16 + $0x1150] sm:$0xff]  ;;  %v5123_v0 = vpack.c.bf16 %v1711_v21, %v1705_v19 }
 0x651   : > { %4914 = vmatpush1.bf16.msra.mxu1 %v4913_v39  ;;  %v1715_v39 = vld [vmem:[#allocation16 + $0x11b8] sm:$0xff]  ;;  %v4933_v43 = vpack.c.bf16 %v1708_v24, %v1702_v23 }
 0x652   : > { %4916 = vmatprep.subr.bf16.mxu1 %v4915_v37  ;;  %v1704_v37 = vld [vmem:[#allocation16 + $0x1160] sm:$0xff]  ;;  %v4935_v29 = vpack.c.bf16 %v1721_v41, %v1715_v39 }
 0x653   : > { %5106 = vmatpush1.bf16.msra.mxu0 %v5105_v55  ;;  %v1717_v55 = vld [vmem:[#allocation16 + $0x11c8] sm:$0xff]  ;;  %v5125_v46 = vpack.c.bf16 %v1710_v27, %v1704_v37 }
 0x654   : > { %5108 = vmatprep.subr.bf16.mxu0 %v5107_v42  ;;  %v1714_v42 = vld [vmem:[#allocation16 + $0x11b0] sm:$0xff] }
 0x655   : > { %4918 = vmatpush1.bf16.msra.mxu1 %v4917_v56  ;;  %v5127_v56 = vpack.c.bf16 %v1723_v30, %v1717_v55  ;;  %v5313_v18 = vld [vmem:[%s6165_s3] sm:$0xff]  ;;  %v5314_v62 = vld [vmem:[%s6165_s3 + $0x8] sm:$0xff]  ;;  %v5315_v13 = vld [vmem:[%s6165_s3 + $0x10] sm:$0xff] }
 0x656   : > { %4920 = vmatprep.subr.bf16.mxu1 %v4919_v48  ;;  %v4937_v48 = vpack.c.bf16 %v1720_v44, %v1714_v42  ;;  %v5316_v16 = vld [vmem:[%s6165_s3 + $0x18] sm:$0xff]  ;;  %v5317_v21 = vld [vmem:[%s6165_s3 + $0x20] sm:$0xff]  ;;  %v5318_v23 = vld [vmem:[%s6165_s3 + $0x28] sm:$0xff]  ;;  %s5637_s3 = scalar_lea.vmem %s5636_s2, 1536 }
 0x657   : > { %5110 = vmatpush1.bf16.msra.mxu0 %v5109_v49  ;;  %v3583_v49 = vrot.slane %v3578_v33, %v6202_v31  ;;  %p5639_p8 = scmp.lt.s32.totalorder %s5637_s3, %s5631_s0 }
 0x658   : > { %5112 = vmatprep.subr.bf16.mxu0 %v5111_v58 }
 0x659   : > { %4922 = vmatpush1.bf16.msra.mxu1 %v4921_v51  ;;  %p5640_p10 = por %p5639_p8, %p5638_p11 }
 0x65a   : > { %4924 = vmatprep.subr.bf16.mxu1 %v4923_v57 }
 0x65b   : > { %5114 = vmatpush1.bf16.msra.mxu0 %v5113_v60  ;;  %p5641_p12 = pnand %p5640_p10, %p5634_p7 }
 0x65c   : > { %5116 = vmatprep.subr.bf16.mxu0 %v5115_v1 }
 0x65d   : > { %4926 = vmatpush1.bf16.msra.mxu1 %v4925_v4 }
 0x65e   : > { %4928 = vmatprep.subr.bf16.mxu1 %v4927_v7 }
 0x65f   : > { %5118 = vmatpush1.bf16.msra.mxu0 %v5117_v11 }
 0x660   : > { %5120 = vmatprep.subr.bf16.mxu0 %v5119_v14 }
 0x661   : > { %4930 = vmatpush1.bf16.msra.mxu1 %v4929_v17 }
 0x662   : > { %4932 = vmatprep.subr.bf16.mxu1 %v4931_v20 }
 0x663   : > { %5122 = vmatpush1.bf16.msra.mxu0 %v5121_v25 }
 0x664   : > { %5124 = vmatprep.subr.bf16.mxu0 %v5123_v0 }
 0x665   : > { %4934 = vmatpush1.bf16.msra.mxu1 %v4933_v43 }
 0x666   : > { %4936 = vmatprep.subr.bf16.mxu1 %v4935_v29 }
 0x667   : > { %5126 = vmatpush1.bf16.msra.mxu0 %v5125_v46 }
 0x668   : > { %5128 = vmatprep.subr.bf16.mxu0 %v5127_v56 }
 0x669   : > { %4938 = vmatpush1.bf16.msra.mxu1 %v4937_v48 }
 0x66b   : > { %5130 = vmatpush1.bf16.msra.mxu0 %v5129_v61 }
 0x66c   : > { %3359 = vmatmul.mubr.f32.vlgmr.msra.gmra.mrb[6].mxu1 %v6348_v9 }
 0x66e   : > { %3572 = vmatmul.mubr.f32.vlgmr.msra.gmra.mrb[4].mxu0 %v6348_v9 }
 0x681   : > { %v3147_v5 = vpop.f32.mrb[6].mxu0 }
 0x682   : > { %v5131_v58 = vadd.f32 %v3147_v5, %v6354_v22  ;;  %v3149_v38 = vpop.f32.mrb[7].mxu0  ;;  %v3595_v22 = vrot.slane %v3578_v33, %v6215_v40 }
 0x683   : > { %v5132_v35 = vadd.f32 %v3149_v38, %v6356_v28  ;;  %v3599_v28 = vrot.slane %v3578_v33, %v6224_v45 }
 0x684   : > { %v3610_v51 = vadd.f32 %v5131_v58, %v3583_v49 }
 0x685   : > { %v3611_v53 = vadd.f32 %v5132_v35, %v3587_v50 }
 0x686   : > { %v3616_v54 = vmax.f32 %v3610_v51, 0.0 }
 0x687   : > { %v3617_v57 = vmax.f32 %v3611_v53, 0.0 }
 0x688   : > { %v3625_v59 = vrot.slane %v3616_v54, %v6202_v31 }
 0x689   : > { %v3629_v9 = vrot.slane %v3617_v57, %v6202_v31 }
 0x68a   : > { %v3646_v60 = vadd.f32 %v5313_v18, %v3625_v59 }
 0x68b   : > { %v3647_v63 = vadd.f32 %v5314_v62, %v3629_v9 }
 0x68c   : > { %3652 = vst [vmem:[%s6378_s30] sm:$0xff] %v3646_v60 }
 0x68d   : > { %3653 = vst [vmem:[%s6378_s30 + $0x8] sm:$0xff] %v3647_v63 }
 0x73f   : > { %v3360_v1 = vpop.f32.mrb[6].mxu1 }
 0x740   : > { %v3612_v3 = vadd.f32 %v3591_v32, %v3360_v1  ;;  %v3362_v4 = vpop.f32.mrb[7].mxu1 }
 0x741   : > { %v3573_v26 = vpop.f32.mrb[4].mxu0  ;;  %v3613_v6 = vadd.f32 %v3595_v22, %v3362_v4 }
 0x742   : > { %v3618_v7 = vmax.f32 %v3612_v3, 0.0  ;;  %v3614_v8 = vadd.f32 %v3599_v28, %v3573_v26  ;;  %v3575_v10 = vpop.f32.mrb[5].mxu0 }
 0x743   : > { %v3619_v36 = vmax.f32 %v3613_v6, 0.0  ;;  %v3615_v40 = vadd.f32 %v3603_v2, %v3575_v10 }
 0x744   : > { %v3633_v45 = vrot.slane %v3618_v7, %v6202_v31  ;;  %v3620_v11 = vmax.f32 %v3614_v8, 0.0 }
 0x745   : > { %v3637_v47 = vrot.slane %v3619_v36, %v6202_v31  ;;  %v3621_v12 = vmax.f32 %v3615_v40, 0.0 }
 0x746   : > { %v3648_v14 = vadd.f32 %v5315_v13, %v3633_v45  ;;  %v3641_v15 = vrot.slane %v3620_v11, %v6202_v31 }
 0x747   : > { %v3649_v17 = vadd.f32 %v5316_v16, %v3637_v47  ;;  %v3645_v19 = vrot.slane %v3621_v12, %v6202_v31 }
 0x748   : > { %3654 = vst [vmem:[%s6378_s30 + $0x10] sm:$0xff] %v3648_v14  ;;  %v3650_v20 = vadd.f32 %v5317_v21, %v3641_v15 }
 0x749   : > { %3655 = vst [vmem:[%s6378_s30 + $0x18] sm:$0xff] %v3649_v17  ;;  %v3651_v24 = vadd.f32 %v5318_v23, %v3645_v19 }
 0x74a   : > { %3656 = vst [vmem:[%s6378_s30 + $0x20] sm:$0xff] %v3650_v20 }
 0x74b   : > { %3657 = vst [vmem:[%s6378_s30 + $0x28] sm:$0xff] %v3651_v24 }
 0x74c   : > { %5644 = shalt.err (!%p5641_p12)
}
 0x74d   : > { %s5645_s13 = scalar_lea.hbm %s6401_s24, 768  ;;  %s5649_s25 = scalar_lea.hbm %s6497_s15, 1536 }
 0x74e   : > { %p5646_p1 = scmp.ne.s32.totalorder %s6401_s24, %s5645_s13  ;;  %p5650_p2 = scmp.lt.u32.totalorder %s6401_s24, %s6497_s15 }
 0x74f   : > { %p5651_p6 = scmp.lt.u32.totalorder %s5649_s25, %s5645_s13  ;;  %p5653_p5 = scmp.lt.u32.totalorder %s5645_s13, %s6401_s24 }
 0x750   : > { %p5647_p13 = pnand %p5646_p1, %p6498_p9 }
 0x751   : > { %p5652_p4 = por %p5651_p6, %p5650_p2 }
 0x752   : > { %p5648_p0 = pneg %p5647_p13 }
 0x753   : > { %p5654_p3 = por %p5653_p5, %p5652_p4 }
 0x755   : > { %p5655_p7 = pnand %p5654_p3, %p5648_p0 }
 0x757   : > { %5658 = shalt.err (!%p5655_p7)
}
 0x758   : > { %5205 = dma.vmem_to_hbm [thread:$0]  (%p6498_p9), %s6403_s27, 768, %s6401_s24, %s3659_s26  }
 0x759 PF: > { %s3685_s23 = sand.u32 1, %s5709_s17   ;;  %p6499_p11 = scmp.ne.s32.totalorder %s6480_s28, 0 }
 0x75a   : > { %p6500_p8 = scmp.ge.s32.totalorder %s5721_s20, 2  ;;  %s3686_s12 = scalar_lea.sflag [#allocation4], %s3685_s23 }
 0x75c   : > { %p5243_p10 = pnand %p6500_p8, %p6499_p11 }
 0x75e   : > { %5704 = dma.done.wait (!%p5243_p10), %s3686_s12, 768  }
 0x75f   : > { %5706 = vsyncadd (!%p5243_p10), %s3686_s12, 4294966528  ;;  %p31_p12 = scmp.ge.s32.totalorder %s6056_s29, 4   ;;  %s6501_s17 = smov %s5713_s18 }
 0x760   : > { %s6502_s18 = smov %s5717_s19  ;;  %s6503_s19 = smov %s6068_s21 }
 0x761   : > { %s6504_s20 = smov %s6056_s29  ;;  %33 = sbr.rel (!%p31_p12) target bundleno = 17 (0x11), region = 158 }
 0x768   :  { %3691 = vsyncpa [#allocation3], 1 }
 0x769   :  { %3693 = vsyncpa [#allocation3 + $0x1], 1 }
 0x76a   :  { %3694 = vsyncpa [#allocation6], 1 }
 0x76b   :  { %3696 = vsyncpa [#allocation6 + $0x1], 1 }
 0x76c   :  { %3697 = vsyncpa [#allocation9], 1 }
 0x76d   :  { %3698 = vsyncpa [#allocation12], 1 }
 0x76e   :  { %3699 = vsyncpa [#allocation15], 1 }
 0x76f   :  { %3700 = vsyncpa [#allocation18], 1 }
 0x770   :  { %3701 = vsyncpa [#allocation4], 1 }
 0x771   :  { %3703 = vsyncpa [#allocation4 + $0x1], 1 }

</bundles_post_ra>
